<compile_context>
chip_gen: v7x
topology: tpu7x:2x2x1
jax: 0.10.0
libtpu: 0.0.40
codegen_flags: <defaults>
</compile_context>

<pallas_src>
import functools

import jax
import jax.numpy as jnp
from jax import lax
from jax.experimental import pallas as pl
from jax.experimental.pallas import tpu as pltpu

BN_EPS = 1e-5
NORM_EPS = 1e-12

LANE = 128        # feature / hidden dims padded to 128-lane multiples
MAX_TILE = 512    # node tile (dst rows == src cols), 256-aligned for the 256-wide MXU
MAX_TE = 512      # decoder edges per tile (lane-dense output)


def _round_up(x, m):
    return (x + m - 1) // m * m


def _pick_tile(n, max_tile=MAX_TILE, align=256):
    """Largest align-multiple tile <= max_tile covering n (amortize per-step overhead)."""
    return int(min(max_tile, max(align, _round_up(n, align))))


# ---------------------------------------------------------------------------
# Pallas kernels
# ---------------------------------------------------------------------------
def sage_layer_kernel(kmap_ref, cnt_ref, adj_ref, xs_ref, xd_ref, wl_ref, bl_ref,
                      wr_ref, gamma_ref, beta_ref, out_ref, acc_ref, *, relu):
    """Fused SAGEConv(sum aggr, L2-normalize) + BatchNorm1d(eval) [+ relu].

    grid = (node_type, dst_tile, src_tile); src_tile is the reduction axis.
    kmap/cnt (scalar prefetch, SMEM): compacted non-empty src-block list per (t, i).
    For node type 1 the adjacency block is accessed transposed (swapped index_map +
    transposed-LHS dot_general), so only one adjacency copy exists in HBM.
    acc_ref: f32 (tile, F_src) neighbor-sum accumulator.
    """
    t = pl.program_id(0)
    i = pl.program_id(1)
    k = pl.program_id(2)

    @pl.when(k == 0)
    def _():
        acc_ref[...] = jnp.zeros_like(acc_ref)

    valid = k < cnt_ref[t, i]   # skip all-zero (incl. padding) adjacency blocks

    @pl.when(jnp.logical_and(valid, t == 0))
    def _():
        # (tile, tile)bf16 @ (tile, F)bf16 -> f32 accumulate
        acc_ref[...] += jnp.dot(adj_ref[...], xs_ref[0],
                                preferred_element_type=jnp.float32)

    @pl.when(jnp.logical_and(valid, t == 1))
    def _():
        # transposed adjacency block: contract adj rows (src) against x_src rows
        acc_ref[...] += lax.dot_general(
            adj_ref[...], xs_ref[0],
            dimension_numbers=(((0,), (0,)), ((), ())),
            preferred_element_type=jnp.float32)

    @pl.when(k == pl.num_programs(2) - 1)
    def _():
        # lin_l in f32 (accuracy of the aggregated sums); lin_r in bf16 -> f32.
        h = (jnp.dot(acc_ref[...], wl_ref[0].astype(jnp.float32),
                     preferred_element_type=jnp.float32)
             + bl_ref[0]
             + jnp.dot(xd_ref[0], wr_ref[0], preferred_element_type=jnp.float32))
        # F.normalize(p=2, dim=-1): h * rsqrt(max(sum(h^2), eps^2))
        ss = jnp.sum(h * h, axis=-1, keepdims=True)
        h = h * lax.rsqrt(jnp.maximum(ss, NORM_EPS * NORM_EPS))
        # BatchNorm1d eval: 1/sqrt(var+eps) folded into gamma_ref
        h = gamma_ref[0] * h + beta_ref[0]
        if relu:
            h = jnp.maximum(h, 0.0)
        out_ref[0] = h.astype(out_ref.dtype)


def edge_decoder_kernel(zu_ref, zm_ref, w1u_ref, w1m_ref, b1_ref,
                        w2_ref, b2_ref, out_ref):
    """cat(zu, zm) @ W1 + b1 -> relu -> w2 -> 5*sigmoid ; lane-dense (1, TE) output.

    Concat realized as split-weight matmul: zu @ W1[:H] + zm @ W1[H:].
    Final projection contracts h's last dim against w2's last dim (no in-kernel h.T).
    """
    h = (jnp.dot(zu_ref[...], w1u_ref[...], preferred_element_type=jnp.float32)
         + jnp.dot(zm_ref[...], w1m_ref[...], preferred_element_type=jnp.float32)
         + b1_ref[...])
    h = jnp.maximum(h, 0.0)
    s = lax.dot_general(w2_ref[...], h,
                        dimension_numbers=(((1,), (1,)), ((), ())),
                        preferred_element_type=jnp.float32) + b2_ref[...]
    out_ref[...] = 5.0 * jax.nn.sigmoid(s)


# ---------------------------------------------------------------------------
# pallas_call wrappers
# ---------------------------------------------------------------------------
def _sage_vmem_limit(tile, f_dim, hid):
    bf, f4 = 2, 4
    per_buf = (tile * tile * bf          # adj
               + 2 * tile * f_dim * bf   # x_src + x_dst views
               + 2 * f_dim * hid * bf    # wl + wr
               + 3 * hid * f4            # bl, gamma, beta
               + tile * hid * bf)        # out
    ws = 2 * per_buf + tile * f_dim * f4  # double-buffered pipeline + f32 accumulator
    # generous margin, capped far below v7x's 64 MiB physical VMEM
    return int(min(max(2 * ws + (4 << 20), 16 << 20), 48 << 20))


def sage_layer(kmap, cnt, adj, x, wl, bl, wr, gamma, beta, *, relu, tile):
    """One fused hetero SAGE layer over both node types.

    x: (2, n_pad, F) stacked activations in dst-type order [movie, user]; the same
    array is passed twice (src view / dst view) with different index_maps.
    Output: (2, n_pad, hid) bf16 in the same dst-type order.
    """
    n_pad = adj.shape[0]
    f_dim = x.shape[2]
    hid = wl.shape[2]
    nb = n_pad // tile

    def adj_map(t_, i, k, km, ct):
        kk = km[t_, i, k]
        row = (1 - t_) * i + t_ * kk
        col = (1 - t_) * kk + t_ * i
        return (row, col)

    def xs_map(t_, i, k, km, ct):
        return (1 - t_, km[t_, i, k], 0)

    def xd_map(t_, i, k, km, ct):
        return (t_, i, 0)

    def w_map(t_, i, k, km, ct):
        return (t_, 0, 0)

    def out_map(t_, i, k, km, ct):
        return (t_, i, 0)

    kernel = functools.partial(sage_layer_kernel, relu=relu)
    return pl.pallas_call(
        kernel,
        out_shape=jax.ShapeDtypeStruct((2, n_pad, hid), jnp.bfloat16),
        grid_spec=pltpu.PrefetchScalarGridSpec(
            num_scalar_prefetch=2,
            grid=(2, nb, nb),
            in_specs=[
                pl.BlockSpec((tile, tile), adj_map),      # adjacency (single copy)
                pl.BlockSpec((1, tile, f_dim), xs_map),   # x as source view
                pl.BlockSpec((1, tile, f_dim), xd_map),   # x as destination view
                pl.BlockSpec((1, f_dim, hid), w_map),     # wl (resident per type)
                pl.BlockSpec((1, 1, hid), w_map),         # bl
                pl.BlockSpec((1, f_dim, hid), w_map),     # wr (resident per type)
                pl.BlockSpec((1, 1, hid), w_map),         # gamma_eff
                pl.BlockSpec((1, 1, hid), w_map),         # beta
            ],
            out_specs=pl.BlockSpec((1, tile, hid), out_map),
            scratch_shapes=[pltpu.VMEM((tile, f_dim), jnp.float32)],
        ),
        compiler_params=pltpu.CompilerParams(
            dimension_semantics=("parallel", "parallel", "arbitrary"),
            vmem_limit_bytes=_sage_vmem_limit(tile, f_dim, hid)),
    )(kmap, cnt, adj, x, x, wl, bl, wr, gamma, beta)


def edge_decoder(zu, zm, w1u, w1m, b1, w2_row, b2, *, te):
    ne_pad, hid = zu.shape
    per_buf = 2 * te * hid * 2 + 2 * hid * hid * 2 + 2 * hid * 4 + 4 + te * 4
    vmem_limit = int(min(max(4 * per_buf + (4 << 20), 16 << 20), 48 << 20))
    out = pl.pallas_call(
        edge_decoder_kernel,
        out_shape=jax.ShapeDtypeStruct((1, ne_pad), jnp.float32),
        grid_spec=pltpu.PrefetchScalarGridSpec(
            num_scalar_prefetch=0,
            grid=(ne_pad // te,),
            in_specs=[
                pl.BlockSpec((te, hid), lambda e: (e, 0)),
                pl.BlockSpec((te, hid), lambda e: (e, 0)),
                pl.BlockSpec((hid, hid), lambda e: (0, 0)),
                pl.BlockSpec((hid, hid), lambda e: (0, 0)),
                pl.BlockSpec((1, hid), lambda e: (0, 0)),
                pl.BlockSpec((1, hid), lambda e: (0, 0)),
                pl.BlockSpec((1, 1), lambda e: (0, 0)),
            ],
            out_specs=pl.BlockSpec((1, te), lambda e: (0, e)),
        ),
        compiler_params=pltpu.CompilerParams(
            dimension_semantics=("parallel",),
            vmem_limit_bytes=vmem_limit),
    )(zu, zm, w1u, w1m, b1, w2_row, b2)
    return out.reshape(-1)


# ---------------------------------------------------------------------------
# Parameter init (deterministic, PyTorch-style uniform(-1/sqrt(fan_in), ..)),
# zero-padded to lane-aligned shapes (padded rows/cols are zero -> exact).
# ---------------------------------------------------------------------------
def _linear_params(key, in_dim, out_dim, bias=True):
    kw, kb = jax.random.split(key)
    bound = 1.0 / jnp.sqrt(jnp.float32(in_dim))
    w_t = jax.random.uniform(kw, (in_dim, out_dim), jnp.float32, -bound, bound)
    b = (jax.random.uniform(kb, (1, out_dim), jnp.float32, -bound, bound)
         if bias else None)
    return w_t, b


def _pad2(x, rows, cols):
    r, c = x.shape
    return jnp.pad(x, ((0, rows - r), (0, cols - c)))


def init_params(key, f_user, f_movie, hidden, f_pad, h_pad):
    keys = jax.random.split(key, 10)
    p = {}
    # layer 1, edge user->movie (dst = movie)
    wl, bl = _linear_params(keys[0], f_user, hidden)
    wr, _ = _linear_params(keys[1], f_movie, hidden, bias=False)
    p["l1_um_wl"] = _pad2(wl, f_pad, h_pad)
    p["l1_um_bl"] = _pad2(bl, 1, h_pad)
    p["l1_um_wr"] = _pad2(wr, f_pad, h_pad)
    # layer 1, edge movie->user (dst = user)
    wl, bl = _linear_params(keys[2], f_movie, hidden)
    wr, _ = _linear_params(keys[3], f_user, hidden, bias=False)
    p["l1_mu_wl"] = _pad2(wl, f_pad, h_pad)
    p["l1_mu_bl"] = _pad2(bl, 1, h_pad)
    p["l1_mu_wr"] = _pad2(wr, f_pad, h_pad)
    # layer 2 (hidden -> hidden)
    wl, bl = _linear_params(keys[4], hidden, hidden)
    wr, _ = _linear_params(keys[5], hidden, hidden, bias=False)
    p["l2_um_wl"] = _pad2(wl, h_pad, h_pad)
    p["l2_um_bl"] = _pad2(bl, 1, h_pad)
    p["l2_um_wr"] = _pad2(wr, h_pad, h_pad)
    wl, bl = _linear_params(keys[6], hidden, hidden)
    wr, _ = _linear_params(keys[7], hidden, hidden, bias=False)
    p["l2_mu_wl"] = _pad2(wl, h_pad, h_pad)
    p["l2_mu_bl"] = _pad2(bl, 1, h_pad)
    p["l2_mu_wr"] = _pad2(wr, h_pad, h_pad)
    # batch norms, eval mode, fresh stats (mean=0, var=1, gamma=1, beta=0):
    # fold 1/sqrt(var + eps) into gamma at trace time, beta stays 0.
    bn_scale = 1.0 / jnp.sqrt(1.0 + BN_EPS)
    gamma_eff = _pad2(jnp.full((1, hidden), bn_scale, jnp.float32), 1, h_pad)
    beta_eff = jnp.zeros((1, h_pad), jnp.float32)
    for name in ("bn1_user", "bn1_movie", "bn2_user", "bn2_movie"):
        p[name + "_g"] = gamma_eff
        p[name + "_b"] = beta_eff
    # edge decoder
    w1, b1 = _linear_params(keys[8], 2 * hidden, hidden)
    p["dec_w1u"] = _pad2(w1[:hidden], h_pad, h_pad)   # half acting on user embedding
    p["dec_w1m"] = _pad2(w1[hidden:], h_pad, h_pad)   # half acting on movie embedding
    p["dec_b1"] = _pad2(b1, 1, h_pad)
    w2, b2 = _linear_params(keys[9], hidden, 1)
    p["dec_w2"] = _pad2(w2.T, 1, h_pad)               # stored as a (1, H) row
    p["dec_b2"] = b2                                   # (1, 1)
    return p


# ---------------------------------------------------------------------------
# Glue: adjacency + block-sparsity map (plain JAX, outside the kernels)
# ---------------------------------------------------------------------------
def build_adj(edge_index_um, n_pad):
    """Single padded dense adjacency (n_pad, n_pad) bf16: rows = movie (dst of type 0),
    cols = user.  Entries are edge multiplicities (small ints, exact in bf16; guard:
    multiplicities > 256 would lose precision).  No transposed copy is materialized."""
    u, m = edge_index_um[0], edge_index_um[1]
    a = jnp.zeros((n_pad, n_pad), jnp.float32).at[m, u].add(1.0)
    return a.astype(jnp.bfloat16)


def build_block_map(adj, tile):
    """Per (node_type, dst_tile): compacted list of non-empty src blocks + count.

    kmap[t, i, k]: the k-th non-empty src block for dst tile i of type t; the tail
    repeats the last valid block so the pipeline skips re-DMA, and the kernel gates
    the matmul with k < cnt[t, i]."""
    n_pad = adj.shape[0]
    nb = n_pad // tile
    nz = (adj != 0).reshape(nb, tile, nb, tile).any(axis=(1, 3))   # (row_blk, col_blk)
    nz2 = jnp.stack([nz, nz.T])                                    # [t, dst_blk, src_blk]
    cnt = jnp.sum(nz2, axis=-1).astype(jnp.int32)                  # (2, nb)
    order = jnp.argsort(jnp.logical_not(nz2).astype(jnp.int32),
                        axis=-1).astype(jnp.int32)                 # non-empty first (stable)
    idx = jnp.arange(nb, dtype=jnp.int32)[None, None, :]
    last = jnp.take_along_axis(order, jnp.maximum(cnt - 1, 0)[..., None], axis=-1)
    kmap = jnp.where(idx < cnt[..., None], order, last)
    return kmap, cnt


# ---------------------------------------------------------------------------
# Full model forward
# ---------------------------------------------------------------------------
def model_forward(params, x_user, x_movie, edge_index_um, edge_label_index):
    n_user, f_user = x_user.shape
    n_movie, f_movie = x_movie.shape
    f_pad = _round_up(max(f_user, f_movie), LANE)
    h_pad = params["dec_b1"].shape[1]

    # TODO(synk): square pad over max(n_user, n_movie); per-type dst/src padding would
    # shrink the output/x_dst traffic further, but padded adjacency blocks are already
    # skipped by the block-sparsity map.
    tile = _pick_tile(max(n_user, n_movie))
    n_pad = _round_up(max(n_user, n_movie), tile)

    # ONE stacked activation tensor, dst-type order: index 0 = movie, 1 = user.
    xm = jnp.pad(x_movie, ((0, n_pad - n_movie), (0, f_pad - f_movie)))
    xu = jnp.pad(x_user, ((0, n_pad - n_user), (0, f_pad - f_user)))
    x0 = jnp.stack([xm, xu]).astype(jnp.bfloat16)                  # (2, n_pad, f_pad)

    adj = build_adj(edge_index_um, n_pad)                          # (n_pad, n_pad) bf16
    kmap, cnt = build_block_map(adj, tile)

    bf = lambda a, b: jnp.stack([a, b]).astype(jnp.bfloat16)
    f32 = lambda a, b: jnp.stack([a, b]).astype(jnp.float32)

    # ---- encoder layer 1 (+ BN + relu; dropout = identity in eval) ----
    # type 0: dst=movie <- src=user ;  type 1: dst=user <- src=movie
    h = sage_layer(
        kmap, cnt, adj, x0,
        bf(params["l1_um_wl"], params["l1_mu_wl"]),
        f32(params["l1_um_bl"], params["l1_mu_bl"]),
        bf(params["l1_um_wr"], params["l1_mu_wr"]),
        f32(params["bn1_movie_g"], params["bn1_user_g"]),
        f32(params["bn1_movie_b"], params["bn1_user_b"]),
        relu=True, tile=tile)                                      # (2, n_pad, h_pad) bf16

    # ---- encoder layer 2 (+ BN, no relu) ----
    z = sage_layer(
        kmap, cnt, adj, h,
        bf(params["l2_um_wl"], params["l2_mu_wl"]),
        f32(params["l2_um_bl"], params["l2_mu_bl"]),
        bf(params["l2_um_wr"], params["l2_mu_wr"]),
        f32(params["bn2_movie_g"], params["bn2_user_g"]),
        f32(params["bn2_movie_b"], params["bn2_user_b"]),
        relu=False, tile=tile)                                     # (2, n_pad, h_pad) bf16
    z_movie, z_user = z[0], z[1]

    # ---- edge decoder ----
    # TODO(synk): edge-label gather stays as XLA glue; an in-kernel DMA gather via
    # scalar-prefetched indices would save one HBM round-trip of the (n_edges, H) copies.
    row, col = edge_label_index
    n_edges = row.shape[0]
    te = int(min(MAX_TE, _round_up(max(n_edges, 1), LANE)))
    ne_pad = _round_up(max(n_edges, te), te)
    row = jnp.pad(row, (0, ne_pad - n_edges))
    col = jnp.pad(col, (0, ne_pad - n_edges))
    zu = jnp.take(z_user, row, axis=0)                             # bf16
    zm = jnp.take(z_movie, col, axis=0)                            # bf16

    out = edge_decoder(zu, zm,
                       params["dec_w1u"].astype(jnp.bfloat16),
                       params["dec_w1m"].astype(jnp.bfloat16),
                       params["dec_b1"], params["dec_w2"], params["dec_b2"],
                       te=te)
    return out[:n_edges]


# ---------------------------------------------------------------------------
if __name__ == "__main__":
    HIDDEN = 32
    N_USER, N_MOVIE = 8, 12
    F_USER, F_MOVIE = 16, 24
    N_EDGES, N_LABEL_EDGES = 24, 6

    root = jax.random.PRNGKey(0)
    k_xu, k_xm, k_eu, k_em, k_lu, k_lm, k_p = jax.random.split(root, 7)

    x_user = jax.random.normal(k_xu, (N_USER, F_USER), jnp.float32)
    x_movie = jax.random.normal(k_xm, (N_MOVIE, F_MOVIE), jnp.float32)
    edge_index_um = jnp.stack([
        jax.random.randint(k_eu, (N_EDGES,), 0, N_USER),
        jax.random.randint(k_em, (N_EDGES,), 0, N_MOVIE),
    ])  # (2, E): row 0 = user idx (src), row 1 = movie idx (dst)
    edge_label_index = jnp.stack([
        jax.random.randint(k_lu, (N_LABEL_EDGES,), 0, N_USER),
        jax.random.randint(k_lm, (N_LABEL_EDGES,), 0, N_MOVIE),
    ])

    F_PAD = _round_up(max(F_USER, F_MOVIE), LANE)
    H_PAD = _round_up(HIDDEN, LANE)
    params = init_params(k_p, F_USER, F_MOVIE, HIDDEN, F_PAD, H_PAD)

    out = jax.jit(model_forward)(params, x_user, x_movie,
                                 edge_index_um, edge_label_index)
    out = jax.block_until_ready(out)
    assert out.shape == (N_LABEL_EDGES,)
    assert bool(jnp.all(jnp.isfinite(out)))
    assert bool(jnp.all((out >= 0.0) & (out <= 5.0)))
    print("KERNEL_OK")
</pallas_src>

<mosaic_0001>
module attributes {stable_mosaic.version = 11 : i64} {
  func.func @sage_layer_kernel(%arg0: i32, %arg1: i32, %arg2: i32, %arg3: memref<2x1x1xi32, #tpu.memory_space<smem>>, %arg4: memref<2x1xi32, #tpu.memory_space<smem>>, %arg5: memref<256x256xbf16, #tpu.memory_space<vmem>>, %arg6: memref<1x256x128xbf16, #tpu.memory_space<vmem>>, %arg7: memref<1x256x128xbf16, #tpu.memory_space<vmem>>, %arg8: memref<1x128x128xbf16, #tpu.memory_space<vmem>>, %arg9: memref<1x1x128xf32, #tpu.memory_space<vmem>>, %arg10: memref<1x128x128xbf16, #tpu.memory_space<vmem>>, %arg11: memref<1x1x128xf32, #tpu.memory_space<vmem>>, %arg12: memref<1x1x128xf32, #tpu.memory_space<vmem>>, %arg13: memref<1x256x128xbf16, #tpu.memory_space<vmem>>, %arg14: memref<256x128xf32, #tpu.memory_space<vmem>>) attributes {dimension_semantics = [#tpu.dimension_semantics<parallel>, #tpu.dimension_semantics<parallel>, #tpu.dimension_semantics<arbitrary>], iteration_bounds = array<i64: 2, 1, 1>, scalar_prefetch = 2 : i64, scratch_operands = 1 : i64, tpu.core_type = #tpu.core_type<tc>, window_params = [{transform_indices = @transform_0, window_bounds = array<i64: 256, 256>}, {transform_indices = @transform_1, window_bounds = array<i64: 1, 256, 128>}, {transform_indices = @transform_2, window_bounds = array<i64: 1, 256, 128>}, {transform_indices = @transform_3, window_bounds = array<i64: 1, 128, 128>}, {transform_indices = @transform_4, window_bounds = array<i64: 1, 1, 128>}, {transform_indices = @transform_5, window_bounds = array<i64: 1, 128, 128>}, {transform_indices = @transform_6, window_bounds = array<i64: 1, 1, 128>}, {transform_indices = @transform_7, window_bounds = array<i64: 1, 1, 128>}, {transform_indices = @transform_8, window_bounds = array<i64: 1, 256, 128>}]} {
    %c0_i32 = arith.constant 0 : i32
    %0 = arith.cmpi eq, %arg2, %c0_i32 : i32
    %1 = arith.extui %0 : i1 to i32
    %c0_i32_0 = arith.constant 0 : i32
    %2 = arith.cmpi ne, %1, %c0_i32_0 : i32
    scf.if %2 {
      %cst = arith.constant 0.000000e+00 : f32
      %18 = vector.broadcast %cst : f32 to vector<256x128xf32>
      %c0 = arith.constant 0 : index
      %c0_6 = arith.constant 0 : index
      %19 = vector.load %arg14[%c0, %c0_6] : memref<256x128xf32, #tpu.memory_space<vmem>>, vector<256x128xf32>
      tpu.vector_store %arg14[%c0, %c0_6], %18 {strides = array<i32>} : memref<256x128xf32, #tpu.memory_space<vmem>>, vector<256x128xf32>,
    } else {
    }
    %3 = arith.index_cast %arg0 : i32 to index
    %4 = arith.index_cast %arg1 : i32 to index
    %5 = memref.load %arg4[%3, %4] : memref<2x1xi32, #tpu.memory_space<smem>>
    %6 = arith.cmpi slt, %arg2, %5 : i32
    %c0_i32_1 = arith.constant 0 : i32
    %7 = arith.cmpi eq, %arg0, %c0_i32_1 : i32
    %8 = arith.andi %6, %7 : i1
    %9 = arith.extui %8 : i1 to i32
    %c0_i32_2 = arith.constant 0 : i32
    %10 = arith.cmpi ne, %9, %c0_i32_2 : i32
    scf.if %10 {
      %c0 = arith.constant 0 : index
      %c0_6 = arith.constant 0 : index
      %18 = vector.load %arg14[%c0, %c0_6] : memref<256x128xf32, #tpu.memory_space<vmem>>, vector<256x128xf32>
      %c0_7 = arith.constant 0 : index
      %c0_8 = arith.constant 0 : index
      %19 = vector.load %arg5[%c0_7, %c0_8] : memref<256x256xbf16, #tpu.memory_space<vmem>>, vector<256x256xbf16>
      %c0_9 = arith.constant 0 : index
      %c0_10 = arith.constant 0 : index
      %c0_11 = arith.constant 0 : index
      %20 = vector.load %arg6[%c0_9, %c0_10, %c0_11] : memref<1x256x128xbf16, #tpu.memory_space<vmem>>, vector<1x256x128xbf16>
      %21 = vector.shape_cast %20 : vector<1x256x128xbf16> to vector<256x128xbf16>
      %cst = arith.constant dense<0.000000e+00> : vector<256x128xf32>
      %22 = tpu.matmul %19, %21, %cst {dimension_numbers = #tpu.dot_dimension_numbers<[1], [0], [0], [1], [0, 0, 1, 1], [], []>} : vector<256x256xbf16>, vector<256x128xbf16>, vector<256x128xf32> -> vector<256x128xf32>
      %23 = arith.addf %18, %22 : vector<256x128xf32>
      %c0_12 = arith.constant 0 : index
      %c0_13 = arith.constant 0 : index
      %24 = vector.load %arg14[%c0_12, %c0_13] : memref<256x128xf32, #tpu.memory_space<vmem>>, vector<256x128xf32>
      tpu.vector_store %arg14[%c0_12, %c0_13], %23 {strides = array<i32>} : memref<256x128xf32, #tpu.memory_space<vmem>>, vector<256x128xf32>,
    } else {
    }
    %c1_i32 = arith.constant 1 : i32
    %11 = arith.cmpi eq, %arg0, %c1_i32 : i32
    %12 = arith.andi %6, %11 : i1
    %13 = arith.extui %12 : i1 to i32
    %c0_i32_3 = arith.constant 0 : i32
    %14 = arith.cmpi ne, %13, %c0_i32_3 : i32
    scf.if %14 {
      %c0 = arith.constant 0 : index
      %c0_6 = arith.constant 0 : index
      %18 = vector.load %arg14[%c0, %c0_6] : memref<256x128xf32, #tpu.memory_space<vmem>>, vector<256x128xf32>
      %c0_7 = arith.constant 0 : index
      %c0_8 = arith.constant 0 : index
      %19 = vector.load %arg5[%c0_7, %c0_8] : memref<256x256xbf16, #tpu.memory_space<vmem>>, vector<256x256xbf16>
      %c0_9 = arith.constant 0 : index
      %c0_10 = arith.constant 0 : index
      %c0_11 = arith.constant 0 : index
      %20 = vector.load %arg6[%c0_9, %c0_10, %c0_11] : memref<1x256x128xbf16, #tpu.memory_space<vmem>>, vector<1x256x128xbf16>
      %21 = vector.shape_cast %20 : vector<1x256x128xbf16> to vector<256x128xbf16>
      %cst = arith.constant dense<0.000000e+00> : vector<256x128xf32>
      %22 = tpu.matmul %19, %21, %cst {dimension_numbers = #tpu.dot_dimension_numbers<[0], [0], [1], [1], [0, 1, 1, 1], [], []>} : vector<256x256xbf16>, vector<256x128xbf16>, vector<256x128xf32> -> vector<256x128xf32>
      %23 = arith.addf %18, %22 : vector<256x128xf32>
      %c0_12 = arith.constant 0 : index
      %c0_13 = arith.constant 0 : index
      %24 = vector.load %arg14[%c0_12, %c0_13] : memref<256x128xf32, #tpu.memory_space<vmem>>, vector<256x128xf32>
      tpu.vector_store %arg14[%c0_12, %c0_13], %23 {strides = array<i32>} : memref<256x128xf32, #tpu.memory_space<vmem>>, vector<256x128xf32>,
    } else {
    }
    %c0_i32_4 = arith.constant 0 : i32
    %15 = arith.cmpi eq, %arg2, %c0_i32_4 : i32
    %16 = arith.extui %15 : i1 to i32
    %c0_i32_5 = arith.constant 0 : i32
    %17 = arith.cmpi ne, %16, %c0_i32_5 : i32
    scf.if %17 {
      %c0 = arith.constant 0 : index
      %c0_6 = arith.constant 0 : index
      %18 = vector.load %arg14[%c0, %c0_6] : memref<256x128xf32, #tpu.memory_space<vmem>>, vector<256x128xf32>
      %c0_7 = arith.constant 0 : index
      %c0_8 = arith.constant 0 : index
      %c0_9 = arith.constant 0 : index
      %19 = vector.load %arg8[%c0_7, %c0_8, %c0_9] : memref<1x128x128xbf16, #tpu.memory_space<vmem>>, vector<1x128x128xbf16>
      %20 = vector.shape_cast %19 : vector<1x128x128xbf16> to vector<128x128xbf16>
      %21 = arith.extf %20 : vector<128x128xbf16> to vector<128x128xf32>
      %cst = arith.constant dense<0.000000e+00> : vector<256x128xf32>
      %22 = tpu.matmul %18, %21, %cst {dimension_numbers = #tpu.dot_dimension_numbers<[1], [0], [0], [1], [0, 0, 1, 1], [], []>} : vector<256x128xf32>, vector<128x128xf32>, vector<256x128xf32> -> vector<256x128xf32>
      %c0_10 = arith.constant 0 : index
      %c0_11 = arith.constant 0 : index
      %c0_12 = arith.constant 0 : index
      %23 = vector.load %arg9[%c0_10, %c0_11, %c0_12] : memref<1x1x128xf32, #tpu.memory_space<vmem>>, vector<1x1x128xf32>
      %24 = vector.shape_cast %23 : vector<1x1x128xf32> to vector<1x128xf32>
      %25 = vector.broadcast %24 : vector<1x128xf32> to vector<256x128xf32>
      %26 = arith.addf %22, %25 : vector<256x128xf32>
      %c0_13 = arith.constant 0 : index
      %c0_14 = arith.constant 0 : index
      %c0_15 = arith.constant 0 : index
      %27 = vector.load %arg7[%c0_13, %c0_14, %c0_15] : memref<1x256x128xbf16, #tpu.memory_space<vmem>>, vector<1x256x128xbf16>
      %28 = vector.shape_cast %27 : vector<1x256x128xbf16> to vector<256x128xbf16>
      %c0_16 = arith.constant 0 : index
      %c0_17 = arith.constant 0 : index
      %c0_18 = arith.constant 0 : index
      %29 = vector.load %arg10[%c0_16, %c0_17, %c0_18] : memref<1x128x128xbf16, #tpu.memory_space<vmem>>, vector<1x128x128xbf16>
      %30 = vector.shape_cast %29 : vector<1x128x128xbf16> to vector<128x128xbf16>
      %cst_19 = arith.constant dense<0.000000e+00> : vector<256x128xf32>
      %31 = tpu.matmul %28, %30, %cst_19 {dimension_numbers = #tpu.dot_dimension_numbers<[1], [0], [0], [1], [0, 0, 1, 1], [], []>} : vector<256x128xbf16>, vector<128x128xbf16>, vector<256x128xf32> -> vector<256x128xf32>
      %32 = arith.addf %26, %31 : vector<256x128xf32>
      %33 = arith.mulf %32, %32 : vector<256x128xf32>
      %cst_20 = arith.constant dense<0.000000e+00> : vector<256xf32>
      %34 = vector.multi_reduction <add>, %33, %cst_20 [1] : vector<256x128xf32> to vector<256xf32>
      %35 = vector.shape_cast %34 : vector<256xf32> to vector<256x1xf32>
      %cst_21 = arith.constant 1.000000e-24 : f32
      %36 = vector.broadcast %cst_21 : f32 to vector<256x1xf32>
      %37 = arith.maximumf %35, %36 : vector<256x1xf32>
      %38 = math.rsqrt %37 : vector<256x1xf32>
      %39 = vector.broadcast %38 : vector<256x1xf32> to vector<256x128xf32>
      %40 = arith.mulf %32, %39 : vector<256x128xf32>
      %c0_22 = arith.constant 0 : index
      %c0_23 = arith.constant 0 : index
      %c0_24 = arith.constant 0 : index
      %41 = vector.load %arg11[%c0_22, %c0_23, %c0_24] : memref<1x1x128xf32, #tpu.memory_space<vmem>>, vector<1x1x128xf32>
      %42 = vector.shape_cast %41 : vector<1x1x128xf32> to vector<1x128xf32>
      %43 = vector.broadcast %42 : vector<1x128xf32> to vector<256x128xf32>
      %44 = arith.mulf %43, %40 : vector<256x128xf32>
      %c0_25 = arith.constant 0 : index
      %c0_26 = arith.constant 0 : index
      %c0_27 = arith.constant 0 : index
      %45 = vector.load %arg12[%c0_25, %c0_26, %c0_27] : memref<1x1x128xf32, #tpu.memory_space<vmem>>, vector<1x1x128xf32>
      %46 = vector.shape_cast %45 : vector<1x1x128xf32> to vector<1x128xf32>
      %47 = vector.broadcast %46 : vector<1x128xf32> to vector<256x128xf32>
      %48 = arith.addf %44, %47 : vector<256x128xf32>
      %49 = arith.truncf %48 : vector<256x128xf32> to vector<256x128xbf16>
      %c0_28 = arith.constant 0 : index
      %c0_29 = arith.constant 0 : index
      %c0_30 = arith.constant 0 : index
      %50 = vector.load %arg13[%c0_28, %c0_29, %c0_30] : memref<1x256x128xbf16, #tpu.memory_space<vmem>>, vector<1x256x128xbf16>
      %51 = vector.shape_cast %50 : vector<1x256x128xbf16> to vector<256x128xbf16>
      %52 = vector.shape_cast %49 : vector<256x128xbf16> to vector<1x256x128xbf16>
      tpu.vector_store %arg13[%c0_28, %c0_29, %c0_30], %52 {strides = array<i32>} : memref<1x256x128xbf16, #tpu.memory_space<vmem>>, vector<1x256x128xbf16>,
    } else {
    }
    return
  }
  func.func @transform_0(%arg0: i32, %arg1: i32, %arg2: i32, %arg3: memref<2x1x1xi32, #tpu.memory_space<smem>>, %arg4: memref<2x1xi32, #tpu.memory_space<smem>>) -> (i32, i32) {
    %0 = arith.index_cast %arg0 : i32 to index
    %1 = arith.index_cast %arg1 : i32 to index
    %2 = arith.index_cast %arg2 : i32 to index
    %3 = memref.load %arg3[%0, %1, %2] : memref<2x1x1xi32, #tpu.memory_space<smem>>
    %c1_i32 = arith.constant 1 : i32
    %4 = arith.subi %c1_i32, %arg0 : i32
    %5 = arith.muli %4, %arg1 : i32
    %6 = arith.muli %arg0, %3 : i32
    %7 = arith.addi %5, %6 : i32
    %c1_i32_0 = arith.constant 1 : i32
    %8 = arith.subi %c1_i32_0, %arg0 : i32
    %9 = arith.muli %8, %3 : i32
    %10 = arith.muli %arg0, %arg1 : i32
    %11 = arith.addi %9, %10 : i32
    %c0_i32 = arith.constant 0 : i32
    return %7, %11 : i32, i32
  }
  func.func @transform_1(%arg0: i32, %arg1: i32, %arg2: i32, %arg3: memref<2x1x1xi32, #tpu.memory_space<smem>>, %arg4: memref<2x1xi32, #tpu.memory_space<smem>>) -> (i32, i32, i32) {
    %c1_i32 = arith.constant 1 : i32
    %0 = arith.subi %c1_i32, %arg0 : i32
    %1 = arith.index_cast %arg0 : i32 to index
    %2 = arith.index_cast %arg1 : i32 to index
    %3 = arith.index_cast %arg2 : i32 to index
    %4 = memref.load %arg3[%1, %2, %3] : memref<2x1x1xi32, #tpu.memory_space<smem>>
    %c0_i32 = arith.constant 0 : i32
    %c0_i32_0 = arith.constant 0 : i32
    return %0, %4, %c0_i32 : i32, i32, i32
  }
  func.func @transform_2(%arg0: i32, %arg1: i32, %arg2: i32, %arg3: memref<2x1x1xi32, #tpu.memory_space<smem>>, %arg4: memref<2x1xi32, #tpu.memory_space<smem>>) -> (i32, i32, i32) {
    %c0_i32 = arith.constant 0 : i32
    %c0_i32_0 = arith.constant 0 : i32
    return %arg0, %arg1, %c0_i32 : i32, i32, i32
  }
  func.func @transform_3(%arg0: i32, %arg1: i32, %arg2: i32, %arg3: memref<2x1x1xi32, #tpu.memory_space<smem>>, %arg4: memref<2x1xi32, #tpu.memory_space<smem>>) -> (i32, i32, i32) {
    %c0_i32 = arith.constant 0 : i32
    %c0_i32_0 = arith.constant 0 : i32
    %c0_i32_1 = arith.constant 0 : i32
    return %arg0, %c0_i32, %c0_i32_0 : i32, i32, i32
  }
  func.func @transform_4(%arg0: i32, %arg1: i32, %arg2: i32, %arg3: memref<2x1x1xi32, #tpu.memory_space<smem>>, %arg4: memref<2x1xi32, #tpu.memory_space<smem>>) -> (i32, i32, i32) {
    %c0_i32 = arith.constant 0 : i32
    %c0_i32_0 = arith.constant 0 : i32
    %c0_i32_1 = arith.constant 0 : i32
    return %arg0, %c0_i32, %c0_i32_0 : i32, i32, i32
  }
  func.func @transform_5(%arg0: i32, %arg1: i32, %arg2: i32, %arg3: memref<2x1x1xi32, #tpu.memory_space<smem>>, %arg4: memref<2x1xi32, #tpu.memory_space<smem>>) -> (i32, i32, i32) {
    %c0_i32 = arith.constant 0 : i32
    %c0_i32_0 = arith.constant 0 : i32
    %c0_i32_1 = arith.constant 0 : i32
    return %arg0, %c0_i32, %c0_i32_0 : i32, i32, i32
  }
  func.func @transform_6(%arg0: i32, %arg1: i32, %arg2: i32, %arg3: memref<2x1x1xi32, #tpu.memory_space<smem>>, %arg4: memref<2x1xi32, #tpu.memory_space<smem>>) -> (i32, i32, i32) {
    %c0_i32 = arith.constant 0 : i32
    %c0_i32_0 = arith.constant 0 : i32
    %c0_i32_1 = arith.constant 0 : i32
    return %arg0, %c0_i32, %c0_i32_0 : i32, i32, i32
  }
  func.func @transform_7(%arg0: i32, %arg1: i32, %arg2: i32, %arg3: memref<2x1x1xi32, #tpu.memory_space<smem>>, %arg4: memref<2x1xi32, #tpu.memory_space<smem>>) -> (i32, i32, i32) {
    %c0_i32 = arith.constant 0 : i32
    %c0_i32_0 = arith.constant 0 : i32
    %c0_i32_1 = arith.constant 0 : i32
    return %arg0, %c0_i32, %c0_i32_0 : i32, i32, i32
  }
  func.func @transform_8(%arg0: i32, %arg1: i32, %arg2: i32, %arg3: memref<2x1x1xi32, #tpu.memory_space<smem>>, %arg4: memref<2x1xi32, #tpu.memory_space<smem>>) -> (i32, i32, i32) {
    %c0_i32 = arith.constant 0 : i32
    %c0_i32_0 = arith.constant 0 : i32
    return %arg0, %arg1, %c0_i32 : i32, i32, i32
  }
}

module attributes {stable_mosaic.version = 11 : i64} {
  func.func @sage_layer_kernel(%arg0: i32, %arg1: i32, %arg2: i32, %arg3: memref<2x1x1xi32, #tpu.memory_space<smem>>, %arg4: memref<2x1xi32, #tpu.memory_space<smem>>, %arg5: memref<256x256xbf16, #tpu.memory_space<vmem>>, %arg6: memref<1x256x128xbf16, #tpu.memory_space<vmem>>, %arg7: memref<1x256x128xbf16, #tpu.memory_space<vmem>>, %arg8: memref<1x128x128xbf16, #tpu.memory_space<vmem>>, %arg9: memref<1x1x128xf32, #tpu.memory_space<vmem>>, %arg10: memref<1x128x128xbf16, #tpu.memory_space<vmem>>, %arg11: memref<1x1x128xf32, #tpu.memory_space<vmem>>, %arg12: memref<1x1x128xf32, #tpu.memory_space<vmem>>, %arg13: memref<1x256x128xbf16, #tpu.memory_space<vmem>>, %arg14: memref<256x128xf32, #tpu.memory_space<vmem>>) attributes {dimension_semantics = [#tpu.dimension_semantics<parallel>, #tpu.dimension_semantics<parallel>, #tpu.dimension_semantics<arbitrary>], iteration_bounds = array<i64: 2, 1, 1>, scalar_prefetch = 2 : i64, scratch_operands = 1 : i64, tpu.core_type = #tpu.core_type<tc>, window_params = [{transform_indices = @transform_0, window_bounds = array<i64: 256, 256>}, {transform_indices = @transform_1, window_bounds = array<i64: 1, 256, 128>}, {transform_indices = @transform_2, window_bounds = array<i64: 1, 256, 128>}, {transform_indices = @transform_3, window_bounds = array<i64: 1, 128, 128>}, {transform_indices = @transform_4, window_bounds = array<i64: 1, 1, 128>}, {transform_indices = @transform_5, window_bounds = array<i64: 1, 128, 128>}, {transform_indices = @transform_6, window_bounds = array<i64: 1, 1, 128>}, {transform_indices = @transform_7, window_bounds = array<i64: 1, 1, 128>}, {transform_indices = @transform_8, window_bounds = array<i64: 1, 256, 128>}]} {
    %c0_i32 = arith.constant 0 : i32
    %0 = arith.cmpi eq, %arg2, %c0_i32 : i32
    %1 = arith.extui %0 : i1 to i32
    %c0_i32_0 = arith.constant 0 : i32
    %2 = arith.cmpi ne, %1, %c0_i32_0 : i32
    scf.if %2 {
      %cst = arith.constant 0.000000e+00 : f32
      %18 = vector.broadcast %cst : f32 to vector<256x128xf32>
      %c0 = arith.constant 0 : index
      %c0_6 = arith.constant 0 : index
      %19 = vector.load %arg14[%c0, %c0_6] : memref<256x128xf32, #tpu.memory_space<vmem>>, vector<256x128xf32>
      tpu.vector_store %arg14[%c0, %c0_6], %18 {strides = array<i32>} : memref<256x128xf32, #tpu.memory_space<vmem>>, vector<256x128xf32>,
    } else {
    }
    %3 = arith.index_cast %arg0 : i32 to index
    %4 = arith.index_cast %arg1 : i32 to index
    %5 = memref.load %arg4[%3, %4] : memref<2x1xi32, #tpu.memory_space<smem>>
    %6 = arith.cmpi slt, %arg2, %5 : i32
    %c0_i32_1 = arith.constant 0 : i32
    %7 = arith.cmpi eq, %arg0, %c0_i32_1 : i32
    %8 = arith.andi %6, %7 : i1
    %9 = arith.extui %8 : i1 to i32
    %c0_i32_2 = arith.constant 0 : i32
    %10 = arith.cmpi ne, %9, %c0_i32_2 : i32
    scf.if %10 {
      %c0 = arith.constant 0 : index
      %c0_6 = arith.constant 0 : index
      %18 = vector.load %arg14[%c0, %c0_6] : memref<256x128xf32, #tpu.memory_space<vmem>>, vector<256x128xf32>
      %c0_7 = arith.constant 0 : index
      %c0_8 = arith.constant 0 : index
      %19 = vector.load %arg5[%c0_7, %c0_8] : memref<256x256xbf16, #tpu.memory_space<vmem>>, vector<256x256xbf16>
      %c0_9 = arith.constant 0 : index
      %c0_10 = arith.constant 0 : index
      %c0_11 = arith.constant 0 : index
      %20 = vector.load %arg6[%c0_9, %c0_10, %c0_11] : memref<1x256x128xbf16, #tpu.memory_space<vmem>>, vector<1x256x128xbf16>
      %21 = vector.shape_cast %20 : vector<1x256x128xbf16> to vector<256x128xbf16>
      %cst = arith.constant dense<0.000000e+00> : vector<256x128xf32>
      %22 = tpu.matmul %19, %21, %cst {dimension_numbers = #tpu.dot_dimension_numbers<[1], [0], [0], [1], [0, 0, 1, 1], [], []>} : vector<256x256xbf16>, vector<256x128xbf16>, vector<256x128xf32> -> vector<256x128xf32>
      %23 = arith.addf %18, %22 : vector<256x128xf32>
      %c0_12 = arith.constant 0 : index
      %c0_13 = arith.constant 0 : index
      %24 = vector.load %arg14[%c0_12, %c0_13] : memref<256x128xf32, #tpu.memory_space<vmem>>, vector<256x128xf32>
      tpu.vector_store %arg14[%c0_12, %c0_13], %23 {strides = array<i32>} : memref<256x128xf32, #tpu.memory_space<vmem>>, vector<256x128xf32>,
    } else {
    }
    %c1_i32 = arith.constant 1 : i32
    %11 = arith.cmpi eq, %arg0, %c1_i32 : i32
    %12 = arith.andi %6, %11 : i1
    %13 = arith.extui %12 : i1 to i32
    %c0_i32_3 = arith.constant 0 : i32
    %14 = arith.cmpi ne, %13, %c0_i32_3 : i32
    scf.if %14 {
      %c0 = arith.constant 0 : index
      %c0_6 = arith.constant 0 : index
      %18 = vector.load %arg14[%c0, %c0_6] : memref<256x128xf32, #tpu.memory_space<vmem>>, vector<256x128xf32>
      %c0_7 = arith.constant 0 : index
      %c0_8 = arith.constant 0 : index
      %19 = vector.load %arg5[%c0_7, %c0_8] : memref<256x256xbf16, #tpu.memory_space<vmem>>, vector<256x256xbf16>
      %c0_9 = arith.constant 0 : index
      %c0_10 = arith.constant 0 : index
      %c0_11 = arith.constant 0 : index
      %20 = vector.load %arg6[%c0_9, %c0_10, %c0_11] : memref<1x256x128xbf16, #tpu.memory_space<vmem>>, vector<1x256x128xbf16>
      %21 = vector.shape_cast %20 : vector<1x256x128xbf16> to vector<256x128xbf16>
      %cst = arith.constant dense<0.000000e+00> : vector<256x128xf32>
      %22 = tpu.matmul %19, %21, %cst {dimension_numbers = #tpu.dot_dimension_numbers<[0], [0], [1], [1], [0, 1, 1, 1], [], []>} : vector<256x256xbf16>, vector<256x128xbf16>, vector<256x128xf32> -> vector<256x128xf32>
      %23 = arith.addf %18, %22 : vector<256x128xf32>
      %c0_12 = arith.constant 0 : index
      %c0_13 = arith.constant 0 : index
      %24 = vector.load %arg14[%c0_12, %c0_13] : memref<256x128xf32, #tpu.memory_space<vmem>>, vector<256x128xf32>
      tpu.vector_store %arg14[%c0_12, %c0_13], %23 {strides = array<i32>} : memref<256x128xf32, #tpu.memory_space<vmem>>, vector<256x128xf32>,
    } else {
    }
    %c0_i32_4 = arith.constant 0 : i32
    %15 = arith.cmpi eq, %arg2, %c0_i32_4 : i32
    %16 = arith.extui %15 : i1 to i32
    %c0_i32_5 = arith.constant 0 : i32
    %17 = arith.cmpi ne, %16, %c0_i32_5 : i32
    scf.if %17 {
      %c0 = arith.constant 0 : index
      %c0_6 = arith.constant 0 : index
      %18 = vector.load %arg14[%c0, %c0_6] : memref<256x128xf32, #tpu.memory_space<vmem>>, vector<256x128xf32>
      %c0_7 = arith.constant 0 : index
      %c0_8 = arith.constant 0 : index
      %c0_9 = arith.constant 0 : index
      %19 = vector.load %arg8[%c0_7, %c0_8, %c0_9] : memref<1x128x128xbf16, #tpu.memory_space<vmem>>, vector<1x128x128xbf16>
      %20 = vector.shape_cast %19 : vector<1x128x128xbf16> to vector<128x128xbf16>
      %21 = arith.extf %20 : vector<128x128xbf16> to vector<128x128xf32>
      %cst = arith.constant dense<0.000000e+00> : vector<256x128xf32>
      %22 = tpu.matmul %18, %21, %cst {dimension_numbers = #tpu.dot_dimension_numbers<[1], [0], [0], [1], [0, 0, 1, 1], [], []>} : vector<256x128xf32>, vector<128x128xf32>, vector<256x128xf32> -> vector<256x128xf32>
      %c0_10 = arith.constant 0 : index
      %c0_11 = arith.constant 0 : index
      %c0_12 = arith.constant 0 : index
      %23 = vector.load %arg9[%c0_10, %c0_11, %c0_12] : memref<1x1x128xf32, #tpu.memory_space<vmem>>, vector<1x1x128xf32>
      %24 = vector.shape_cast %23 : vector<1x1x128xf32> to vector<1x128xf32>
      %25 = vector.broadcast %24 : vector<1x128xf32> to vector<256x128xf32>
      %26 = arith.addf %22, %25 : vector<256x128xf32>
      %c0_13 = arith.constant 0 : index
      %c0_14 = arith.constant 0 : index
      %c0_15 = arith.constant 0 : index
      %27 = vector.load %arg7[%c0_13, %c0_14, %c0_15] : memref<1x256x128xbf16, #tpu.memory_space<vmem>>, vector<1x256x128xbf16>
      %28 = vector.shape_cast %27 : vector<1x256x128xbf16> to vector<256x128xbf16>
      %c0_16 = arith.constant 0 : index
      %c0_17 = arith.constant 0 : index
      %c0_18 = arith.constant 0 : index
      %29 = vector.load %arg10[%c0_16, %c0_17, %c0_18] : memref<1x128x128xbf16, #tpu.memory_space<vmem>>, vector<1x128x128xbf16>
      %30 = vector.shape_cast %29 : vector<1x128x128xbf16> to vector<128x128xbf16>
      %cst_19 = arith.constant dense<0.000000e+00> : vector<256x128xf32>
      %31 = tpu.matmul %28, %30, %cst_19 {dimension_numbers = #tpu.dot_dimension_numbers<[1], [0], [0], [1], [0, 0, 1, 1], [], []>} : vector<256x128xbf16>, vector<128x128xbf16>, vector<256x128xf32> -> vector<256x128xf32>
      %32 = arith.addf %26, %31 : vector<256x128xf32>
      %33 = arith.mulf %32, %32 : vector<256x128xf32>
      %cst_20 = arith.constant dense<0.000000e+00> : vector<256xf32>
      %34 = vector.multi_reduction <add>, %33, %cst_20 [1] : vector<256x128xf32> to vector<256xf32>
      %35 = vector.shape_cast %34 : vector<256xf32> to vector<256x1xf32>
      %cst_21 = arith.constant 1.000000e-24 : f32
      %36 = vector.broadcast %cst_21 : f32 to vector<256x1xf32>
      %37 = arith.maximumf %35, %36 : vector<256x1xf32>
      %38 = math.rsqrt %37 : vector<256x1xf32>
      %39 = vector.broadcast %38 : vector<256x1xf32> to vector<256x128xf32>
      %40 = arith.mulf %32, %39 : vector<256x128xf32>
      %c0_22 = arith.constant 0 : index
      %c0_23 = arith.constant 0 : index
      %c0_24 = arith.constant 0 : index
      %41 = vector.load %arg11[%c0_22, %c0_23, %c0_24] : memref<1x1x128xf32, #tpu.memory_space<vmem>>, vector<1x1x128xf32>
      %42 = vector.shape_cast %41 : vector<1x1x128xf32> to vector<1x128xf32>
      %43 = vector.broadcast %42 : vector<1x128xf32> to vector<256x128xf32>
      %44 = arith.mulf %43, %40 : vector<256x128xf32>
      %c0_25 = arith.constant 0 : index
      %c0_26 = arith.constant 0 : index
      %c0_27 = arith.constant 0 : index
      %45 = vector.load %arg12[%c0_25, %c0_26, %c0_27] : memref<1x1x128xf32, #tpu.memory_space<vmem>>, vector<1x1x128xf32>
      %46 = vector.shape_cast %45 : vector<1x1x128xf32> to vector<1x128xf32>
      %47 = vector.broadcast %46 : vector<1x128xf32> to vector<256x128xf32>
      %48 = arith.addf %44, %47 : vector<256x128xf32>
      %cst_28 = arith.constant 0.000000e+00 : f32
      %49 = vector.broadcast %cst_28 : f32 to vector<256x128xf32>
      %50 = arith.maximumf %48, %49 : vector<256x128xf32>
      %51 = arith.truncf %50 : vector<256x128xf32> to vector<256x128xbf16>
      %c0_29 = arith.constant 0 : index
      %c0_30 = arith.constant 0 : index
      %c0_31 = arith.constant 0 : index
      %52 = vector.load %arg13[%c0_29, %c0_30, %c0_31] : memref<1x256x128xbf16, #tpu.memory_space<vmem>>, vector<1x256x128xbf16>
      %53 = vector.shape_cast %52 : vector<1x256x128xbf16> to vector<256x128xbf16>
      %54 = vector.shape_cast %51 : vector<256x128xbf16> to vector<1x256x128xbf16>
      tpu.vector_store %arg13[%c0_29, %c0_30, %c0_31], %54 {strides = array<i32>} : memref<1x256x128xbf16, #tpu.memory_space<vmem>>, vector<1x256x128xbf16>,
    } else {
    }
    return
  }
  func.func @transform_0(%arg0: i32, %arg1: i32, %arg2: i32, %arg3: memref<2x1x1xi32, #tpu.memory_space<smem>>, %arg4: memref<2x1xi32, #tpu.memory_space<smem>>) -> (i32, i32) {
    %0 = arith.index_cast %arg0 : i32 to index
    %1 = arith.index_cast %arg1 : i32 to index
    %2 = arith.index_cast %arg2 : i32 to index
    %3 = memref.load %arg3[%0, %1, %2] : memref<2x1x1xi32, #tpu.memory_space<smem>>
    %c1_i32 = arith.constant 1 : i32
    %4 = arith.subi %c1_i32, %arg0 : i32
    %5 = arith.muli %4, %arg1 : i32
    %6 = arith.muli %arg0, %3 : i32
    %7 = arith.addi %5, %6 : i32
    %c1_i32_0 = arith.constant 1 : i32
    %8 = arith.subi %c1_i32_0, %arg0 : i32
    %9 = arith.muli %8, %3 : i32
    %10 = arith.muli %arg0, %arg1 : i32
    %11 = arith.addi %9, %10 : i32
    %c0_i32 = arith.constant 0 : i32
    return %7, %11 : i32, i32
  }
  func.func @transform_1(%arg0: i32, %arg1: i32, %arg2: i32, %arg3: memref<2x1x1xi32, #tpu.memory_space<smem>>, %arg4: memref<2x1xi32, #tpu.memory_space<smem>>) -> (i32, i32, i32) {
    %c1_i32 = arith.constant 1 : i32
    %0 = arith.subi %c1_i32, %arg0 : i32
    %1 = arith.index_cast %arg0 : i32 to index
    %2 = arith.index_cast %arg1 : i32 to index
    %3 = arith.index_cast %arg2 : i32 to index
    %4 = memref.load %arg3[%1, %2, %3] : memref<2x1x1xi32, #tpu.memory_space<smem>>
    %c0_i32 = arith.constant 0 : i32
    %c0_i32_0 = arith.constant 0 : i32
    return %0, %4, %c0_i32 : i32, i32, i32
  }
  func.func @transform_2(%arg0: i32, %arg1: i32, %arg2: i32, %arg3: memref<2x1x1xi32, #tpu.memory_space<smem>>, %arg4: memref<2x1xi32, #tpu.memory_space<smem>>) -> (i32, i32, i32) {
    %c0_i32 = arith.constant 0 : i32
    %c0_i32_0 = arith.constant 0 : i32
    return %arg0, %arg1, %c0_i32 : i32, i32, i32
  }
  func.func @transform_3(%arg0: i32, %arg1: i32, %arg2: i32, %arg3: memref<2x1x1xi32, #tpu.memory_space<smem>>, %arg4: memref<2x1xi32, #tpu.memory_space<smem>>) -> (i32, i32, i32) {
    %c0_i32 = arith.constant 0 : i32
    %c0_i32_0 = arith.constant 0 : i32
    %c0_i32_1 = arith.constant 0 : i32
    return %arg0, %c0_i32, %c0_i32_0 : i32, i32, i32
  }
  func.func @transform_4(%arg0: i32, %arg1: i32, %arg2: i32, %arg3: memref<2x1x1xi32, #tpu.memory_space<smem>>, %arg4: memref<2x1xi32, #tpu.memory_space<smem>>) -> (i32, i32, i32) {
    %c0_i32 = arith.constant 0 : i32
    %c0_i32_0 = arith.constant 0 : i32
    %c0_i32_1 = arith.constant 0 : i32
    return %arg0, %c0_i32, %c0_i32_0 : i32, i32, i32
  }
  func.func @transform_5(%arg0: i32, %arg1: i32, %arg2: i32, %arg3: memref<2x1x1xi32, #tpu.memory_space<smem>>, %arg4: memref<2x1xi32, #tpu.memory_space<smem>>) -> (i32, i32, i32) {
    %c0_i32 = arith.constant 0 : i32
    %c0_i32_0 = arith.constant 0 : i32
    %c0_i32_1 = arith.constant 0 : i32
    return %arg0, %c0_i32, %c0_i32_0 : i32, i32, i32
  }
  func.func @transform_6(%arg0: i32, %arg1: i32, %arg2: i32, %arg3: memref<2x1x1xi32, #tpu.memory_space<smem>>, %arg4: memref<2x1xi32, #tpu.memory_space<smem>>) -> (i32, i32, i32) {
    %c0_i32 = arith.constant 0 : i32
    %c0_i32_0 = arith.constant 0 : i32
    %c0_i32_1 = arith.constant 0 : i32
    return %arg0, %c0_i32, %c0_i32_0 : i32, i32, i32
  }
  func.func @transform_7(%arg0: i32, %arg1: i32, %arg2: i32, %arg3: memref<2x1x1xi32, #tpu.memory_space<smem>>, %arg4: memref<2x1xi32, #tpu.memory_space<smem>>) -> (i32, i32, i32) {
    %c0_i32 = arith.constant 0 : i32
    %c0_i32_0 = arith.constant 0 : i32
    %c0_i32_1 = arith.constant 0 : i32
    return %arg0, %c0_i32, %c0_i32_0 : i32, i32, i32
  }
  func.func @transform_8(%arg0: i32, %arg1: i32, %arg2: i32, %arg3: memref<2x1x1xi32, #tpu.memory_space<smem>>, %arg4: memref<2x1xi32, #tpu.memory_space<smem>>) -> (i32, i32, i32) {
    %c0_i32 = arith.constant 0 : i32
    %c0_i32_0 = arith.constant 0 : i32
    return %arg0, %arg1, %c0_i32 : i32, i32, i32
  }
}

module attributes {stable_mosaic.version = 11 : i64} {
  func.func @edge_decoder_kernel(%arg0: i32, %arg1: memref<128x128xbf16, #tpu.memory_space<vmem>>, %arg2: memref<128x128xbf16, #tpu.memory_space<vmem>>, %arg3: memref<128x128xbf16, #tpu.memory_space<vmem>>, %arg4: memref<128x128xbf16, #tpu.memory_space<vmem>>, %arg5: memref<1x128xf32, #tpu.memory_space<vmem>>, %arg6: memref<1x128xf32, #tpu.memory_space<vmem>>, %arg7: memref<1x1xf32, #tpu.memory_space<vmem>>, %arg8: memref<1x128xf32, #tpu.memory_space<vmem>>) attributes {dimension_semantics = [#tpu.dimension_semantics<parallel>], iteration_bounds = array<i64: 1>, scalar_prefetch = 0 : i64, scratch_operands = 0 : i64, tpu.core_type = #tpu.core_type<tc>, window_params = [{transform_indices = @transform_0, window_bounds = array<i64: 128, 128>}, {transform_indices = @transform_1, window_bounds = array<i64: 128, 128>}, {pipeline_mode = #tpu.pipeline_mode<synchronous>, transform_indices = @transform_2, window_bounds = array<i64: 128, 128>}, {pipeline_mode = #tpu.pipeline_mode<synchronous>, transform_indices = @transform_3, window_bounds = array<i64: 128, 128>}, {pipeline_mode = #tpu.pipeline_mode<synchronous>, transform_indices = @transform_4, window_bounds = array<i64: 1, 128>}, {pipeline_mode = #tpu.pipeline_mode<synchronous>, transform_indices = @transform_5, window_bounds = array<i64: 1, 128>}, {pipeline_mode = #tpu.pipeline_mode<synchronous>, transform_indices = @transform_6, window_bounds = array<i64: 1, 1>}, {transform_indices = @transform_7, window_bounds = array<i64: 1, 128>}]} {
    %c0 = arith.constant 0 : index
    %c0_0 = arith.constant 0 : index
    %0 = vector.load %arg1[%c0, %c0_0] : memref<128x128xbf16, #tpu.memory_space<vmem>>, vector<128x128xbf16>
    %c0_1 = arith.constant 0 : index
    %c0_2 = arith.constant 0 : index
    %1 = vector.load %arg3[%c0_1, %c0_2] : memref<128x128xbf16, #tpu.memory_space<vmem>>, vector<128x128xbf16>
    %cst = arith.constant dense<0.000000e+00> : vector<128x128xf32>
    %2 = tpu.matmul %0, %1, %cst {dimension_numbers = #tpu.dot_dimension_numbers<[1], [0], [0], [1], [0, 0, 1, 1], [], []>} : vector<128x128xbf16>, vector<128x128xbf16>, vector<128x128xf32> -> vector<128x128xf32>
    %c0_3 = arith.constant 0 : index
    %c0_4 = arith.constant 0 : index
    %3 = vector.load %arg2[%c0_3, %c0_4] : memref<128x128xbf16, #tpu.memory_space<vmem>>, vector<128x128xbf16>
    %c0_5 = arith.constant 0 : index
    %c0_6 = arith.constant 0 : index
    %4 = vector.load %arg4[%c0_5, %c0_6] : memref<128x128xbf16, #tpu.memory_space<vmem>>, vector<128x128xbf16>
    %cst_7 = arith.constant dense<0.000000e+00> : vector<128x128xf32>
    %5 = tpu.matmul %3, %4, %cst_7 {dimension_numbers = #tpu.dot_dimension_numbers<[1], [0], [0], [1], [0, 0, 1, 1], [], []>} : vector<128x128xbf16>, vector<128x128xbf16>, vector<128x128xf32> -> vector<128x128xf32>
    %6 = arith.addf %2, %5 : vector<128x128xf32>
    %c0_8 = arith.constant 0 : index
    %c0_9 = arith.constant 0 : index
    %7 = vector.load %arg5[%c0_8, %c0_9] : memref<1x128xf32, #tpu.memory_space<vmem>>, vector<1x128xf32>
    %8 = vector.broadcast %7 : vector<1x128xf32> to vector<128x128xf32>
    %9 = arith.addf %6, %8 : vector<128x128xf32>
    %cst_10 = arith.constant 0.000000e+00 : f32
    %10 = vector.broadcast %cst_10 : f32 to vector<128x128xf32>
    %11 = arith.maximumf %9, %10 : vector<128x128xf32>
    %c0_11 = arith.constant 0 : index
    %c0_12 = arith.constant 0 : index
    %12 = vector.load %arg6[%c0_11, %c0_12] : memref<1x128xf32, #tpu.memory_space<vmem>>, vector<1x128xf32>
    %cst_13 = arith.constant dense<0.000000e+00> : vector<1x128xf32>
    %13 = tpu.matmul %12, %11, %cst_13 {dimension_numbers = #tpu.dot_dimension_numbers<[1], [1], [0], [0], [0, 0, 1, 0], [], []>} : vector<1x128xf32>, vector<128x128xf32>, vector<1x128xf32> -> vector<1x128xf32>
    %c0_14 = arith.constant 0 : index
    %c0_15 = arith.constant 0 : index
    %14 = vector.load %arg7[%c0_14, %c0_15] : memref<1x1xf32, #tpu.memory_space<vmem>>, vector<1x1xf32>
    %15 = vector.broadcast %14 : vector<1x1xf32> to vector<1x128xf32>
    %16 = arith.addf %13, %15 : vector<1x128xf32>
    %17 = arith.negf %16 : vector<1x128xf32>
    %18 = math.exp %17 : vector<1x128xf32>
    %cst_16 = arith.constant 1.000000e+00 : f32
    %19 = vector.broadcast %cst_16 : f32 to vector<1x128xf32>
    %20 = arith.addf %19, %18 : vector<1x128xf32>
    %21 = arith.divf %19, %20 : vector<1x128xf32>
    %cst_17 = arith.constant 5.000000e+00 : f32
    %22 = vector.broadcast %cst_17 : f32 to vector<1x128xf32>
    %23 = arith.mulf %22, %21 : vector<1x128xf32>
    %c0_18 = arith.constant 0 : index
    %c0_19 = arith.constant 0 : index
    %24 = vector.load %arg8[%c0_18, %c0_19] : memref<1x128xf32, #tpu.memory_space<vmem>>, vector<1x128xf32>
    tpu.vector_store %arg8[%c0_18, %c0_19], %23 {strides = array<i32>} : memref<1x128xf32, #tpu.memory_space<vmem>>, vector<1x128xf32>,
    return
  }
  func.func @transform_0(%arg0: i32) -> (i32, i32) {
    %c0_i32 = arith.constant 0 : i32
    %c0_i32_0 = arith.constant 0 : i32
    return %arg0, %c0_i32 : i32, i32
  }
  func.func @transform_1(%arg0: i32) -> (i32, i32) {
    %c0_i32 = arith.constant 0 : i32
    %c0_i32_0 = arith.constant 0 : i32
    return %arg0, %c0_i32 : i32, i32
  }
  func.func @transform_2(%arg0: i32) -> (i32, i32) {
    %c0_i32 = arith.constant 0 : i32
    %c0_i32_0 = arith.constant 0 : i32
    %c0_i32_1 = arith.constant 0 : i32
    return %c0_i32, %c0_i32_0 : i32, i32
  }
  func.func @transform_3(%arg0: i32) -> (i32, i32) {
    %c0_i32 = arith.constant 0 : i32
    %c0_i32_0 = arith.constant 0 : i32
    %c0_i32_1 = arith.constant 0 : i32
    return %c0_i32, %c0_i32_0 : i32, i32
  }
  func.func @transform_4(%arg0: i32) -> (i32, i32) {
    %c0_i32 = arith.constant 0 : i32
    %c0_i32_0 = arith.constant 0 : i32
    %c0_i32_1 = arith.constant 0 : i32
    return %c0_i32, %c0_i32_0 : i32, i32
  }
  func.func @transform_5(%arg0: i32) -> (i32, i32) {
    %c0_i32 = arith.constant 0 : i32
    %c0_i32_0 = arith.constant 0 : i32
    %c0_i32_1 = arith.constant 0 : i32
    return %c0_i32, %c0_i32_0 : i32, i32
  }
  func.func @transform_6(%arg0: i32) -> (i32, i32) {
    %c0_i32 = arith.constant 0 : i32
    %c0_i32_0 = arith.constant 0 : i32
    %c0_i32_1 = arith.constant 0 : i32
    return %c0_i32, %c0_i32_0 : i32, i32
  }
  func.func @transform_7(%arg0: i32) -> (i32, i32) {
    %c0_i32 = arith.constant 0 : i32
    %c0_i32_0 = arith.constant 0 : i32
    return %c0_i32, %arg0 : i32, i32
  }
}

</mosaic_0001>

<bundles_post_ra>
// kernel: model_forward.5
= control target key start
LH: loop header
LB: loop body
LE: loop exit
PB: predicated region body
PF: predicated region fallthrough
CT: control target
= control target key end

     0   :  { %v874_v32 = vmov 0.0|0.0   ;;  %vm875_vm0 = vmmov 0   ;;  %v876_v33 = vmov 0.0   ;;  %v877_v34 = vmov 0   ;;  %s1034_s3 = inlined_call_operand.vmem [shape: bf16[128,128], index: 3, kind: input, shape index: {}]   ;;  %s1035_s1 = inlined_call_operand.vmem [shape: bf16[128,128], index: 1, kind: input, shape index: {}]   ;;  %s1036_s2 = inlined_call_operand.vmem [shape: bf16[128,128], index: 2, kind: input, shape index: {}]   ;;  %s1037_s0 = inlined_call_operand.vmem [shape: bf16[128,128], index: 0, kind: input, shape index: {}]   ;;  %s1038_s6 = inlined_call_operand.<no memory space> [shape: f32[1,1], index: 6, kind: input, shape index: {}]   ;;  %s1039_s4 = inlined_call_operand.vmem [shape: f32[1,128], index: 4, kind: input, shape index: {}]   ;;  %s1040_s5 = inlined_call_operand.vmem [shape: f32[1,128], index: 5, kind: input, shape index: {}]   ;;  %s1041_s7 = inlined_call_operand.vmem [shape: f32[1,128], index: 7, kind: output, shape index: {}]  }
   0x1   :  { %v838_v0 = vld [vmem:[%s1034_s3] sm:$0xff]   ;;  %v839_v1 = vld [vmem:[%s1034_s3 + $0x8] sm:$0xff]   ;;  %v840_v2 = vld [vmem:[%s1034_s3 + $0x10] sm:$0xff]   ;;  %793 = vmatprep.subr.bf16.mxu1 %v874_v32  ;;  %790 = vmatprep.mubr.msk.f32.mxu1 %vm875_vm0, %v876_v33  ;;  %v12_v35 = vstv %s1038_s6 }
   0x2   :  { %694 = vmatprep.subr.bf16.mxu0 %v838_v0  ;;  %v841_v3 = vld [vmem:[%s1034_s3 + $0x18] sm:$0xff]   ;;  %v846_v4 = vld [vmem:[%s1035_s1] sm:$0xff]   ;;  %v843_v6 = vld [vmem:[%s1034_s3 + $0x28] sm:$0xff]   ;;  %837 = vset.pattern.permute.xlu0 %v877_v34  ;;  %13 = vst [vmem:[#allocation2] sm:$0x1] %v12_v35 }
   0x3   :  { %695 = vmatpush3.bf16.msra.mxu0 %v838_v0  ;;  %710 = vmatprep.mubr.bf16.mxu0 %v846_v4  ;;  %v842_v5 = vld [vmem:[%s1034_s3 + $0x20] sm:$0xff]   ;;  %v844_v7 = vld [vmem:[%s1034_s3 + $0x30] sm:$0xff]   ;;  %v845_v8 = vld [vmem:[%s1034_s3 + $0x38] sm:$0xff]  }
   0x4   :  { %696 = vmatprep.subr.bf16.mxu0 %v839_v1  ;;  %v848_v9 = vld [vmem:[%s1036_s2] sm:$0xff]   ;;  %v847_v10 = vld [vmem:[%s1035_s1 + $0x8] sm:$0xff]   ;;  %v850_v11 = vld [vmem:[%s1035_s1 + $0x10] sm:$0xff]  }
   0x5   :  { %v849_v12 = vld [vmem:[%s1036_s2 + $0x8] sm:$0xff]   ;;  %v852_v13 = vld [vmem:[%s1036_s2 + $0x10] sm:$0xff]   ;;  %v851_v14 = vld [vmem:[%s1035_s1 + $0x18] sm:$0xff]  }
   0x6   :  { %v854_v15 = vld [vmem:[%s1035_s1 + $0x20] sm:$0xff]   ;;  %v853_v16 = vld [vmem:[%s1036_s2 + $0x18] sm:$0xff]   ;;  %v855_v18 = vld [vmem:[%s1035_s1 + $0x28] sm:$0xff]  }
   0x7   :  { %697 = vmatpush3.bf16.msra.mxu0 %v839_v1  ;;  %v856_v17 = vld [vmem:[%s1036_s2 + $0x20] sm:$0xff]   ;;  %v858_v19 = vld [vmem:[%s1035_s1 + $0x30] sm:$0xff]   ;;  %v857_v20 = vld [vmem:[%s1036_s2 + $0x28] sm:$0xff]  }
   0x8   :  { %698 = vmatprep.subr.bf16.mxu0 %v840_v2  ;;  %v860_v21 = vld [vmem:[%s1036_s2 + $0x30] sm:$0xff]   ;;  %v859_v22 = vld [vmem:[%s1035_s1 + $0x38] sm:$0xff]   ;;  %v862_v23 = vld [vmem:[%s1037_s0] sm:$0xff]  }
   0x9   :  { %v861_v24 = vld [vmem:[%s1036_s2 + $0x38] sm:$0xff]   ;;  %v863_v25 = vld [vmem:[%s1037_s0 + $0x8] sm:$0xff]   ;;  %v864_v26 = vld [vmem:[%s1037_s0 + $0x10] sm:$0xff]  }
   0xa   :  { %v865_v27 = vld [vmem:[%s1037_s0 + $0x18] sm:$0xff]   ;;  %v866_v28 = vld [vmem:[%s1037_s0 + $0x20] sm:$0xff]   ;;  %v867_v29 = vld [vmem:[%s1037_s0 + $0x28] sm:$0xff]  }
   0xb   :  { %699 = vmatpush3.bf16.msra.mxu0 %v840_v2  ;;  %v868_v30 = vld [vmem:[%s1037_s0 + $0x30] sm:$0xff]   ;;  %v869_v31 = vld [vmem:[%s1037_s0 + $0x38] sm:$0xff]   ;;  %v519_v36 = vld [vmem:[#allocation2] sm:$0x1] }
   0xc   :  { %700 = vmatprep.subr.bf16.mxu0 %v841_v3  ;;  %522 = vperm.xlu0 %837, %v519_v36   ;;  %v643_v37 = vld [vmem:[%s1039_s4] ss:$0 sm:$0xff] }
   0xf   :  { %701 = vmatpush3.bf16.msra.mxu0 %v841_v3 }
  0x10   :  { %702 = vmatprep.subr.bf16.mxu0 %v842_v5 }
  0x13   :  { %703 = vmatpush3.bf16.msra.mxu0 %v842_v5 }
  0x14   :  { %704 = vmatprep.subr.bf16.mxu0 %v843_v6 }
  0x17   :  { %705 = vmatpush3.bf16.msra.mxu0 %v843_v6 }
  0x18   :  { %706 = vmatprep.subr.bf16.mxu0 %v844_v7 }
  0x1b   :  { %707 = vmatpush3.bf16.msra.mxu0 %v844_v7 }
  0x1c   :  { %708 = vmatprep.subr.bf16.mxu0 %v845_v8 }
  0x1f   :  { %709 = vmatpush3.bf16.msra.mxu0 %v845_v8 }
  0x20   :  { %726 = vmatprep.subr.bf16.mxu0 %v848_v9 }
  0x22   :  { %711 = vmatmul.mubr.bf16.vlgmr.msra.gmra.mrb[0].mxu0 %v847_v10 }
  0x23   :  { %727 = vmatpush3.bf16.msra.mxu0 %v848_v9  ;;  %714 = vmatprep.mubr.bf16.mxu0 %v850_v11 }
  0x24   :  { %728 = vmatprep.subr.bf16.mxu0 %v849_v12 }
  0x27   :  { %729 = vmatpush3.bf16.msra.mxu0 %v849_v12 }
  0x28   :  { %730 = vmatprep.subr.bf16.mxu0 %v852_v13 }
  0x2a   :  { %715 = vmatmul.mubr.bf16.gmra.mrb[4].mxu0 %v851_v14 }
  0x2b   :  { %731 = vmatpush3.bf16.msra.mxu0 %v852_v13  ;;  %718 = vmatprep.mubr.bf16.mxu0 %v854_v15 }
  0x2c   :  { %732 = vmatprep.subr.bf16.mxu0 %v853_v16 }
  0x2f   :  { %733 = vmatpush3.bf16.msra.mxu0 %v853_v16 }
  0x30   :  { %734 = vmatprep.subr.bf16.mxu0 %v856_v17 }
  0x32   :  { %719 = vmatmul.mubr.bf16.gmra.mrb[8].mxu0 %v855_v18 }
  0x33   :  { %735 = vmatpush3.bf16.msra.mxu0 %v856_v17  ;;  %722 = vmatprep.mubr.bf16.mxu0 %v858_v19 }
  0x34   :  { %736 = vmatprep.subr.bf16.mxu0 %v857_v20 }
  0x37   :  { %737 = vmatpush3.bf16.msra.mxu0 %v857_v20 }
  0x38   :  { %738 = vmatprep.subr.bf16.mxu0 %v860_v21 }
  0x3a   :  { %723 = vmatmul.mubr.bf16.gmra.mrb[12].mxu0 %v859_v22 }
  0x3b   :  { %739 = vmatpush3.bf16.msra.mxu0 %v860_v21  ;;  %742 = vmatprep.mubr.bf16.mxu0 %v862_v23 }
  0x3c   :  { %740 = vmatprep.subr.bf16.mxu0 %v861_v24 }
  0x3f   :  { %741 = vmatpush3.bf16.msra.mxu0 %v861_v24 }
  0x42   :  { %743 = vmatmul.mubr.bf16.vlgmr.msra.gmra.mrb[0].mxu0 %v863_v25 }
  0x43   :  { %746 = vmatprep.mubr.bf16.mxu0 %v864_v26 }
  0x4a   :  { %747 = vmatmul.mubr.bf16.gmra.mrb[4].mxu0 %v865_v27 }
  0x4b   :  { %750 = vmatprep.mubr.bf16.mxu0 %v866_v28 }
  0x52   :  { %751 = vmatmul.mubr.bf16.gmra.mrb[8].mxu0 %v867_v29 }
  0x53   :  { %754 = vmatprep.mubr.bf16.mxu0 %v868_v30  ;;  %v518_v30 = vld [vmem:[%s1040_s5] sm:$0x1] }
  0x5a   :  { %755 = vmatmul.mubr.bf16.gmra.mrb[12].mxu0 %v869_v31  ;;  %v525_v31 = vlaneseq }
  0x5c   :  { %v526_v33 = vshrl.u32 %v525_v31, 7 }
  0x5e   :  { %v527_v34 = vsub.s32 0, %v526_v33 }
  0x8b   :  { %v523_v35 = vpop.permute.xlu0 %522 }
  0x8c   :  { %v528_v36 = vrot.slane %v523_v35, %v527_v34 }
 0x115   :  { %v744_v38 = vpop.f32.mrb[0].mxu0 }
 0x116   :  { %v488_v39 = vadd.f32 %v744_v38, %v643_v37  ;;  %v416_v40 = vpop.f32.mrb[1].mxu0 }
 0x117   :  { %v486_v41 = vadd.f32 %v643_v37, %v416_v40  ;;  %v745_v42 = vpop.f32.mrb[2].mxu0 }
 0x118   :  { %v489_v43 = vadd.f32 %v745_v42, %v643_v37  ;;  %v419_v44 = vpop.f32.mrb[3].mxu0  ;;  %v504_v46 = vmax.f32 %v488_v39, 0.0 }
 0x119   :  { %v487_v45 = vadd.f32 %v643_v37, %v419_v44  ;;  %v502_v48 = vmax.f32 %v486_v41, 0.0 }
 0x11a   :  { %v505_v47 = vmax.f32 %v489_v43, 0.0 }
 0x11b   :  { %v503_v49 = vmax.f32 %v487_v45, 0.0 }
 0x11c   :  { %v797_v50 = vpack.c.bf16 %v505_v47, %v504_v46 }
 0x11d   :  { %v748_v51 = vpop.f32.mrb[4].mxu0  ;;  %v794_v52 = vpack.c.bf16 %v503_v49, %v502_v48 }
 0x11e   :  { %v492_v53 = vadd.f32 %v748_v51, %v643_v37  ;;  %v432_v54 = vpop.f32.mrb[5].mxu0 }
 0x11f   :  { %v490_v55 = vadd.f32 %v643_v37, %v432_v54  ;;  %v749_v56 = vpop.f32.mrb[6].mxu0  ;;  %795 = vmatpush3.bf16.xpose.msra.mxu1 %v794_v52 }
 0x120   :  { %v493_v57 = vadd.f32 %v749_v56, %v643_v37  ;;  %v435_v58 = vpop.f32.mrb[7].mxu0  ;;  %796 = vmatprep.subr.bf16.mxu1 %v874_v32  ;;  %v508_v60 = vmax.f32 %v492_v53, 0.0 }
 0x121   :  { %v491_v59 = vadd.f32 %v643_v37, %v435_v58  ;;  %v506_v62 = vmax.f32 %v490_v55, 0.0 }
 0x122   :  { %v509_v61 = vmax.f32 %v493_v57, 0.0 }
 0x123   :  { %v507_v63 = vmax.f32 %v491_v59, 0.0 }
 0x124   :  { %v803_v0 = vpack.c.bf16 %v509_v61, %v508_v60 }
 0x125   :  { %v800_v1 = vpack.c.bf16 %v507_v63, %v506_v62  ;;  %v752_v2 = vpop.f32.mrb[8].mxu0 }
 0x126   :  { %v496_v3 = vadd.f32 %v752_v2, %v643_v37  ;;  %v448_v4 = vpop.f32.mrb[9].mxu0 }
 0x127   :  { %v494_v5 = vadd.f32 %v643_v37, %v448_v4  ;;  %v753_v6 = vpop.f32.mrb[10].mxu0  ;;  %798 = vmatpush3.bf16.xpose.msra.mxu1 %v797_v50 }
 0x128   :  { %v497_v7 = vadd.f32 %v753_v6, %v643_v37  ;;  %v451_v8 = vpop.f32.mrb[11].mxu0  ;;  %799 = vmatprep.subr.bf16.mxu1 %v874_v32  ;;  %v512_v10 = vmax.f32 %v496_v3, 0.0 }
 0x129   :  { %v495_v9 = vadd.f32 %v643_v37, %v451_v8  ;;  %v510_v12 = vmax.f32 %v494_v5, 0.0 }
 0x12a   :  { %v513_v11 = vmax.f32 %v497_v7, 0.0 }
 0x12b   :  { %v511_v13 = vmax.f32 %v495_v9, 0.0 }
 0x12c   :  { %v809_v14 = vpack.c.bf16 %v513_v11, %v512_v10 }
 0x12d   :  { %v806_v15 = vpack.c.bf16 %v511_v13, %v510_v12  ;;  %v756_v16 = vpop.f32.mrb[12].mxu0 }
 0x12e   :  { %v500_v17 = vadd.f32 %v756_v16, %v643_v37  ;;  %v464_v18 = vpop.f32.mrb[13].mxu0 }
 0x12f   :  { %v498_v19 = vadd.f32 %v643_v37, %v464_v18  ;;  %v757_v20 = vpop.f32.mrb[14].mxu0  ;;  %801 = vmatpush3.bf16.xpose.msra.mxu1 %v800_v1 }
 0x130   :  { %v501_v21 = vadd.f32 %v757_v20, %v643_v37  ;;  %v467_v22 = vpop.f32.mrb[15].mxu0  ;;  %802 = vmatprep.subr.bf16.mxu1 %v874_v32  ;;  %v516_v24 = vmax.f32 %v500_v17, 0.0 }
 0x131   :  { %v499_v23 = vadd.f32 %v643_v37, %v467_v22  ;;  %v514_v26 = vmax.f32 %v498_v19, 0.0 }
 0x132   :  { %v517_v25 = vmax.f32 %v501_v21, 0.0 }
 0x133   :  { %v515_v27 = vmax.f32 %v499_v23, 0.0 }
 0x134   :  { %v815_v28 = vpack.c.bf16 %v517_v25, %v516_v24 }
 0x135   :  { %v812_v29 = vpack.c.bf16 %v515_v27, %v514_v26 }
 0x137   :  { %804 = vmatpush3.bf16.xpose.msra.mxu1 %v803_v0 }
 0x138   :  { %805 = vmatprep.subr.bf16.mxu1 %v874_v32 }
 0x13f   :  { %807 = vmatpush3.bf16.xpose.msra.mxu1 %v806_v15 }
 0x140   :  { %808 = vmatprep.subr.bf16.mxu1 %v874_v32 }
 0x147   :  { %810 = vmatpush3.bf16.xpose.msra.mxu1 %v809_v14 }
 0x148   :  { %811 = vmatprep.subr.bf16.mxu1 %v874_v32 }
 0x14f   :  { %813 = vmatpush3.bf16.xpose.msra.mxu1 %v812_v29 }
 0x150   :  { %814 = vmatprep.subr.bf16.mxu1 %v874_v32 }
 0x157   :  { %816 = vmatpush3.bf16.xpose.msra.mxu1 %v815_v28 }
 0x15e   :  { %791 = vmatmul.mubr.f32.vlgmr.msra.gmra.mrb[0].mxu1 %v518_v30 }
 0x231   :  { %v595_v37 = vpop.f32.mrb[0].mxu1 }
 0x232   :  { %v596_v38 = vadd.f32 %v595_v37, %v528_v36  ;;  %v792_v39 = vpop.f32.mrb[1].mxu1 }
 0x234   :  { %v644_v40 = vmul.f32 -1.442695, %v596_v38 }
 0x236   :  { %870 = vpow2.f32 %v644_v40 }
 0x240   :  { %v871_v41 = vpop.eup %870 }
 0x241   :  { %v602_v42 = vadd.f32 1.0, %v871_v41 }
 0x243   :  { %872 = vrcp.f32 %v602_v42 }
 0x24d   :  { %v873_v32 = vpop.eup %872 }
 0x24e   :  { %v605_v43 = vmul.f32 5.0, %v873_v32 }
 0x250   :  { %606 = vst [vmem:[%s1041_s7] sm:$0x1] %v605_v43 }

// kernel: model_forward.3
= control target key start
LH: loop header
LB: loop body
LE: loop exit
PB: predicated region body
PF: predicated region fallthrough
CT: control target
= control target key end

     0   :  { %s5037_s0 = inlined_call_operand.vmem [shape: s32[2,1,1], index: 0, kind: input, shape index: {}]   ;;  %s5038_s2 = inlined_call_operand.vmem [shape: bf16[256,256], index: 2, kind: input, shape index: {}]   ;;  %s5039_s3 = inlined_call_operand.vmem [shape: bf16[2,256,128], index: 3, kind: input, shape index: {}, may-alias: {3,4}]   ;;  %s5040_s4 = inlined_call_operand.vmem [shape: bf16[2,256,128], index: 4, kind: input, shape index: {}, may-alias: {3,4}]   ;;  %s5041_s5 = inlined_call_operand.vmem [shape: bf16[2,128,128], index: 5, kind: input, shape index: {}]   ;;  %s5042_s6 = inlined_call_operand.vmem [shape: f32[2,1,128], index: 6, kind: input, shape index: {}]   ;;  %s5043_s7 = inlined_call_operand.vmem [shape: bf16[2,128,128], index: 7, kind: input, shape index: {}]   ;;  %s5044_s8 = inlined_call_operand.vmem [shape: f32[2,1,128], index: 8, kind: input, shape index: {}]   ;;  %s5045_s9 = inlined_call_operand.vmem [shape: f32[2,1,128], index: 9, kind: input, shape index: {}]   ;;  %s5046_s10 = inlined_call_operand.vmem [shape: bf16[2,256,128], index: 10, kind: output, shape index: {}]   ;;  %s5047_s1 = inlined_call_operand.vmem [shape: s32[2,1], index: 1, kind: input, shape index: {}]  }
   0x1   :  { %5051 = sst [smem:[#allocation11_spill]] %s5039_s3  ;;  %s15_s15 = sshll.u32 %s5037_s0, 4  ;;  %s16_s15 = int_to_ptr.vmem [resolvable:$true] %s15_s15 }
   0x2   :  { %5052 = sst [smem:[#allocation12_spill]] %s5040_s4  ;;  %s19_s18 = sshll.u32 %s5047_s1, 4  ;;  %s20_s18 = int_to_ptr.vmem [resolvable:$true] %s19_s18 }
   0x3   :  { %s4388_s19 = scalar_lea.vmem %s16_s15, 32  ;;  %p4393_p1 = scmp.lt.s32.totalorder %s16_s15, %s16_s15 }
   0x4   :  { %p4389_p0 = scmp.ne.s32.totalorder %s16_s15, %s4388_s19  ;;  %p4394_p2 = scmp.lt.s32.totalorder %s4388_s19, %s4388_s19 }
   0x6   :  { %p4395_p3 = por %p4394_p2, %p4393_p1 }
   0x8   :  { %p4396_p4 = pnand %p4395_p3, %p4389_p0 }
   0xa   :  { %4399 = shalt.err (!%p4396_p4)  }
   0xb   :  { %s4438_s20 = smov [#allocation4]   ;;  %s4400_s21 = scalar_lea.vmem %s20_s18, 32 }
   0xc   :  { %18 = dma.vmem_to_smem %s16_s15, 32, %s4438_s20, [#allocation3] }
   0xd   :  { %p4401_p5 = scmp.ne.s32.totalorder %s20_s18, %s4400_s21  ;;  %p4405_p6 = scmp.lt.s32.totalorder %s20_s18, %s20_s18 }
   0xe   :  { %p4406_p7 = scmp.lt.s32.totalorder %s4400_s21, %s4400_s21 }
  0x10   :  { %p4407_p8 = por %p4406_p7, %p4405_p6 }
  0x12   :  { %p4408_p9 = pnand %p4407_p8, %p4401_p5 }
  0x14   :  { %4411 = shalt.err (!%p4408_p9)  }
  0x15   :  { %s4439_s0 = smov [#allocation5]  }
  0x16   :  { %22 = dma.vmem_to_smem %s20_s18, 32, %s4439_s0, [#allocation3] }
  0x17   :  { %4424 = dma.done.wait [#allocation3], 64 }
  0x18   :  { %4425 = vsyncadd [#allocation3], 4294967232 }
  0x19   :  { %24 = sfence }
  0x1a   :  { %s4502_s1 = smov 0   ;;  %s4504_s22 = smov 0  }
  0x1b   :  { %s4506_s23 = smov 0  }
  0x1c LB: > { %5053 = sst [smem:[#allocation7_spill]] %s4432_s22  ;;  %s49_s24 = sadd.s32 1, %s4432_s22  ;;  %s4436_s23 = sphi %s4506_s23, %s30_s23   ;;  %s4432_s22 = sphi %s4504_s22, %s5064_s22   ;;  %s4428_s1 = sphi %s4502_s1, %s5063_s1  }
  0x1d   : > { %5054 = sst [smem:[#allocation8_spill]] %s4436_s23  ;;  %p3310_p10 = scmp.ge.s32.totalorder %s4436_s23, 1 }
  0x1e   : > { %p51_p11 = scmp.ge.s32.totalorder %s49_s24, 2  ;;  %p486_p12 = scmp.lt.s32.totalorder %s4436_s23, 3 }
  0x20   : > { %s5066_s24 = smov (%p51_p11, %s49_s24), 0  ;;  %p487_p13 = pnand %p3310_p10, %p486_p12 }
  0x21   : > { %5055 = sst [smem:[#allocation9_spill]] %s5066_s24 }
  0x22   : > { %490 = sbr.rel (%p487_p13) target bundleno = 1273 (0x4f9), region = 52 }
  0x29   : > { %s4523_s25 = sshll.u32 %s4428_s1, 7  ;;  %s4526_s26 = ssub.s32 1, %s4428_s1  ;;  %v4440_v0 = vmov 0.0  }
  0x2a   : > { %s4529_s27 = sld [smem:[#allocation4 + %s4523_s25]]  ;;  %710 = vst [vmem:[#allocation2] sm:$0xff] %v4440_v0  ;;  %711 = vst [vmem:[#allocation2 + $0x8] sm:$0xff] %v4440_v0  ;;  %p647_p0 = scmp.lt.s32.totalorder %s4526_s26, 1 }
  0x2b   : > { %s4532_s28 = sld [smem:[#allocation4 + %s4523_s25]]  ;;  %712 = vst [vmem:[#allocation2 + $0x10] sm:$0xff] %v4440_v0  ;;  %713 = vst [vmem:[#allocation2 + $0x18] sm:$0xff] %v4440_v0  ;;  %p667_p1 = scmp.lt.s32.totalorder %s4428_s1, 1 }
  0x2c   : > { %714 = vst [vmem:[#allocation2 + $0x20] sm:$0xff] %v4440_v0  ;;  %715 = vst [vmem:[#allocation2 + $0x28] sm:$0xff] %v4440_v0  ;;  %s4537_s29 = sld [smem:[#allocation5 + %s4523_s25]]  ;;  %p751_p2 = scmp.eq.s32.totalorder %s4428_s1, 0 }
  0x2d   : > { %716 = vst [vmem:[#allocation2 + $0x30] sm:$0xff] %v4440_v0  ;;  %717 = vst [vmem:[#allocation2 + $0x38] sm:$0xff] %v4440_v0  ;;  %s648_s30 = scalar_select %p647_p0, %s4526_s26, 1 }
  0x2e   : > { %718 = vst [vmem:[#allocation2 + $0x40] sm:$0xff] %v4440_v0  ;;  %719 = vst [vmem:[#allocation2 + $0x48] sm:$0xff] %v4440_v0  ;;  %s4541_s11 = scalar_select %p667_p1, %s4428_s1, 1 }
  0x2f   : > { %720 = vst [vmem:[#allocation2 + $0x50] sm:$0xff] %v4440_v0  ;;  %721 = vst [vmem:[#allocation2 + $0x58] sm:$0xff] %v4440_v0  ;;  %s3318_s12 = sshll.u32 %s648_s30, 5  ;;  %s5057_s4 = sld [smem:[#allocation12_spill]] }
  0x30   : > { %722 = vst [vmem:[#allocation2 + $0x60] sm:$0xff] %v4440_v0  ;;  %723 = vst [vmem:[#allocation2 + $0x68] sm:$0xff] %v4440_v0  ;;  %s603_s13 = smul.u32 %s4428_s1, %s4529_s27  ;;  %s3487_s18 = sshll.u32 %s4541_s11, 7 }
  0x31   : > { %724 = vst [vmem:[#allocation2 + $0x70] sm:$0xff] %v4440_v0  ;;  %725 = vst [vmem:[#allocation2 + $0x78] sm:$0xff] %v4440_v0  ;;  %s3317_s14 = sshll.u32 %s4532_s28, 5  ;;  %s605_s15 = smul.u32 %s4526_s26, %s4529_s27 }
  0x32   : > { %726 = vst [vmem:[#allocation2 + $0x80] sm:$0xff] %v4440_v0  ;;  %727 = vst [vmem:[#allocation2 + $0x88] sm:$0xff] %v4440_v0  ;;  %p4549_p3 = scmp.lt.s32.totalorder %s3317_s14, 31  ;;  %s3312_s17 = sshll.u32 %s603_s13, 5 }
  0x33   : > { %728 = vst [vmem:[#allocation2 + $0x90] sm:$0xff] %v4440_v0  ;;  %729 = vst [vmem:[#allocation2 + $0x98] sm:$0xff] %v4440_v0  ;;  %s3313_s19 = sshll.u32 %s605_s15, 1  ;;  %p610_p4 = scmp.lt.s32.totalorder %s3312_s17, 31 }
  0x34   : > { %730 = vst [vmem:[#allocation2 + $0xa0] sm:$0xff] %v4440_v0  ;;  %731 = vst [vmem:[#allocation2 + $0xa8] sm:$0xff] %v4440_v0  ;;  %p612_p5 = scmp.lt.s32.totalorder %s3313_s19, 1  ;;  %s3488_s26 = sshll.u32 %s4541_s11, 6 }
  0x35   : > { %732 = vst [vmem:[#allocation2 + $0xb0] sm:$0xff] %v4440_v0  ;;  %733 = vst [vmem:[#allocation2 + $0xb8] sm:$0xff] %v4440_v0  ;;  %s4557_s0 = scalar_lea.vmem %s5057_s4, %s3487_s18  ;;  %s5068_s17 = smov (!%p610_p4, %s3312_s17), 31 }
  0x36   : > { %734 = vst [vmem:[#allocation2 + $0xc0] sm:$0xff] %v4440_v0  ;;  %735 = vst [vmem:[#allocation2 + $0xc8] sm:$0xff] %v4440_v0  ;;  %5058 = sst [smem:[#allocation10_spill]] %s4557_s0  ;;  %s5070_s19 = smov (!%p612_p5, %s3313_s19), 1 }
  0x37   : > { %736 = vst [vmem:[#allocation2 + $0xd0] sm:$0xff] %v4440_v0  ;;  %737 = vst [vmem:[#allocation2 + $0xd8] sm:$0xff] %v4440_v0  ;;  %s3314_s25 = sshll.u32 %s5068_s17, 1  ;;  %s4563_s13 = scalar_lea.vmem %s5041_s5, %s3488_s26 }
  0x38   : > { %738 = vst [vmem:[#allocation2 + $0xe0] sm:$0xff] %v4440_v0  ;;  %739 = vst [vmem:[#allocation2 + $0xe8] sm:$0xff] %v4440_v0  ;;  %s615_s27 = sadd.s32 %s3314_s25, %s5070_s19  ;;  %s4577_s3 = scalar_lea.vmem %s5043_s7, %s3488_s26 }
  0x39   : > { %740 = vst [vmem:[#allocation2 + $0xf0] sm:$0xff] %v4440_v0  ;;  %741 = vst [vmem:[#allocation2 + $0xf8] sm:$0xff] %v4440_v0  ;;  %s3315_s15 = sshll.u32 %s615_s27, 2  ;;  %s5072_s14 = smov (!%p4549_p3, %s3317_s14), 31 }
  0x3a   : > { %s4572_s23 = scalar_lea.vmem %s5038_s2, %s3315_s15  ;;  %s691_s27 = scalar_lea.vmem %s5044_s8, %s4541_s11 }
  0x3b   : > { %s694_s22 = scalar_lea.vmem %s5045_s9, %s4541_s11  ;;  %s652_s24 = sadd.s32 %s3318_s12, %s5072_s14 }
  0x3c   : > { %s4592_s15 = scalar_lea.vmem %s5046_s10, %s3487_s18  ;;  %s3319_s21 = sshll.u32 %s652_s24, 2 }
  0x3d   : > { %p3329_p6 = scmp.gt.s32.totalorder %s4537_s29, 0  ;;  %s5059_s16 = sld [smem:[#allocation11_spill]] }
  0x3f   : > { %p752_p7 = pnand %p3329_p6, %p751_p2 }
  0x40   : > { %v4190_v12 = vld [vmem:[%s4572_s23 + $0x4] ss:$8 sps:$4 sm:$0xff] (!%p752_p7)   ;;  %v4188_v19 = vld [vmem:[%s4572_s23] ss:$8 sps:$4 sm:$0xff] (!%p752_p7)   ;;  %v4194_v21 = vld [vmem:[%s4572_s23 + $0x14] ss:$8 sps:$4 sm:$0xff] (!%p752_p7)  }
  0x41   : > { %755 = sbr.rel (%p752_p7) target bundleno = 377 (0x179), region = 60  ;;  %v4193_v13 = vld [vmem:[%s4572_s23 + $0x84] ss:$8 sps:$4 sm:$0xff] (!%p752_p7)   ;;  %1140 = vmatprep.mubr.bf16.mxu0 (!%p752_p7), %v4190_v12  ;;  %v4191_v20 = vld [vmem:[%s4572_s23 + $0x80] ss:$8 sps:$4 sm:$0xff] (!%p752_p7)  }
  0x42   : > { %1204 = vmatprep.mubr.bf16.mxu1 (!%p752_p7), %v4193_v13  ;;  %v4196_v22 = vld [vmem:[%s4572_s23 + $0x94] ss:$8 sps:$4 sm:$0xff] (!%p752_p7)   ;;  %v4198_v23 = vld [vmem:[%s4572_s23 + $0x10] ss:$8 sps:$4 sm:$0xff] (!%p752_p7)   ;;  %v4200_v25 = vld [vmem:[%s4572_s23 + $0x24] ss:$8 sps:$4 sm:$0xff] (!%p752_p7)  }
  0x43   : > { %s4598_s17 = scalar_lea.vmem %s5059_s16, %s3319_s21  ;;  %v4199_v24 = vld [vmem:[%s4572_s23 + $0x90] ss:$8 sps:$4 sm:$0xff] (!%p752_p7)   ;;  %v4202_v26 = vld [vmem:[%s4572_s23 + $0xa4] ss:$8 sps:$4 sm:$0xff] (!%p752_p7)   ;;  %v4204_v27 = vld [vmem:[%s4572_s23 + $0x20] ss:$8 sps:$4 sm:$0xff] (!%p752_p7)  }
  0x44   : > { %v4172_v1 = vld [vmem:[%s4598_s17 + $0x40] sm:$0xff] (!%p752_p7)   ;;  %v4174_v3 = vld [vmem:[%s4598_s17 + $0x48] sm:$0xff] (!%p752_p7)   ;;  %v4176_v5 = vld [vmem:[%s4598_s17 + $0x50] sm:$0xff] (!%p752_p7)  }
  0x45   : > { %v4173_v2 = vld [vmem:[%s4598_s17] sm:$0xff] (!%p752_p7)   ;;  %3657 = vmatprep.subr.bf16.mxu0 (!%p752_p7), %v4172_v1  ;;  %4113 = vmatprep.subr.bf16.mxu1 (!%p752_p7), %v4172_v1  ;;  %v4175_v4 = vld [vmem:[%s4598_s17 + $0x8] sm:$0xff] (!%p752_p7)   ;;  %v4177_v6 = vld [vmem:[%s4598_s17 + $0x10] sm:$0xff] (!%p752_p7)  }
  0x46   : > { %3658 = vmatpush3.bf16.msra.mxu0 (!%p752_p7), %v4173_v2  ;;  %4121 = vmatpush3.bf16.msra.mxu1 (!%p752_p7), %v4173_v2  ;;  %v4178_v7 = vld [vmem:[%s4598_s17 + $0x58] sm:$0xff] (!%p752_p7)   ;;  %v4180_v9 = vld [vmem:[%s4598_s17 + $0x60] sm:$0xff] (!%p752_p7)   ;;  %v4182_v11 = vld [vmem:[%s4598_s17 + $0x68] sm:$0xff] (!%p752_p7)  }
  0x47   : > { %3659 = vmatprep.subr.bf16.mxu0 (!%p752_p7), %v4174_v3  ;;  %4114 = vmatprep.subr.bf16.mxu1 (!%p752_p7), %v4174_v3  ;;  %v4179_v8 = vld [vmem:[%s4598_s17 + $0x18] sm:$0xff] (!%p752_p7)   ;;  %v4181_v10 = vld [vmem:[%s4598_s17 + $0x20] sm:$0xff] (!%p752_p7)   ;;  %v4183_v14 = vld [vmem:[%s4598_s17 + $0x28] sm:$0xff] (!%p752_p7)  }
  0x48   : > { %v4184_v15 = vld [vmem:[%s4598_s17 + $0x70] sm:$0xff]   ;;  %v4186_v17 = vld [vmem:[%s4598_s17 + $0x78] sm:$0xff]   ;;  %v4205_v28 = vld [vmem:[%s4572_s23 + $0xa0] ss:$8 sps:$4 sm:$0xff]  }
  0x49   : > { %v4185_v16 = vld [vmem:[%s4598_s17 + $0x30] sm:$0xff]   ;;  %v4187_v18 = vld [vmem:[%s4598_s17 + $0x38] sm:$0xff]   ;;  %v4212_v33 = vld [vmem:[%s4572_s23 + $0x44] ss:$8 sps:$4 sm:$0xff]  }
  0x4a   : > { %3660 = vmatpush3.bf16.msra.mxu0 %v4175_v4  ;;  %4122 = vmatpush3.bf16.msra.mxu1 %v4175_v4  ;;  %v4206_v29 = vld [vmem:[%s4572_s23 + $0x34] ss:$8 sps:$4 sm:$0xff]   ;;  %v4210_v31 = vld [vmem:[%s4572_s23 + $0x30] ss:$8 sps:$4 sm:$0xff]   ;;  %v4214_v34 = vld [vmem:[%s4572_s23 + $0xc4] ss:$8 sps:$4 sm:$0xff]  }
  0x4b   : > { %3661 = vmatprep.subr.bf16.mxu0 %v4176_v5  ;;  %4115 = vmatprep.subr.bf16.mxu1 %v4176_v5  ;;  %v4208_v30 = vld [vmem:[%s4572_s23 + $0xb4] ss:$8 sps:$4 sm:$0xff]   ;;  %v4211_v32 = vld [vmem:[%s4572_s23 + $0xb0] ss:$8 sps:$4 sm:$0xff]   ;;  %v4216_v35 = vld [vmem:[%s4572_s23 + $0x40] ss:$8 sps:$4 sm:$0xff]  }
  0x4c   : > { %v4217_v36 = vld [vmem:[%s4572_s23 + $0xc0] ss:$8 sps:$4 sm:$0xff]   ;;  %v4218_v37 = vld [vmem:[%s4572_s23 + $0x54] ss:$8 sps:$4 sm:$0xff]   ;;  %v4222_v39 = vld [vmem:[%s4572_s23 + $0x50] ss:$8 sps:$4 sm:$0xff]  }
  0x4d   : > { %v4220_v38 = vld [vmem:[%s4572_s23 + $0xd4] ss:$8 sps:$4 sm:$0xff]   ;;  %v4223_v40 = vld [vmem:[%s4572_s23 + $0xd0] ss:$8 sps:$4 sm:$0xff]   ;;  %v4224_v41 = vld [vmem:[%s4572_s23 + $0x64] ss:$8 sps:$4 sm:$0xff]  }
  0x4e   : > { %3662 = vmatpush3.bf16.msra.mxu0 %v4177_v6  ;;  %4123 = vmatpush3.bf16.msra.mxu1 %v4177_v6  ;;  %v4226_v42 = vld [vmem:[%s4572_s23 + $0xe4] ss:$8 sps:$4 sm:$0xff]   ;;  %v4228_v43 = vld [vmem:[%s4572_s23 + $0x60] ss:$8 sps:$4 sm:$0xff]   ;;  %v4230_v45 = vld [vmem:[%s4572_s23 + $0x74] ss:$8 sps:$4 sm:$0xff]  }
  0x4f   : > { %3663 = vmatprep.subr.bf16.mxu0 %v4178_v7  ;;  %4116 = vmatprep.subr.bf16.mxu1 %v4178_v7  ;;  %v4229_v44 = vld [vmem:[%s4572_s23 + $0xe0] ss:$8 sps:$4 sm:$0xff]   ;;  %v4232_v46 = vld [vmem:[%s4572_s23 + $0xf4] ss:$8 sps:$4 sm:$0xff]   ;;  %v4234_v47 = vld [vmem:[%s4572_s23 + $0x70] ss:$8 sps:$4 sm:$0xff]  }
  0x50   : > { %v4235_v48 = vld [vmem:[%s4572_s23 + $0xf0] ss:$8 sps:$4 sm:$0xff]   ;;  %v756_v51 = vld [vmem:[#allocation2] sm:$0xff]  ;;  %v757_v59 = vld [vmem:[#allocation2 + $0x8] sm:$0xff] }
  0x51   : > { %v772_v53 = vld [vmem:[#allocation2 + $0x80] sm:$0xff]  ;;  %v773_v61 = vld [vmem:[#allocation2 + $0x88] sm:$0xff]  ;;  %v758_v7 = vld [vmem:[#allocation2 + $0x10] sm:$0xff] }
  0x52   : > { %3664 = vmatpush3.bf16.msra.mxu0 %v4179_v8  ;;  %4124 = vmatpush3.bf16.msra.mxu1 %v4179_v8 }
  0x53   : > { %3665 = vmatprep.subr.bf16.mxu0 %v4180_v9  ;;  %4117 = vmatprep.subr.bf16.mxu1 %v4180_v9  ;;  %v774_v9 = vld [vmem:[#allocation2 + $0x90] sm:$0xff] }
  0x56   : > { %3666 = vmatpush3.bf16.msra.mxu0 %v4181_v10  ;;  %4125 = vmatpush3.bf16.msra.mxu1 %v4181_v10 }
  0x57   : > { %3667 = vmatprep.subr.bf16.mxu0 %v4182_v11  ;;  %4118 = vmatprep.subr.bf16.mxu1 %v4182_v11 }
  0x5a   : > { %3668 = vmatpush3.bf16.msra.mxu0 %v4183_v14  ;;  %4126 = vmatpush3.bf16.msra.mxu1 %v4183_v14 }
  0x5b   : > { %3669 = vmatprep.subr.bf16.mxu0 %v4184_v15  ;;  %4119 = vmatprep.subr.bf16.mxu1 %v4184_v15  ;;  %v759_v15 = vld [vmem:[#allocation2 + $0x18] sm:$0xff] }
  0x5e   : > { %3670 = vmatpush3.bf16.msra.mxu0 %v4185_v16  ;;  %4127 = vmatpush3.bf16.msra.mxu1 %v4185_v16 }
  0x5f   : > { %3671 = vmatprep.subr.bf16.mxu0 %v4186_v17  ;;  %4120 = vmatprep.subr.bf16.mxu1 %v4186_v17  ;;  %v775_v17 = vld [vmem:[#allocation2 + $0x98] sm:$0xff] }
  0x62   : > { %3672 = vmatpush3.bf16.msra.mxu0 %v4187_v18  ;;  %4128 = vmatpush3.bf16.msra.mxu1 %v4187_v18 }
  0x65   : > { %1141 = vmatmul.mubr.bf16.vlgmr.msra.gmra.mrb[0].mxu0 %v4188_v19  ;;  %1205 = vmatmul.mubr.bf16.vlgmr.msra.gmra.mrb[0].mxu1 %v4191_v20 }
  0x66   : > { %1148 = vmatprep.mubr.bf16.mxu0 %v4194_v21  ;;  %1212 = vmatprep.mubr.bf16.mxu1 %v4196_v22 }
  0x6d   : > { %1149 = vmatmul.mubr.bf16.gmra.mrb[4].mxu0 %v4198_v23  ;;  %1213 = vmatmul.mubr.bf16.gmra.mrb[4].mxu1 %v4199_v24 }
  0x6e   : > { %1156 = vmatprep.mubr.bf16.mxu0 %v4200_v25  ;;  %1220 = vmatprep.mubr.bf16.mxu1 %v4202_v26 }
  0x75   : > { %1157 = vmatmul.mubr.bf16.gmra.mrb[8].mxu0 %v4204_v27  ;;  %1221 = vmatmul.mubr.bf16.gmra.mrb[8].mxu1 %v4205_v28  ;;  %v760_v27 = vld [vmem:[#allocation2 + $0x20] sm:$0xff] }
  0x76   : > { %1164 = vmatprep.mubr.bf16.mxu0 %v4206_v29  ;;  %1228 = vmatprep.mubr.bf16.mxu1 %v4208_v30  ;;  %v776_v29 = vld [vmem:[#allocation2 + $0xa0] sm:$0xff] }
  0x7d   : > { %1165 = vmatmul.mubr.bf16.gmra.mrb[12].mxu0 %v4210_v31  ;;  %1229 = vmatmul.mubr.bf16.gmra.mrb[12].mxu1 %v4211_v32 }
  0x7e   : > { %1172 = vmatprep.mubr.bf16.mxu0 %v4212_v33  ;;  %1236 = vmatprep.mubr.bf16.mxu1 %v4214_v34 }
  0x85   : > { %1173 = vmatmul.mubr.bf16.gmra.mrb[16].mxu0 %v4216_v35  ;;  %1237 = vmatmul.mubr.bf16.gmra.mrb[16].mxu1 %v4217_v36  ;;  %v761_v35 = vld [vmem:[#allocation2 + $0x28] sm:$0xff] }
  0x86   : > { %1180 = vmatprep.mubr.bf16.mxu0 %v4218_v37  ;;  %1244 = vmatprep.mubr.bf16.mxu1 %v4220_v38  ;;  %v777_v37 = vld [vmem:[#allocation2 + $0xa8] sm:$0xff] }
  0x8d   : > { %1181 = vmatmul.mubr.bf16.gmra.mrb[20].mxu0 %v4222_v39  ;;  %1245 = vmatmul.mubr.bf16.gmra.mrb[20].mxu1 %v4223_v40 }
  0x8e   : > { %1188 = vmatprep.mubr.bf16.mxu0 %v4224_v41  ;;  %1252 = vmatprep.mubr.bf16.mxu1 %v4226_v42 }
  0x95   : > { %1189 = vmatmul.mubr.bf16.gmra.mrb[24].mxu0 %v4228_v43  ;;  %1253 = vmatmul.mubr.bf16.gmra.mrb[24].mxu1 %v4229_v44 }
  0x96   : > { %1196 = vmatprep.mubr.bf16.mxu0 %v4230_v45  ;;  %1260 = vmatprep.mubr.bf16.mxu1 %v4232_v46 }
  0x9d   : > { %1197 = vmatmul.mubr.bf16.gmra.mrb[28].mxu0 %v4234_v47  ;;  %1261 = vmatmul.mubr.bf16.gmra.mrb[28].mxu1 %v4235_v48  ;;  %v762_v47 = vld [vmem:[#allocation2 + $0x30] sm:$0xff] }
 0x138   : > { %v3673_v49 = vpop.f32.mrb[0].mxu0  ;;  %v3721_v50 = vpop.f32.mrb[0].mxu1 }
 0x139   : > { %v3674_v52 = vpop.f32.mrb[1].mxu0  ;;  %v3722_v54 = vpop.f32.mrb[1].mxu1 }
 0x13a   : > { %v3675_v55 = vadd.f32 %v3674_v52, %v3673_v49  ;;  %v3723_v56 = vadd.f32 %v3722_v54, %v3721_v50  ;;  %v3676_v57 = vpop.f32.mrb[2].mxu0  ;;  %v3724_v58 = vpop.f32.mrb[2].mxu1  ;;  %v778_v49 = vld [vmem:[#allocation2 + $0xb0] sm:$0xff] }
 0x13b   : > { %v3677_v60 = vpop.f32.mrb[3].mxu0  ;;  %v3725_v62 = vpop.f32.mrb[3].mxu1 }
 0x13c   : > { %v1269_v63 = vadd.f32 %v3675_v55, %v756_v51  ;;  %v1285_v0 = vadd.f32 %v3723_v56, %v772_v53  ;;  %v3678_v1 = vadd.f32 %v3677_v60, %v3676_v57  ;;  %v3726_v2 = vadd.f32 %v3725_v62, %v3724_v58  ;;  %v763_v55 = vld [vmem:[#allocation2 + $0x38] sm:$0xff] }
 0x13d   : > { %v779_v57 = vld [vmem:[#allocation2 + $0xb8] sm:$0xff] }
 0x13e   : > { %1301 = vst [vmem:[#allocation2] sm:$0xff] %v1269_v63  ;;  %1317 = vst [vmem:[#allocation2 + $0x80] sm:$0xff] %v1285_v0  ;;  %v1270_v3 = vadd.f32 %v3678_v1, %v757_v59  ;;  %v1286_v4 = vadd.f32 %v3726_v2, %v773_v61 }
 0x140   : > { %1302 = vst [vmem:[#allocation2 + $0x8] sm:$0xff] %v1270_v3  ;;  %1318 = vst [vmem:[#allocation2 + $0x88] sm:$0xff] %v1286_v4  ;;  %v3679_v5 = vpop.f32.mrb[4].mxu0  ;;  %v3727_v6 = vpop.f32.mrb[4].mxu1  ;;  %v764_v3 = vld [vmem:[#allocation2 + $0x40] sm:$0xff] }
 0x141   : > { %v3680_v8 = vpop.f32.mrb[5].mxu0  ;;  %v3728_v10 = vpop.f32.mrb[5].mxu1 }
 0x142   : > { %v3681_v11 = vadd.f32 %v3680_v8, %v3679_v5  ;;  %v3729_v12 = vadd.f32 %v3728_v10, %v3727_v6  ;;  %v3682_v13 = vpop.f32.mrb[6].mxu0  ;;  %v3730_v14 = vpop.f32.mrb[6].mxu1  ;;  %v780_v5 = vld [vmem:[#allocation2 + $0xc0] sm:$0xff] }
 0x143   : > { %v3683_v16 = vpop.f32.mrb[7].mxu0  ;;  %v3731_v18 = vpop.f32.mrb[7].mxu1 }
 0x144   : > { %v1271_v19 = vadd.f32 %v3681_v11, %v758_v7  ;;  %v1287_v20 = vadd.f32 %v3729_v12, %v774_v9  ;;  %v3684_v21 = vadd.f32 %v3683_v16, %v3682_v13  ;;  %v3732_v22 = vadd.f32 %v3731_v18, %v3730_v14  ;;  %v765_v11 = vld [vmem:[#allocation2 + $0x48] sm:$0xff] }
 0x145   : > { %v781_v13 = vld [vmem:[#allocation2 + $0xc8] sm:$0xff] }
 0x146   : > { %1303 = vst [vmem:[#allocation2 + $0x10] sm:$0xff] %v1271_v19  ;;  %1319 = vst [vmem:[#allocation2 + $0x90] sm:$0xff] %v1287_v20  ;;  %v1272_v23 = vadd.f32 %v3684_v21, %v759_v15  ;;  %v1288_v24 = vadd.f32 %v3732_v22, %v775_v17 }
 0x148   : > { %1304 = vst [vmem:[#allocation2 + $0x18] sm:$0xff] %v1272_v23  ;;  %1320 = vst [vmem:[#allocation2 + $0x98] sm:$0xff] %v1288_v24  ;;  %v3685_v25 = vpop.f32.mrb[8].mxu0  ;;  %v3733_v26 = vpop.f32.mrb[8].mxu1  ;;  %v766_v23 = vld [vmem:[#allocation2 + $0x50] sm:$0xff] }
 0x149   : > { %v3686_v28 = vpop.f32.mrb[9].mxu0  ;;  %v3734_v30 = vpop.f32.mrb[9].mxu1 }
 0x14a   : > { %v3687_v31 = vadd.f32 %v3686_v28, %v3685_v25  ;;  %v3735_v32 = vadd.f32 %v3734_v30, %v3733_v26  ;;  %v3688_v33 = vpop.f32.mrb[10].mxu0  ;;  %v3736_v34 = vpop.f32.mrb[10].mxu1  ;;  %v782_v25 = vld [vmem:[#allocation2 + $0xd0] sm:$0xff] }
 0x14b   : > { %v3689_v36 = vpop.f32.mrb[11].mxu0  ;;  %v3737_v38 = vpop.f32.mrb[11].mxu1 }
 0x14c   : > { %v1273_v39 = vadd.f32 %v3687_v31, %v760_v27  ;;  %v1289_v40 = vadd.f32 %v3735_v32, %v776_v29  ;;  %v3690_v41 = vadd.f32 %v3689_v36, %v3688_v33  ;;  %v3738_v42 = vadd.f32 %v3737_v38, %v3736_v34  ;;  %v767_v31 = vld [vmem:[#allocation2 + $0x58] sm:$0xff] }
 0x14d   : > { %v783_v33 = vld [vmem:[#allocation2 + $0xd8] sm:$0xff] }
 0x14e   : > { %1305 = vst [vmem:[#allocation2 + $0x20] sm:$0xff] %v1273_v39  ;;  %1321 = vst [vmem:[#allocation2 + $0xa0] sm:$0xff] %v1289_v40  ;;  %v1274_v43 = vadd.f32 %v3690_v41, %v761_v35  ;;  %v1290_v44 = vadd.f32 %v3738_v42, %v777_v37 }
 0x150   : > { %1306 = vst [vmem:[#allocation2 + $0x28] sm:$0xff] %v1274_v43  ;;  %1322 = vst [vmem:[#allocation2 + $0xa8] sm:$0xff] %v1290_v44  ;;  %v3691_v45 = vpop.f32.mrb[12].mxu0  ;;  %v3739_v46 = vpop.f32.mrb[12].mxu1  ;;  %v768_v43 = vld [vmem:[#allocation2 + $0x60] sm:$0xff] }
 0x151   : > { %v3692_v48 = vpop.f32.mrb[13].mxu0  ;;  %v3740_v50 = vpop.f32.mrb[13].mxu1 }
 0x152   : > { %v3693_v51 = vadd.f32 %v3692_v48, %v3691_v45  ;;  %v3741_v52 = vadd.f32 %v3740_v50, %v3739_v46  ;;  %v3694_v53 = vpop.f32.mrb[14].mxu0  ;;  %v3742_v54 = vpop.f32.mrb[14].mxu1  ;;  %v784_v45 = vld [vmem:[#allocation2 + $0xe0] sm:$0xff] }
 0x153   : > { %v3695_v56 = vpop.f32.mrb[15].mxu0  ;;  %v3743_v58 = vpop.f32.mrb[15].mxu1 }
 0x154   : > { %v1275_v59 = vadd.f32 %v3693_v51, %v762_v47  ;;  %v1291_v60 = vadd.f32 %v3741_v52, %v778_v49  ;;  %v3696_v61 = vadd.f32 %v3695_v56, %v3694_v53  ;;  %v3744_v62 = vadd.f32 %v3743_v58, %v3742_v54  ;;  %v769_v51 = vld [vmem:[#allocation2 + $0x68] sm:$0xff] }
 0x155   : > { %v785_v53 = vld [vmem:[#allocation2 + $0xe8] sm:$0xff] }
 0x156   : > { %1307 = vst [vmem:[#allocation2 + $0x30] sm:$0xff] %v1275_v59  ;;  %1323 = vst [vmem:[#allocation2 + $0xb0] sm:$0xff] %v1291_v60  ;;  %v1276_v63 = vadd.f32 %v3696_v61, %v763_v55  ;;  %v1292_v0 = vadd.f32 %v3744_v62, %v779_v57 }
 0x158   : > { %1308 = vst [vmem:[#allocation2 + $0x38] sm:$0xff] %v1276_v63  ;;  %1324 = vst [vmem:[#allocation2 + $0xb8] sm:$0xff] %v1292_v0  ;;  %v3697_v1 = vpop.f32.mrb[16].mxu0  ;;  %v3745_v2 = vpop.f32.mrb[16].mxu1  ;;  %v770_v63 = vld [vmem:[#allocation2 + $0x70] sm:$0xff] }
 0x159   : > { %v3698_v4 = vpop.f32.mrb[17].mxu0  ;;  %v3746_v6 = vpop.f32.mrb[17].mxu1 }
 0x15a   : > { %v3699_v7 = vadd.f32 %v3698_v4, %v3697_v1  ;;  %v3747_v8 = vadd.f32 %v3746_v6, %v3745_v2  ;;  %v3700_v9 = vpop.f32.mrb[18].mxu0  ;;  %v3748_v10 = vpop.f32.mrb[18].mxu1  ;;  %v786_v1 = vld [vmem:[#allocation2 + $0xf0] sm:$0xff] }
 0x15b   : > { %v3701_v12 = vpop.f32.mrb[19].mxu0  ;;  %v3749_v14 = vpop.f32.mrb[19].mxu1 }
 0x15c   : > { %v1277_v15 = vadd.f32 %v3699_v7, %v764_v3  ;;  %v1293_v16 = vadd.f32 %v3747_v8, %v780_v5  ;;  %v3702_v17 = vadd.f32 %v3701_v12, %v3700_v9  ;;  %v3750_v18 = vadd.f32 %v3749_v14, %v3748_v10  ;;  %v771_v7 = vld [vmem:[#allocation2 + $0x78] sm:$0xff] }
 0x15d   : > { %v787_v9 = vld [vmem:[#allocation2 + $0xf8] sm:$0xff] }
 0x15e   : > { %1309 = vst [vmem:[#allocation2 + $0x40] sm:$0xff] %v1277_v15  ;;  %1325 = vst [vmem:[#allocation2 + $0xc0] sm:$0xff] %v1293_v16  ;;  %v1278_v19 = vadd.f32 %v3702_v17, %v765_v11  ;;  %v1294_v20 = vadd.f32 %v3750_v18, %v781_v13 }
 0x160   : > { %1310 = vst [vmem:[#allocation2 + $0x48] sm:$0xff] %v1278_v19  ;;  %1326 = vst [vmem:[#allocation2 + $0xc8] sm:$0xff] %v1294_v20  ;;  %v3703_v21 = vpop.f32.mrb[20].mxu0  ;;  %v3751_v22 = vpop.f32.mrb[20].mxu1 }
 0x161   : > { %v3704_v24 = vpop.f32.mrb[21].mxu0  ;;  %v3752_v26 = vpop.f32.mrb[21].mxu1 }
 0x162   : > { %v3705_v27 = vadd.f32 %v3704_v24, %v3703_v21  ;;  %v3753_v28 = vadd.f32 %v3752_v26, %v3751_v22  ;;  %v3706_v29 = vpop.f32.mrb[22].mxu0  ;;  %v3754_v30 = vpop.f32.mrb[22].mxu1 }
 0x163   : > { %v3707_v32 = vpop.f32.mrb[23].mxu0  ;;  %v3755_v34 = vpop.f32.mrb[23].mxu1 }
 0x164   : > { %v1279_v35 = vadd.f32 %v3705_v27, %v766_v23  ;;  %v1295_v36 = vadd.f32 %v3753_v28, %v782_v25  ;;  %v3708_v37 = vadd.f32 %v3707_v32, %v3706_v29  ;;  %v3756_v38 = vadd.f32 %v3755_v34, %v3754_v30 }
 0x166   : > { %1311 = vst [vmem:[#allocation2 + $0x50] sm:$0xff] %v1279_v35  ;;  %1327 = vst [vmem:[#allocation2 + $0xd0] sm:$0xff] %v1295_v36  ;;  %v1280_v39 = vadd.f32 %v3708_v37, %v767_v31  ;;  %v1296_v40 = vadd.f32 %v3756_v38, %v783_v33 }
 0x168   : > { %1312 = vst [vmem:[#allocation2 + $0x58] sm:$0xff] %v1280_v39  ;;  %1328 = vst [vmem:[#allocation2 + $0xd8] sm:$0xff] %v1296_v40  ;;  %v3709_v41 = vpop.f32.mrb[24].mxu0  ;;  %v3757_v42 = vpop.f32.mrb[24].mxu1 }
 0x169   : > { %v3710_v44 = vpop.f32.mrb[25].mxu0  ;;  %v3758_v46 = vpop.f32.mrb[25].mxu1 }
 0x16a   : > { %v3711_v47 = vadd.f32 %v3710_v44, %v3709_v41  ;;  %v3759_v48 = vadd.f32 %v3758_v46, %v3757_v42  ;;  %v3712_v49 = vpop.f32.mrb[26].mxu0  ;;  %v3760_v50 = vpop.f32.mrb[26].mxu1 }
 0x16b   : > { %v3713_v52 = vpop.f32.mrb[27].mxu0  ;;  %v3761_v54 = vpop.f32.mrb[27].mxu1 }
 0x16c   : > { %v1281_v55 = vadd.f32 %v3711_v47, %v768_v43  ;;  %v1297_v56 = vadd.f32 %v3759_v48, %v784_v45  ;;  %v3714_v57 = vadd.f32 %v3713_v52, %v3712_v49  ;;  %v3762_v58 = vadd.f32 %v3761_v54, %v3760_v50 }
 0x16e   : > { %1313 = vst [vmem:[#allocation2 + $0x60] sm:$0xff] %v1281_v55  ;;  %1329 = vst [vmem:[#allocation2 + $0xe0] sm:$0xff] %v1297_v56  ;;  %v1282_v59 = vadd.f32 %v3714_v57, %v769_v51  ;;  %v1298_v60 = vadd.f32 %v3762_v58, %v785_v53 }
 0x170   : > { %1314 = vst [vmem:[#allocation2 + $0x68] sm:$0xff] %v1282_v59  ;;  %1330 = vst [vmem:[#allocation2 + $0xe8] sm:$0xff] %v1298_v60  ;;  %v3715_v61 = vpop.f32.mrb[28].mxu0  ;;  %v3763_v62 = vpop.f32.mrb[28].mxu1 }
 0x171   : > { %v3716_v0 = vpop.f32.mrb[29].mxu0  ;;  %v3764_v2 = vpop.f32.mrb[29].mxu1 }
 0x172   : > { %v3717_v3 = vadd.f32 %v3716_v0, %v3715_v61  ;;  %v3765_v4 = vadd.f32 %v3764_v2, %v3763_v62  ;;  %v3718_v5 = vpop.f32.mrb[30].mxu0  ;;  %v3766_v6 = vpop.f32.mrb[30].mxu1 }
 0x173   : > { %v3719_v8 = vpop.f32.mrb[31].mxu0  ;;  %v3767_v10 = vpop.f32.mrb[31].mxu1 }
 0x174   : > { %v1283_v11 = vadd.f32 %v3717_v3, %v770_v63  ;;  %v1299_v12 = vadd.f32 %v3765_v4, %v786_v1  ;;  %v3720_v13 = vadd.f32 %v3719_v8, %v3718_v5  ;;  %v3768_v14 = vadd.f32 %v3767_v10, %v3766_v6 }
 0x176   : > { %1315 = vst [vmem:[#allocation2 + $0x70] sm:$0xff] %v1283_v11  ;;  %1331 = vst [vmem:[#allocation2 + $0xf0] sm:$0xff] %v1299_v12  ;;  %v1284_v15 = vadd.f32 %v3720_v13, %v771_v7  ;;  %v1300_v16 = vadd.f32 %v3768_v14, %v787_v9 }
 0x178   : > { %1316 = vst [vmem:[#allocation2 + $0x78] sm:$0xff] %v1284_v15  ;;  %1332 = vst [vmem:[#allocation2 + $0xf8] sm:$0xff] %v1300_v16 }
 0x179 PF: > { %p1333_p8 = scmp.eq.s32.totalorder %s4428_s1, 1 }
 0x17b   : > { %p1334_p9 = pnand %p3329_p6, %p1333_p8 }
 0x17c   : > { %v4236_v17 = vld [vmem:[%s4572_s23 + $0x84] ss:$8 sps:$4 sm:$0xff] (!%p1334_p9)   ;;  %v4238_v18 = vld [vmem:[%s4572_s23 + $0x80] ss:$8 sps:$4 sm:$0xff] (!%p1334_p9)   ;;  %v4239_v19 = vld [vmem:[%s4572_s23 + $0x94] ss:$8 sps:$4 sm:$0xff] (!%p1334_p9)  }
 0x17d   : > { %1337 = sbr.rel (%p1334_p9) target bundleno = 792 (0x318), region = 64  ;;  %1642 = vxpose.xlu1.c.b16.start [1/8] (!%p1334_p9), %v4236_v17, 128  ;;  %1626 = vxpose.xlu0.c.b16.start [1/8] (!%p1334_p9), %v4238_v18, 128  ;;  %v4241_v20 = vld [vmem:[%s4572_s23 + $0x90] ss:$8 sps:$4 sm:$0xff] (!%p1334_p9)   ;;  %v4242_v21 = vld [vmem:[%s4572_s23 + $0xa4] ss:$8 sps:$4 sm:$0xff] (!%p1334_p9)  }
 0x17e   : > { %v4244_v22 = vld [vmem:[%s4572_s23 + $0xa0] ss:$8 sps:$4 sm:$0xff] (!%p1334_p9)   ;;  %v4245_v23 = vld [vmem:[%s4572_s23 + $0xb4] ss:$8 sps:$4 sm:$0xff] (!%p1334_p9)   ;;  %v4247_v24 = vld [vmem:[%s4572_s23 + $0xb0] ss:$8 sps:$4 sm:$0xff] (!%p1334_p9)  }
 0x17f   : > { %v4248_v25 = vld [vmem:[%s4572_s23 + $0xc4] ss:$8 sps:$4 sm:$0xff] (!%p1334_p9)   ;;  %v4250_v26 = vld [vmem:[%s4572_s23 + $0xc0] ss:$8 sps:$4 sm:$0xff] (!%p1334_p9)   ;;  %v4251_v27 = vld [vmem:[%s4572_s23 + $0xd4] ss:$8 sps:$4 sm:$0xff] (!%p1334_p9)  }
 0x180   : > { %v4253_v28 = vld [vmem:[%s4572_s23 + $0xd0] ss:$8 sps:$4 sm:$0xff] (!%p1334_p9)   ;;  %v4254_v29 = vld [vmem:[%s4572_s23 + $0xe4] ss:$8 sps:$4 sm:$0xff] (!%p1334_p9)   ;;  %v4256_v30 = vld [vmem:[%s4572_s23 + $0xe0] ss:$8 sps:$4 sm:$0xff] (!%p1334_p9)  }
 0x181   : > { %1643 = vxpose.xlu1.c.b16.cont [2/8] (!%p1334_p9), %v4239_v19, 128  ;;  %1627 = vxpose.xlu0.c.b16.cont [2/8] (!%p1334_p9), %v4241_v20, 128  ;;  %v4284_v31 = vld [vmem:[%s4598_s17 + $0x40] sm:$0xff] (!%p1334_p9)   ;;  %v4257_v33 = vld [vmem:[%s4572_s23 + $0xf4] ss:$8 sps:$4 sm:$0xff] (!%p1334_p9)   ;;  %v4286_v34 = vld [vmem:[%s4598_s17 + $0x48] sm:$0xff] (!%p1334_p9)  }
 0x182   : > { %v4285_v32 = vld [vmem:[%s4598_s17] sm:$0xff] (!%p1334_p9)   ;;  %3769 = vmatprep.subr.bf16.mxu0 (!%p1334_p9), %v4284_v31  ;;  %4129 = vmatprep.subr.bf16.mxu1 (!%p1334_p9), %v4284_v31  ;;  %v4287_v35 = vld [vmem:[%s4598_s17 + $0x8] sm:$0xff] (!%p1334_p9)   ;;  %v4288_v36 = vld [vmem:[%s4598_s17 + $0x50] sm:$0xff] (!%p1334_p9)  }
 0x183   : > { %3770 = vmatpush3.bf16.msra.mxu0 (!%p1334_p9), %v4285_v32  ;;  %4137 = vmatpush3.bf16.msra.mxu1 (!%p1334_p9), %v4285_v32  ;;  %v4259_v37 = vld [vmem:[%s4572_s23 + $0xf0] ss:$8 sps:$4 sm:$0xff] (!%p1334_p9)   ;;  %v4260_v38 = vld [vmem:[%s4572_s23 + $0x4] ss:$8 sps:$4 sm:$0xff] (!%p1334_p9)   ;;  %v4262_v41 = vld [vmem:[%s4572_s23] ss:$8 sps:$4 sm:$0xff] (!%p1334_p9)  }
 0x184   : > { %3771 = vmatprep.subr.bf16.mxu0 %v4286_v34  ;;  %4130 = vmatprep.subr.bf16.mxu1 %v4286_v34  ;;  %v4289_v39 = vld [vmem:[%s4598_s17 + $0x10] sm:$0xff]   ;;  %v4290_v40 = vld [vmem:[%s4598_s17 + $0x58] sm:$0xff]   ;;  %v4292_v44 = vld [vmem:[%s4598_s17 + $0x60] sm:$0xff]  }
 0x185   : > { %1644 = vxpose.xlu1.c.b16.cont [3/8] %v4242_v21, 128  ;;  %1628 = vxpose.xlu0.c.b16.cont [3/8] %v4244_v22, 128  ;;  %v4263_v42 = vld [vmem:[%s4572_s23 + $0x14] ss:$8 sps:$4 sm:$0xff]   ;;  %v4265_v45 = vld [vmem:[%s4572_s23 + $0x10] ss:$8 sps:$4 sm:$0xff]   ;;  %v4293_v46 = vld [vmem:[%s4598_s17 + $0x20] sm:$0xff]  }
 0x186   : > { %v4291_v43 = vld [vmem:[%s4598_s17 + $0x18] sm:$0xff]   ;;  %v4266_v47 = vld [vmem:[%s4572_s23 + $0x24] ss:$8 sps:$4 sm:$0xff]   ;;  %v4268_v49 = vld [vmem:[%s4572_s23 + $0x20] ss:$8 sps:$4 sm:$0xff]  }
 0x187   : > { %3772 = vmatpush3.bf16.msra.mxu0 %v4287_v35  ;;  %4138 = vmatpush3.bf16.msra.mxu1 %v4287_v35  ;;  %v4294_v48 = vld [vmem:[%s4598_s17 + $0x68] sm:$0xff]   ;;  %v4269_v51 = vld [vmem:[%s4572_s23 + $0x34] ss:$8 sps:$4 sm:$0xff]   ;;  %v4271_v53 = vld [vmem:[%s4572_s23 + $0x30] ss:$8 sps:$4 sm:$0xff]  }
 0x188   : > { %3773 = vmatprep.subr.bf16.mxu0 %v4288_v36  ;;  %4131 = vmatprep.subr.bf16.mxu1 %v4288_v36  ;;  %v4295_v50 = vld [vmem:[%s4598_s17 + $0x28] sm:$0xff]   ;;  %v4296_v52 = vld [vmem:[%s4598_s17 + $0x70] sm:$0xff]   ;;  %v4298_v56 = vld [vmem:[%s4598_s17 + $0x78] sm:$0xff]  }
 0x189   : > { %1645 = vxpose.xlu1.c.b16.cont [4/8] %v4245_v23, 128  ;;  %1629 = vxpose.xlu0.c.b16.cont [4/8] %v4247_v24, 128  ;;  %v4297_v54 = vld [vmem:[%s4598_s17 + $0x30] sm:$0xff]   ;;  %v4272_v55 = vld [vmem:[%s4572_s23 + $0x44] ss:$8 sps:$4 sm:$0xff]   ;;  %v4274_v57 = vld [vmem:[%s4572_s23 + $0x40] ss:$8 sps:$4 sm:$0xff]  }
 0x18a   : > { %v4299_v58 = vld [vmem:[%s4598_s17 + $0x38] sm:$0xff]   ;;  %v4278_v61 = vld [vmem:[%s4572_s23 + $0x64] ss:$8 sps:$4 sm:$0xff]   ;;  %v4280_v62 = vld [vmem:[%s4572_s23 + $0x60] ss:$8 sps:$4 sm:$0xff]  }
 0x18b   : > { %3774 = vmatpush3.bf16.msra.mxu0 %v4289_v39  ;;  %4139 = vmatpush3.bf16.msra.mxu1 %v4289_v39  ;;  %v4275_v59 = vld [vmem:[%s4572_s23 + $0x54] ss:$8 sps:$4 sm:$0xff]   ;;  %v4277_v60 = vld [vmem:[%s4572_s23 + $0x50] ss:$8 sps:$4 sm:$0xff]   ;;  %v1354_v35 = vld [vmem:[#allocation2 + $0x80] sm:$0xff] }
 0x18c   : > { %3775 = vmatprep.subr.bf16.mxu0 %v4290_v40  ;;  %4132 = vmatprep.subr.bf16.mxu1 %v4290_v40  ;;  %v4281_v63 = vld [vmem:[%s4572_s23 + $0x74] ss:$8 sps:$4 sm:$0xff]   ;;  %v4283_v0 = vld [vmem:[%s4572_s23 + $0x70] ss:$8 sps:$4 sm:$0xff]  }
 0x18d   : > { %1646 = vxpose.xlu1.c.b16.cont [5/8] %v4248_v25, 128  ;;  %1630 = vxpose.xlu0.c.b16.cont [5/8] %v4250_v26, 128 }
 0x18f   : > { %3776 = vmatpush3.bf16.msra.mxu0 %v4291_v43  ;;  %4140 = vmatpush3.bf16.msra.mxu1 %v4291_v43  ;;  %v1355_v43 = vld [vmem:[#allocation2 + $0x88] sm:$0xff] }
 0x190   : > { %3777 = vmatprep.subr.bf16.mxu0 %v4292_v44  ;;  %4133 = vmatprep.subr.bf16.mxu1 %v4292_v44 }
 0x191   : > { %1647 = vxpose.xlu1.c.b16.cont [6/8] %v4251_v27, 128  ;;  %1631 = vxpose.xlu0.c.b16.cont [6/8] %v4253_v28, 128 }
 0x193   : > { %3778 = vmatpush3.bf16.msra.mxu0 %v4293_v46  ;;  %4141 = vmatpush3.bf16.msra.mxu1 %v4293_v46  ;;  %v1339_v46 = vld [vmem:[#allocation2 + $0x8] sm:$0xff] }
 0x194   : > { %3779 = vmatprep.subr.bf16.mxu0 %v4294_v48  ;;  %4134 = vmatprep.subr.bf16.mxu1 %v4294_v48 }
 0x195   : > { %1648 = vxpose.xlu1.c.b16.cont [7/8] %v4254_v29, 128  ;;  %1632 = vxpose.xlu0.c.b16.cont [7/8] %v4256_v30, 128 }
 0x197   : > { %3780 = vmatpush3.bf16.msra.mxu0 %v4295_v50  ;;  %4142 = vmatpush3.bf16.msra.mxu1 %v4295_v50 }
 0x198   : > { %3781 = vmatprep.subr.bf16.mxu0 %v4296_v52  ;;  %4135 = vmatprep.subr.bf16.mxu1 %v4296_v52 }
 0x199   : > { %1649 = vxpose.xlu1.c.b16.end [8/8] %v4257_v33, 128  ;;  %1633 = vxpose.xlu0.c.b16.end [8/8] %v4259_v37, 128  ;;  %v1338_v37 = vld [vmem:[#allocation2] sm:$0xff] }
 0x19b   : > { %3782 = vmatpush3.bf16.msra.mxu0 %v4297_v54  ;;  %4143 = vmatpush3.bf16.msra.mxu1 %v4297_v54 }
 0x19c   : > { %3783 = vmatprep.subr.bf16.mxu0 %v4298_v56  ;;  %4136 = vmatprep.subr.bf16.mxu1 %v4298_v56 }
 0x19d   : > { %1610 = vxpose.xlu1.c.b16.start [1/8] %v4260_v38, 128  ;;  %1594 = vxpose.xlu0.c.b16.start [1/8] %v4262_v41, 128 }
 0x19f   : > { %3784 = vmatpush3.bf16.msra.mxu0 %v4299_v58  ;;  %4144 = vmatpush3.bf16.msra.mxu1 %v4299_v58 }
 0x1a1   : > { %1611 = vxpose.xlu1.c.b16.cont [2/8] %v4263_v42, 128  ;;  %1595 = vxpose.xlu0.c.b16.cont [2/8] %v4265_v45, 128 }
 0x1a5   : > { %1612 = vxpose.xlu1.c.b16.cont [3/8] %v4266_v47, 128  ;;  %1596 = vxpose.xlu0.c.b16.cont [3/8] %v4268_v49, 128 }
 0x1a9   : > { %1613 = vxpose.xlu1.c.b16.cont [4/8] %v4269_v51, 128  ;;  %1597 = vxpose.xlu0.c.b16.cont [4/8] %v4271_v53, 128 }
 0x1ad   : > { %1614 = vxpose.xlu1.c.b16.cont [5/8] %v4272_v55, 128  ;;  %1598 = vxpose.xlu0.c.b16.cont [5/8] %v4274_v57, 128  ;;  %v1356_v55 = vld [vmem:[#allocation2 + $0x90] sm:$0xff] }
 0x1ae   : > { %v1340_v57 = vld [vmem:[#allocation2 + $0x10] sm:$0xff] }
 0x1b1   : > { %1615 = vxpose.xlu1.c.b16.cont [6/8] %v4275_v59, 128  ;;  %1599 = vxpose.xlu0.c.b16.cont [6/8] %v4277_v60, 128 }
 0x1b5   : > { %1616 = vxpose.xlu1.c.b16.cont [7/8] %v4278_v61, 128  ;;  %1600 = vxpose.xlu0.c.b16.cont [7/8] %v4280_v62, 128 }
 0x1b9   : > { %1617 = vxpose.xlu1.c.b16.end [8/8] %v4281_v63, 128  ;;  %1601 = vxpose.xlu0.c.b16.end [8/8] %v4283_v0, 128  ;;  %v1357_v63 = vld [vmem:[#allocation2 + $0x98] sm:$0xff] }
 0x1e3   : > { %v1650_v1 = vpop.trf.xlu1  ;;  %v1634_v2 = vpop.trf.xlu0 }
 0x1e4   : > { %1850 = vmatprep.mubr.bf16.mxu1 %v1650_v1  ;;  %1786 = vmatprep.mubr.bf16.mxu0 %v1634_v2  ;;  %v1341_v2 = vld [vmem:[#allocation2 + $0x18] sm:$0xff] }
 0x1e7   : > { %v1651_v3 = vpop.trf.xlu1  ;;  %v1635_v4 = vpop.trf.xlu0 }
 0x1eb   : > { %v1652_v5 = vpop.trf.xlu1  ;;  %v1636_v6 = vpop.trf.xlu0 }
 0x1ef   : > { %v1653_v7 = vpop.trf.xlu1  ;;  %v1637_v8 = vpop.trf.xlu0 }
 0x1f3   : > { %v1654_v9 = vpop.trf.xlu1  ;;  %v1638_v10 = vpop.trf.xlu0 }
 0x1f7   : > { %v1655_v11 = vpop.trf.xlu1  ;;  %v1639_v12 = vpop.trf.xlu0 }
 0x1fb   : > { %v1656_v13 = vpop.trf.xlu1  ;;  %v1640_v14 = vpop.trf.xlu0 }
 0x1ff   : > { %v1657_v15 = vpop.trf.xlu1  ;;  %v1641_v16 = vpop.trf.xlu0 }
 0x203   : > { %v1618_v17 = vpop.trf.xlu1  ;;  %v1602_v18 = vpop.trf.xlu0 }
 0x204   : > { %1851 = vmatmul.mubr.bf16.vlgmr.msra.gmra.mrb[0].mxu1 %v1618_v17  ;;  %1787 = vmatmul.mubr.bf16.vlgmr.msra.gmra.mrb[0].mxu0 %v1602_v18 }
 0x205   : > { %1858 = vmatprep.mubr.bf16.mxu1 %v1651_v3  ;;  %1794 = vmatprep.mubr.bf16.mxu0 %v1635_v4 }
 0x207   : > { %v1619_v19 = vpop.trf.xlu1  ;;  %v1603_v20 = vpop.trf.xlu0 }
 0x20b   : > { %v1620_v21 = vpop.trf.xlu1  ;;  %v1604_v22 = vpop.trf.xlu0 }
 0x20c   : > { %1859 = vmatmul.mubr.bf16.gmra.mrb[4].mxu1 %v1619_v19  ;;  %1795 = vmatmul.mubr.bf16.gmra.mrb[4].mxu0 %v1603_v20  ;;  %v1359_v19 = vld [vmem:[#allocation2 + $0xa8] sm:$0xff] }
 0x20d   : > { %1866 = vmatprep.mubr.bf16.mxu1 %v1652_v5  ;;  %1802 = vmatprep.mubr.bf16.mxu0 %v1636_v6 }
 0x20f   : > { %v1621_v23 = vpop.trf.xlu1  ;;  %v1605_v24 = vpop.trf.xlu0 }
 0x213   : > { %v1622_v25 = vpop.trf.xlu1  ;;  %v1606_v26 = vpop.trf.xlu0 }
 0x214   : > { %1867 = vmatmul.mubr.bf16.gmra.mrb[8].mxu1 %v1620_v21  ;;  %1803 = vmatmul.mubr.bf16.gmra.mrb[8].mxu0 %v1604_v22  ;;  %v1343_v22 = vld [vmem:[#allocation2 + $0x28] sm:$0xff] }
 0x215   : > { %1874 = vmatprep.mubr.bf16.mxu1 %v1653_v7  ;;  %1810 = vmatprep.mubr.bf16.mxu0 %v1637_v8 }
 0x217   : > { %v1623_v27 = vpop.trf.xlu1  ;;  %v1607_v28 = vpop.trf.xlu0 }
 0x21b   : > { %v1624_v29 = vpop.trf.xlu1  ;;  %v1608_v30 = vpop.trf.xlu0 }
 0x21c   : > { %1875 = vmatmul.mubr.bf16.gmra.mrb[12].mxu1 %v1621_v23  ;;  %1811 = vmatmul.mubr.bf16.gmra.mrb[12].mxu0 %v1605_v24 }
 0x21d   : > { %1882 = vmatprep.mubr.bf16.mxu1 %v1654_v9  ;;  %1818 = vmatprep.mubr.bf16.mxu0 %v1638_v10 }
 0x21f   : > { %v1625_v31 = vpop.trf.xlu1  ;;  %v1609_v32 = vpop.trf.xlu0 }
 0x224   : > { %1883 = vmatmul.mubr.bf16.gmra.mrb[16].mxu1 %v1622_v25  ;;  %1819 = vmatmul.mubr.bf16.gmra.mrb[16].mxu0 %v1606_v26 }
 0x225   : > { %1890 = vmatprep.mubr.bf16.mxu1 %v1655_v11  ;;  %1826 = vmatprep.mubr.bf16.mxu0 %v1639_v12  ;;  %v1358_v11 = vld [vmem:[#allocation2 + $0xa0] sm:$0xff] }
 0x22c   : > { %1891 = vmatmul.mubr.bf16.gmra.mrb[20].mxu1 %v1623_v27  ;;  %1827 = vmatmul.mubr.bf16.gmra.mrb[20].mxu0 %v1607_v28 }
 0x22d   : > { %1898 = vmatprep.mubr.bf16.mxu1 %v1656_v13  ;;  %1834 = vmatprep.mubr.bf16.mxu0 %v1640_v14  ;;  %v1342_v13 = vld [vmem:[#allocation2 + $0x20] sm:$0xff] }
 0x234   : > { %1899 = vmatmul.mubr.bf16.gmra.mrb[24].mxu1 %v1624_v29  ;;  %1835 = vmatmul.mubr.bf16.gmra.mrb[24].mxu0 %v1608_v30 }
 0x235   : > { %1906 = vmatprep.mubr.bf16.mxu1 %v1657_v15  ;;  %1842 = vmatprep.mubr.bf16.mxu0 %v1641_v16 }
 0x23c   : > { %1907 = vmatmul.mubr.bf16.gmra.mrb[28].mxu1 %v1625_v31  ;;  %1843 = vmatmul.mubr.bf16.gmra.mrb[28].mxu0 %v1609_v32  ;;  %v1360_v31 = vld [vmem:[#allocation2 + $0xb0] sm:$0xff] }
 0x2d7   : > { %v3833_v33 = vpop.f32.mrb[0].mxu1  ;;  %v3785_v34 = vpop.f32.mrb[0].mxu0 }
 0x2d8   : > { %v3834_v36 = vpop.f32.mrb[1].mxu1  ;;  %v3786_v38 = vpop.f32.mrb[1].mxu0 }
 0x2d9   : > { %v3835_v39 = vadd.f32 %v3834_v36, %v3833_v33  ;;  %v3836_v40 = vpop.f32.mrb[2].mxu1  ;;  %v3787_v41 = vadd.f32 %v3786_v38, %v3785_v34  ;;  %v3788_v42 = vpop.f32.mrb[2].mxu0  ;;  %v1344_v33 = vld [vmem:[#allocation2 + $0x30] sm:$0xff] }
 0x2da   : > { %v3837_v44 = vpop.f32.mrb[3].mxu1  ;;  %v3789_v47 = vpop.f32.mrb[3].mxu0 }
 0x2db   : > { %v1931_v45 = vadd.f32 %v3835_v39, %v1354_v35  ;;  %v3838_v48 = vadd.f32 %v3837_v44, %v3836_v40  ;;  %v1915_v49 = vadd.f32 %v3787_v41, %v1338_v37  ;;  %v3790_v50 = vadd.f32 %v3789_v47, %v3788_v42  ;;  %v1361_v39 = vld [vmem:[#allocation2 + $0xb8] sm:$0xff] }
 0x2dc   : > { %v1345_v42 = vld [vmem:[#allocation2 + $0x38] sm:$0xff] }
 0x2dd   : > { %1963 = vst [vmem:[#allocation2 + $0x80] sm:$0xff] %v1931_v45  ;;  %v1932_v51 = vadd.f32 %v3838_v48, %v1355_v43  ;;  %1947 = vst [vmem:[#allocation2] sm:$0xff] %v1915_v49  ;;  %v1916_v52 = vadd.f32 %v3790_v50, %v1339_v46 }
 0x2df   : > { %1964 = vst [vmem:[#allocation2 + $0x88] sm:$0xff] %v1932_v51  ;;  %v3839_v53 = vpop.f32.mrb[4].mxu1  ;;  %1948 = vst [vmem:[#allocation2 + $0x8] sm:$0xff] %v1916_v52  ;;  %v3791_v54 = vpop.f32.mrb[4].mxu0  ;;  %v1362_v51 = vld [vmem:[#allocation2 + $0xc0] sm:$0xff] }
 0x2e0   : > { %v3840_v56 = vpop.f32.mrb[5].mxu1  ;;  %v3792_v58 = vpop.f32.mrb[5].mxu0 }
 0x2e1   : > { %v3841_v59 = vadd.f32 %v3840_v56, %v3839_v53  ;;  %v3842_v60 = vpop.f32.mrb[6].mxu1  ;;  %v3793_v61 = vadd.f32 %v3792_v58, %v3791_v54  ;;  %v3794_v62 = vpop.f32.mrb[6].mxu0  ;;  %v1346_v53 = vld [vmem:[#allocation2 + $0x40] sm:$0xff] }
 0x2e2   : > { %v3843_v0 = vpop.f32.mrb[7].mxu1  ;;  %v3795_v3 = vpop.f32.mrb[7].mxu0 }
 0x2e3   : > { %v1933_v1 = vadd.f32 %v3841_v59, %v1356_v55  ;;  %v3844_v4 = vadd.f32 %v3843_v0, %v3842_v60  ;;  %v1917_v5 = vadd.f32 %v3793_v61, %v1340_v57  ;;  %v3796_v6 = vadd.f32 %v3795_v3, %v3794_v62  ;;  %v1363_v59 = vld [vmem:[#allocation2 + $0xc8] sm:$0xff] }
 0x2e4   : > { %v1347_v62 = vld [vmem:[#allocation2 + $0x48] sm:$0xff] }
 0x2e5   : > { %1965 = vst [vmem:[#allocation2 + $0x90] sm:$0xff] %v1933_v1  ;;  %v1934_v7 = vadd.f32 %v3844_v4, %v1357_v63  ;;  %1949 = vst [vmem:[#allocation2 + $0x10] sm:$0xff] %v1917_v5  ;;  %v1918_v8 = vadd.f32 %v3796_v6, %v1341_v2 }
 0x2e7   : > { %1966 = vst [vmem:[#allocation2 + $0x98] sm:$0xff] %v1934_v7  ;;  %v3845_v9 = vpop.f32.mrb[8].mxu1  ;;  %1950 = vst [vmem:[#allocation2 + $0x18] sm:$0xff] %v1918_v8  ;;  %v3797_v10 = vpop.f32.mrb[8].mxu0  ;;  %v1364_v7 = vld [vmem:[#allocation2 + $0xd0] sm:$0xff] }
 0x2e8   : > { %v3846_v12 = vpop.f32.mrb[9].mxu1  ;;  %v3798_v14 = vpop.f32.mrb[9].mxu0 }
 0x2e9   : > { %v3847_v15 = vadd.f32 %v3846_v12, %v3845_v9  ;;  %v3848_v16 = vpop.f32.mrb[10].mxu1  ;;  %v3799_v17 = vadd.f32 %v3798_v14, %v3797_v10  ;;  %v3800_v18 = vpop.f32.mrb[10].mxu0  ;;  %v1348_v9 = vld [vmem:[#allocation2 + $0x50] sm:$0xff] }
 0x2ea   : > { %v3849_v20 = vpop.f32.mrb[11].mxu1  ;;  %v3801_v23 = vpop.f32.mrb[11].mxu0 }
 0x2eb   : > { %v1935_v21 = vadd.f32 %v3847_v15, %v1358_v11  ;;  %v3850_v24 = vadd.f32 %v3849_v20, %v3848_v16  ;;  %v1919_v25 = vadd.f32 %v3799_v17, %v1342_v13  ;;  %v3802_v26 = vadd.f32 %v3801_v23, %v3800_v18  ;;  %v1365_v15 = vld [vmem:[#allocation2 + $0xd8] sm:$0xff] }
 0x2ec   : > { %v1349_v18 = vld [vmem:[#allocation2 + $0x58] sm:$0xff] }
 0x2ed   : > { %1967 = vst [vmem:[#allocation2 + $0xa0] sm:$0xff] %v1935_v21  ;;  %v1936_v27 = vadd.f32 %v3850_v24, %v1359_v19  ;;  %1951 = vst [vmem:[#allocation2 + $0x20] sm:$0xff] %v1919_v25  ;;  %v1920_v28 = vadd.f32 %v3802_v26, %v1343_v22 }
 0x2ef   : > { %1968 = vst [vmem:[#allocation2 + $0xa8] sm:$0xff] %v1936_v27  ;;  %v3851_v29 = vpop.f32.mrb[12].mxu1  ;;  %1952 = vst [vmem:[#allocation2 + $0x28] sm:$0xff] %v1920_v28  ;;  %v3803_v30 = vpop.f32.mrb[12].mxu0  ;;  %v1366_v27 = vld [vmem:[#allocation2 + $0xe0] sm:$0xff] }
 0x2f0   : > { %v3852_v32 = vpop.f32.mrb[13].mxu1  ;;  %v3804_v34 = vpop.f32.mrb[13].mxu0 }
 0x2f1   : > { %v3853_v35 = vadd.f32 %v3852_v32, %v3851_v29  ;;  %v3854_v36 = vpop.f32.mrb[14].mxu1  ;;  %v3805_v37 = vadd.f32 %v3804_v34, %v3803_v30  ;;  %v3806_v38 = vpop.f32.mrb[14].mxu0  ;;  %v1350_v29 = vld [vmem:[#allocation2 + $0x60] sm:$0xff] }
 0x2f2   : > { %v3855_v40 = vpop.f32.mrb[15].mxu1  ;;  %v3807_v43 = vpop.f32.mrb[15].mxu0 }
 0x2f3   : > { %v1937_v41 = vadd.f32 %v3853_v35, %v1360_v31  ;;  %v3856_v44 = vadd.f32 %v3855_v40, %v3854_v36  ;;  %v1921_v45 = vadd.f32 %v3805_v37, %v1344_v33  ;;  %v3808_v46 = vadd.f32 %v3807_v43, %v3806_v38  ;;  %v1367_v35 = vld [vmem:[#allocation2 + $0xe8] sm:$0xff] }
 0x2f4   : > { %v1351_v38 = vld [vmem:[#allocation2 + $0x68] sm:$0xff] }
 0x2f5   : > { %1969 = vst [vmem:[#allocation2 + $0xb0] sm:$0xff] %v1937_v41  ;;  %v1938_v47 = vadd.f32 %v3856_v44, %v1361_v39  ;;  %1953 = vst [vmem:[#allocation2 + $0x30] sm:$0xff] %v1921_v45  ;;  %v1922_v48 = vadd.f32 %v3808_v46, %v1345_v42 }
 0x2f7   : > { %1970 = vst [vmem:[#allocation2 + $0xb8] sm:$0xff] %v1938_v47  ;;  %v3857_v49 = vpop.f32.mrb[16].mxu1  ;;  %1954 = vst [vmem:[#allocation2 + $0x38] sm:$0xff] %v1922_v48  ;;  %v3809_v50 = vpop.f32.mrb[16].mxu0  ;;  %v1368_v47 = vld [vmem:[#allocation2 + $0xf0] sm:$0xff] }
 0x2f8   : > { %v3858_v52 = vpop.f32.mrb[17].mxu1  ;;  %v3810_v54 = vpop.f32.mrb[17].mxu0 }
 0x2f9   : > { %v3859_v55 = vadd.f32 %v3858_v52, %v3857_v49  ;;  %v3860_v56 = vpop.f32.mrb[18].mxu1  ;;  %v3811_v57 = vadd.f32 %v3810_v54, %v3809_v50  ;;  %v3812_v58 = vpop.f32.mrb[18].mxu0  ;;  %v1352_v49 = vld [vmem:[#allocation2 + $0x70] sm:$0xff] }
 0x2fa   : > { %v3861_v60 = vpop.f32.mrb[19].mxu1  ;;  %v3813_v63 = vpop.f32.mrb[19].mxu0 }
 0x2fb   : > { %v1939_v61 = vadd.f32 %v3859_v55, %v1362_v51  ;;  %v3862_v0 = vadd.f32 %v3861_v60, %v3860_v56  ;;  %v1923_v1 = vadd.f32 %v3811_v57, %v1346_v53  ;;  %v3814_v2 = vadd.f32 %v3813_v63, %v3812_v58  ;;  %v1369_v55 = vld [vmem:[#allocation2 + $0xf8] sm:$0xff] }
 0x2fc   : > { %v1353_v58 = vld [vmem:[#allocation2 + $0x78] sm:$0xff] }
 0x2fd   : > { %1971 = vst [vmem:[#allocation2 + $0xc0] sm:$0xff] %v1939_v61  ;;  %v1940_v3 = vadd.f32 %v3862_v0, %v1363_v59  ;;  %1955 = vst [vmem:[#allocation2 + $0x40] sm:$0xff] %v1923_v1  ;;  %v1924_v4 = vadd.f32 %v3814_v2, %v1347_v62 }
 0x2ff   : > { %1972 = vst [vmem:[#allocation2 + $0xc8] sm:$0xff] %v1940_v3  ;;  %v3863_v5 = vpop.f32.mrb[20].mxu1  ;;  %1956 = vst [vmem:[#allocation2 + $0x48] sm:$0xff] %v1924_v4  ;;  %v3815_v6 = vpop.f32.mrb[20].mxu0 }
 0x300   : > { %v3864_v8 = vpop.f32.mrb[21].mxu1  ;;  %v3816_v10 = vpop.f32.mrb[21].mxu0 }
 0x301   : > { %v3865_v11 = vadd.f32 %v3864_v8, %v3863_v5  ;;  %v3866_v12 = vpop.f32.mrb[22].mxu1  ;;  %v3817_v13 = vadd.f32 %v3816_v10, %v3815_v6  ;;  %v3818_v14 = vpop.f32.mrb[22].mxu0 }
 0x302   : > { %v3867_v16 = vpop.f32.mrb[23].mxu1  ;;  %v3819_v19 = vpop.f32.mrb[23].mxu0 }
 0x303   : > { %v1941_v17 = vadd.f32 %v3865_v11, %v1364_v7  ;;  %v3868_v20 = vadd.f32 %v3867_v16, %v3866_v12  ;;  %v1925_v21 = vadd.f32 %v3817_v13, %v1348_v9  ;;  %v3820_v22 = vadd.f32 %v3819_v19, %v3818_v14 }
 0x305   : > { %1973 = vst [vmem:[#allocation2 + $0xd0] sm:$0xff] %v1941_v17  ;;  %v1942_v23 = vadd.f32 %v3868_v20, %v1365_v15  ;;  %1957 = vst [vmem:[#allocation2 + $0x50] sm:$0xff] %v1925_v21  ;;  %v1926_v24 = vadd.f32 %v3820_v22, %v1349_v18 }
 0x307   : > { %1974 = vst [vmem:[#allocation2 + $0xd8] sm:$0xff] %v1942_v23  ;;  %v3869_v25 = vpop.f32.mrb[24].mxu1  ;;  %1958 = vst [vmem:[#allocation2 + $0x58] sm:$0xff] %v1926_v24  ;;  %v3821_v26 = vpop.f32.mrb[24].mxu0 }
 0x308   : > { %v3870_v28 = vpop.f32.mrb[25].mxu1  ;;  %v3822_v30 = vpop.f32.mrb[25].mxu0 }
 0x309   : > { %v3871_v31 = vadd.f32 %v3870_v28, %v3869_v25  ;;  %v3872_v32 = vpop.f32.mrb[26].mxu1  ;;  %v3823_v33 = vadd.f32 %v3822_v30, %v3821_v26  ;;  %v3824_v34 = vpop.f32.mrb[26].mxu0 }
 0x30a   : > { %v3873_v36 = vpop.f32.mrb[27].mxu1  ;;  %v3825_v39 = vpop.f32.mrb[27].mxu0 }
 0x30b   : > { %v1943_v37 = vadd.f32 %v3871_v31, %v1366_v27  ;;  %v3874_v40 = vadd.f32 %v3873_v36, %v3872_v32  ;;  %v1927_v41 = vadd.f32 %v3823_v33, %v1350_v29  ;;  %v3826_v42 = vadd.f32 %v3825_v39, %v3824_v34 }
 0x30d   : > { %1975 = vst [vmem:[#allocation2 + $0xe0] sm:$0xff] %v1943_v37  ;;  %v1944_v43 = vadd.f32 %v3874_v40, %v1367_v35  ;;  %1959 = vst [vmem:[#allocation2 + $0x60] sm:$0xff] %v1927_v41  ;;  %v1928_v44 = vadd.f32 %v3826_v42, %v1351_v38 }
 0x30f   : > { %1976 = vst [vmem:[#allocation2 + $0xe8] sm:$0xff] %v1944_v43  ;;  %v3875_v45 = vpop.f32.mrb[28].mxu1  ;;  %1960 = vst [vmem:[#allocation2 + $0x68] sm:$0xff] %v1928_v44  ;;  %v3827_v46 = vpop.f32.mrb[28].mxu0 }
 0x310   : > { %v3876_v48 = vpop.f32.mrb[29].mxu1  ;;  %v3828_v50 = vpop.f32.mrb[29].mxu0 }
 0x311   : > { %v3877_v51 = vadd.f32 %v3876_v48, %v3875_v45  ;;  %v3878_v52 = vpop.f32.mrb[30].mxu1  ;;  %v3829_v53 = vadd.f32 %v3828_v50, %v3827_v46  ;;  %v3830_v54 = vpop.f32.mrb[30].mxu0 }
 0x312   : > { %v3879_v56 = vpop.f32.mrb[31].mxu1  ;;  %v3831_v59 = vpop.f32.mrb[31].mxu0 }
 0x313   : > { %v1945_v57 = vadd.f32 %v3877_v51, %v1368_v47  ;;  %v3880_v60 = vadd.f32 %v3879_v56, %v3878_v52  ;;  %v1929_v61 = vadd.f32 %v3829_v53, %v1352_v49  ;;  %v3832_v62 = vadd.f32 %v3831_v59, %v3830_v54 }
 0x315   : > { %1977 = vst [vmem:[#allocation2 + $0xf0] sm:$0xff] %v1945_v57  ;;  %v1946_v63 = vadd.f32 %v3880_v60, %v1369_v55  ;;  %1961 = vst [vmem:[#allocation2 + $0x70] sm:$0xff] %v1929_v61  ;;  %v1930_v0 = vadd.f32 %v3832_v62, %v1353_v58 }
 0x317   : > { %1978 = vst [vmem:[#allocation2 + $0xf8] sm:$0xff] %v1946_v63  ;;  %1962 = vst [vmem:[#allocation2 + $0x78] sm:$0xff] %v1930_v0 }
 0x318 PF: > { %v3524_v1 = vld [vmem:[%s4563_s13] sm:$0xff]   ;;  %v3635_v3 = vld [vmem:[%s4563_s13 + $0x8] sm:$0xff]   ;;  %s5060_s1 = sld [smem:[#allocation10_spill]]  ;;  %v3636_v5 = vld [vmem:[%s4563_s13 + $0x10] sm:$0xff]   ;;  %s5061_s29 = scalar_lea.vmem %s5042_s6, %s4541_s11 }
 0x319   : > { %4082 = vmatprep.subr.bf16.mxu0 %v3524_v1  ;;  %v4300_v2 = vld [vmem:[%s4577_s3] sm:$0xff]   ;;  %v4301_v4 = vld [vmem:[%s4577_s3 + $0x8] sm:$0xff]   ;;  %v4302_v6 = vld [vmem:[%s4577_s3 + $0x10] sm:$0xff]  }
 0x31a   : > { %4084 = vmatpush3.bf16.msra.mxu0 %v3524_v1  ;;  %4033 = vmatprep.subr.bf16.mxu1 %v4300_v2  ;;  %v3637_v7 = vld [vmem:[%s4563_s13 + $0x18] sm:$0xff]   ;;  %v1982_v9 = vld [vmem:[#allocation2] sm:$0xff]  ;;  %v3639_v13 = vld [vmem:[%s4563_s13 + $0x28] sm:$0xff]  }
 0x31b   : > { %4086 = vmatprep.subr.bf16.mxu0 %v3635_v3  ;;  %4034 = vmatpush3.bf16.msra.mxu1 %v4300_v2  ;;  %v4303_v8 = vld [vmem:[%s4577_s3 + $0x18] sm:$0xff]   ;;  %v3638_v10 = vld [vmem:[%s4563_s13 + $0x20] sm:$0xff]   ;;  %v4305_v14 = vld [vmem:[%s4577_s3 + $0x28] sm:$0xff]  }
 0x31c   : > { %4035 = vmatprep.subr.bf16.mxu1 %v4301_v4  ;;  %3985 = vmatprep.mubr.f32.mxu0 %v1982_v9  ;;  %v4304_v12 = vld [vmem:[%s4577_s3 + $0x20] sm:$0xff]   ;;  %v3640_v15 = vld [vmem:[%s4563_s13 + $0x30] sm:$0xff]   ;;  %v3641_v17 = vld [vmem:[%s4563_s13 + $0x38] sm:$0xff]  }
 0x31d   : > { %v4306_v16 = vld [vmem:[%s4577_s3 + $0x30] sm:$0xff]   ;;  %v4307_v18 = vld [vmem:[%s4577_s3 + $0x38] sm:$0xff]   ;;  %v1983_v19 = vld [vmem:[#allocation2 + $0x8] sm:$0xff] }
 0x31e   : > { %4088 = vmatpush3.bf16.msra.mxu0 %v3635_v3  ;;  %v4308_v11 = vld [vmem:[%s5060_s1] sm:$0xff]   ;;  %v4309_v20 = vld [vmem:[%s5060_s1 + $0x8] sm:$0xff]   ;;  %v1984_v21 = vld [vmem:[#allocation2 + $0x10] sm:$0xff] }
 0x31f   : > { %4090 = vmatprep.subr.bf16.mxu0 %v3636_v5  ;;  %4036 = vmatpush3.bf16.msra.mxu1 %v4301_v4  ;;  %v4310_v22 = vld [vmem:[%s5060_s1 + $0x10] sm:$0xff]   ;;  %v1985_v23 = vld [vmem:[#allocation2 + $0x18] sm:$0xff]  ;;  %v1986_v24 = vld [vmem:[#allocation2 + $0x20] sm:$0xff] }
 0x320   : > { %4037 = vmatprep.subr.bf16.mxu1 %v4302_v6  ;;  %4049 = vmatprep.mubr.bf16.mxu1 %v4308_v11  ;;  %v1987_v25 = vld [vmem:[#allocation2 + $0x28] sm:$0xff]  ;;  %v4311_v26 = vld [vmem:[%s5060_s1 + $0x18] sm:$0xff]   ;;  %v1988_v27 = vld [vmem:[#allocation2 + $0x30] sm:$0xff] }
 0x321   : > { %v4312_v28 = vld [vmem:[%s5060_s1 + $0x20] sm:$0xff]   ;;  %v1989_v29 = vld [vmem:[#allocation2 + $0x38] sm:$0xff]  ;;  %v1991_v31 = vld [vmem:[#allocation2 + $0x48] sm:$0xff] }
 0x322   : > { %4092 = vmatpush3.bf16.msra.mxu0 %v3636_v5  ;;  %v1990_v30 = vld [vmem:[#allocation2 + $0x40] sm:$0xff]  ;;  %v4313_v32 = vld [vmem:[%s5060_s1 + $0x28] sm:$0xff]   ;;  %v1992_v33 = vld [vmem:[#allocation2 + $0x50] sm:$0xff] }
 0x323   : > { %4094 = vmatprep.subr.bf16.mxu0 %v3637_v7  ;;  %4038 = vmatpush3.bf16.msra.mxu1 %v4302_v6  ;;  %v4314_v34 = vld [vmem:[%s5060_s1 + $0x30] sm:$0xff]   ;;  %v1993_v35 = vld [vmem:[#allocation2 + $0x58] sm:$0xff]  ;;  %v1994_v36 = vld [vmem:[#allocation2 + $0x60] sm:$0xff] }
 0x324   : > { %4039 = vmatprep.subr.bf16.mxu1 %v4303_v8  ;;  %v1995_v37 = vld [vmem:[#allocation2 + $0x68] sm:$0xff]  ;;  %v4315_v38 = vld [vmem:[%s5060_s1 + $0x38] sm:$0xff]   ;;  %v1996_v39 = vld [vmem:[#allocation2 + $0x70] sm:$0xff] }
 0x325   : > { %v4316_v40 = vld [vmem:[%s5060_s1 + $0x40] sm:$0xff]   ;;  %v1997_v41 = vld [vmem:[#allocation2 + $0x78] sm:$0xff]  ;;  %v1999_v43 = vld [vmem:[#allocation2 + $0x88] sm:$0xff] }
 0x326   : > { %4096 = vmatpush3.bf16.msra.mxu0 %v3637_v7  ;;  %v1998_v42 = vld [vmem:[#allocation2 + $0x80] sm:$0xff]  ;;  %v4317_v44 = vld [vmem:[%s5060_s1 + $0x48] sm:$0xff]   ;;  %v2000_v45 = vld [vmem:[#allocation2 + $0x90] sm:$0xff] }
 0x327   : > { %4098 = vmatprep.subr.bf16.mxu0 %v3638_v10  ;;  %4040 = vmatpush3.bf16.msra.mxu1 %v4303_v8  ;;  %v4318_v46 = vld [vmem:[%s5060_s1 + $0x50] sm:$0xff]   ;;  %v2001_v47 = vld [vmem:[#allocation2 + $0x98] sm:$0xff]  ;;  %v2002_v48 = vld [vmem:[#allocation2 + $0xa0] sm:$0xff] }
 0x328   : > { %4041 = vmatprep.subr.bf16.mxu1 %v4304_v12  ;;  %v2003_v49 = vld [vmem:[#allocation2 + $0xa8] sm:$0xff]  ;;  %v4319_v50 = vld [vmem:[%s5060_s1 + $0x58] sm:$0xff]   ;;  %v2004_v51 = vld [vmem:[#allocation2 + $0xb0] sm:$0xff] }
 0x329   : > { %v4320_v52 = vld [vmem:[%s5060_s1 + $0x60] sm:$0xff]   ;;  %v2005_v53 = vld [vmem:[#allocation2 + $0xb8] sm:$0xff]  ;;  %v2007_v55 = vld [vmem:[#allocation2 + $0xc8] sm:$0xff] }
 0x32a   : > { %4100 = vmatpush3.bf16.msra.mxu0 %v3638_v10  ;;  %v2006_v54 = vld [vmem:[#allocation2 + $0xc0] sm:$0xff]  ;;  %v4321_v56 = vld [vmem:[%s5060_s1 + $0x68] sm:$0xff]   ;;  %v2008_v57 = vld [vmem:[#allocation2 + $0xd0] sm:$0xff] }
 0x32b   : > { %4102 = vmatprep.subr.bf16.mxu0 %v3639_v13  ;;  %4042 = vmatpush3.bf16.msra.mxu1 %v4304_v12  ;;  %v4322_v58 = vld [vmem:[%s5060_s1 + $0x70] sm:$0xff]   ;;  %v2009_v59 = vld [vmem:[#allocation2 + $0xd8] sm:$0xff]  ;;  %v2010_v60 = vld [vmem:[#allocation2 + $0xe0] sm:$0xff] }
 0x32c   : > { %4043 = vmatprep.subr.bf16.mxu1 %v4305_v14  ;;  %v2011_v61 = vld [vmem:[#allocation2 + $0xe8] sm:$0xff]  ;;  %v4323_v62 = vld [vmem:[%s5060_s1 + $0x78] sm:$0xff]   ;;  %v2012_v63 = vld [vmem:[#allocation2 + $0xf0] sm:$0xff] }
 0x32d   : > { %v2013_v0 = vld [vmem:[#allocation2 + $0xf8] sm:$0xff]  ;;  %v4740_v1 = vld [vmem:[%s5061_s29] ss:$0 sm:$0xff] }
 0x32e   : > { %4104 = vmatpush3.bf16.msra.mxu0 %v3639_v13 }
 0x32f   : > { %4106 = vmatprep.subr.bf16.mxu0 %v3640_v15  ;;  %4044 = vmatpush3.bf16.msra.mxu1 %v4305_v14 }
 0x330   : > { %4045 = vmatprep.subr.bf16.mxu1 %v4306_v16 }
 0x332   : > { %4108 = vmatpush3.bf16.msra.mxu0 %v3640_v15 }
 0x333   : > { %4110 = vmatprep.subr.bf16.mxu0 %v3641_v17  ;;  %4046 = vmatpush3.bf16.msra.mxu1 %v4306_v16 }
 0x334   : > { %4047 = vmatprep.subr.bf16.mxu1 %v4307_v18 }
 0x336   : > { %4112 = vmatpush3.bf16.msra.mxu0 %v3641_v17 }
 0x337   : > { %4048 = vmatpush3.bf16.msra.mxu1 %v4307_v18 }
 0x339   : > { %3986 = vmatmul.mubr.f32.vlgmr.msra.gmra.mrb[0].mxu0 %v1983_v19 }
 0x33a   : > { %3988 = vmatprep.mubr.f32.mxu0 %v1984_v21  ;;  %4050 = vmatmul.mubr.bf16.vlgmr.msra.gmra.mrb[0].mxu1 %v4309_v20 }
 0x33b   : > { %4053 = vmatprep.mubr.bf16.mxu1 %v4310_v22 }
 0x33d   : > { %3989 = vmatmul.mubr.f32.gmra.mrb[2].mxu0 %v1985_v23 }
 0x33e   : > { %3991 = vmatprep.mubr.f32.mxu0 %v1986_v24 }
 0x341   : > { %3992 = vmatmul.mubr.f32.gmra.mrb[4].mxu0 %v1987_v25 }
 0x342   : > { %3994 = vmatprep.mubr.f32.mxu0 %v1988_v27  ;;  %4054 = vmatmul.mubr.bf16.gmra.mrb[4].mxu1 %v4311_v26 }
 0x343   : > { %4057 = vmatprep.mubr.bf16.mxu1 %v4312_v28 }
 0x345   : > { %3995 = vmatmul.mubr.f32.gmra.mrb[6].mxu0 %v1989_v29 }
 0x346   : > { %3997 = vmatprep.mubr.f32.mxu0 %v1990_v30 }
 0x349   : > { %3998 = vmatmul.mubr.f32.gmra.mrb[8].mxu0 %v1991_v31 }
 0x34a   : > { %4000 = vmatprep.mubr.f32.mxu0 %v1992_v33  ;;  %4058 = vmatmul.mubr.bf16.gmra.mrb[8].mxu1 %v4313_v32 }
 0x34b   : > { %4061 = vmatprep.mubr.bf16.mxu1 %v4314_v34 }
 0x34d   : > { %4001 = vmatmul.mubr.f32.gmra.mrb[10].mxu0 %v1993_v35 }
 0x34e   : > { %4003 = vmatprep.mubr.f32.mxu0 %v1994_v36 }
 0x351   : > { %4004 = vmatmul.mubr.f32.gmra.mrb[12].mxu0 %v1995_v37 }
 0x352   : > { %4006 = vmatprep.mubr.f32.mxu0 %v1996_v39  ;;  %4062 = vmatmul.mubr.bf16.gmra.mrb[12].mxu1 %v4315_v38 }
 0x353   : > { %4065 = vmatprep.mubr.bf16.mxu1 %v4316_v40 }
 0x355   : > { %4007 = vmatmul.mubr.f32.gmra.mrb[14].mxu0 %v1997_v41 }
 0x356   : > { %4009 = vmatprep.mubr.f32.mxu0 %v1998_v42 }
 0x359   : > { %4010 = vmatmul.mubr.f32.gmra.mrb[16].mxu0 %v1999_v43 }
 0x35a   : > { %4012 = vmatprep.mubr.f32.mxu0 %v2000_v45  ;;  %4066 = vmatmul.mubr.bf16.gmra.mrb[16].mxu1 %v4317_v44 }
 0x35b   : > { %4069 = vmatprep.mubr.bf16.mxu1 %v4318_v46 }
 0x35d   : > { %4013 = vmatmul.mubr.f32.gmra.mrb[18].mxu0 %v2001_v47 }
 0x35e   : > { %4015 = vmatprep.mubr.f32.mxu0 %v2002_v48 }
 0x361   : > { %4016 = vmatmul.mubr.f32.gmra.mrb[20].mxu0 %v2003_v49 }
 0x362   : > { %4018 = vmatprep.mubr.f32.mxu0 %v2004_v51  ;;  %4070 = vmatmul.mubr.bf16.gmra.mrb[20].mxu1 %v4319_v50 }
 0x363   : > { %4073 = vmatprep.mubr.bf16.mxu1 %v4320_v52 }
 0x365   : > { %4019 = vmatmul.mubr.f32.gmra.mrb[22].mxu0 %v2005_v53 }
 0x366   : > { %4021 = vmatprep.mubr.f32.mxu0 %v2006_v54 }
 0x369   : > { %4022 = vmatmul.mubr.f32.gmra.mrb[24].mxu0 %v2007_v55 }
 0x36a   : > { %4024 = vmatprep.mubr.f32.mxu0 %v2008_v57  ;;  %4074 = vmatmul.mubr.bf16.gmra.mrb[24].mxu1 %v4321_v56 }
 0x36b   : > { %4077 = vmatprep.mubr.bf16.mxu1 %v4322_v58 }
 0x36d   : > { %4025 = vmatmul.mubr.f32.gmra.mrb[26].mxu0 %v2009_v59 }
 0x36e   : > { %4027 = vmatprep.mubr.f32.mxu0 %v2010_v60 }
 0x371   : > { %4028 = vmatmul.mubr.f32.gmra.mrb[28].mxu0 %v2011_v61 }
 0x372   : > { %4030 = vmatprep.mubr.f32.mxu0 %v2012_v63  ;;  %4078 = vmatmul.mubr.bf16.gmra.mrb[28].mxu1 %v4323_v62 }
 0x375   : > { %4031 = vmatmul.mubr.f32.gmra.mrb[30].mxu0 %v2013_v0 }
 0x40c   : > { %v3987_v2 = vpop.f32.mrb[0].mxu0 }
 0x40d   : > { %v2119_v3 = vpop.f32.mrb[1].mxu0  ;;  %v4051_v5 = vpop.f32.mrb[0].mxu1  ;;  %v2125_v7 = vadd.f32 %v3987_v2, %v4740_v1 }
 0x40e   : > { %v2120_v4 = vadd.f32 %v4740_v1, %v2119_v3  ;;  %v2504_v6 = vpop.f32.mrb[1].mxu1 }
 0x40f   : > { %v4052_v10 = vpop.f32.mrb[2].mxu1 }
 0x410   : > { %v4744_v8 = vadd.f32 %v2504_v6, %v2120_v4  ;;  %v3990_v9 = vpop.f32.mrb[2].mxu0  ;;  %v2507_v13 = vpop.f32.mrb[3].mxu1 }
 0x411   : > { %v2135_v11 = vadd.f32 %v3990_v9, %v4740_v1  ;;  %v2129_v12 = vpop.f32.mrb[3].mxu0  ;;  %v4748_v15 = vadd.f32 %v2507_v13, %v2125_v7 }
 0x412   : > { %v2130_v14 = vadd.f32 %v4740_v1, %v2129_v12  ;;  %v2663_v16 = vmul.f32 %v4744_v8, %v4744_v8 }
 0x413   : > { %v4752_v17 = vadd.f32 %v4052_v10, %v2135_v11  ;;  %v2664_v25 = vmul.f32 %v4748_v15, %v4748_v15 }
 0x414   : > { %v4754_v18 = vadd.f32 %v4051_v5, %v2130_v14  ;;  %v3993_v19 = vpop.f32.mrb[4].mxu0  ;;  %2695 = vadd.xlane.f32.xlu0 %v2663_v16 }
 0x415   : > { %v2139_v20 = vpop.f32.mrb[5].mxu0  ;;  %v2666_v21 = vmul.f32 %v4752_v17, %v4752_v17  ;;  %v2145_v22 = vadd.f32 %v3993_v19, %v4740_v1  ;;  %v4055_v24 = vpop.f32.mrb[4].mxu1 }
 0x416   : > { %v2140_v23 = vadd.f32 %v4740_v1, %v2139_v20  ;;  %v2520_v26 = vpop.f32.mrb[5].mxu1  ;;  %v2665_v33 = vmul.f32 %v4754_v18, %v4754_v18 }
 0x417   : > { %2701 = vadd.xlane.f32.xlu1 %v2666_v21  ;;  %v4056_v29 = vpop.f32.mrb[6].mxu1 }
 0x418   : > { %v4762_v27 = vadd.f32 %v2520_v26, %v2140_v23  ;;  %v3996_v28 = vpop.f32.mrb[6].mxu0  ;;  %2697 = vadd.xlane.f32.xlu0 %v2664_v25  ;;  %v2523_v32 = vpop.f32.mrb[7].mxu1 }
 0x419   : > { %v2155_v30 = vadd.f32 %v3996_v28, %v4740_v1  ;;  %v2149_v31 = vpop.f32.mrb[7].mxu0  ;;  %v4768_v35 = vadd.f32 %v2523_v32, %v2145_v22 }
 0x41a   : > { %v2150_v34 = vadd.f32 %v4740_v1, %v2149_v31  ;;  %v2667_v36 = vmul.f32 %v4762_v27, %v4762_v27 }
 0x41b   : > { %v4772_v37 = vadd.f32 %v4056_v29, %v2155_v30  ;;  %2699 = vadd.xlane.f32.xlu1 %v2665_v33  ;;  %v2668_v41 = vmul.f32 %v4768_v35, %v4768_v35 }
 0x41c   : > { %v4774_v38 = vadd.f32 %v4055_v24, %v2150_v34  ;;  %v3999_v39 = vpop.f32.mrb[8].mxu0  ;;  %2703 = vadd.xlane.f32.xlu0 %v2667_v36 }
 0x41d   : > { %v2159_v40 = vpop.f32.mrb[9].mxu0  ;;  %v2165_v42 = vadd.f32 %v3999_v39, %v4740_v1  ;;  %v4059_v44 = vpop.f32.mrb[8].mxu1  ;;  %v2670_v53 = vmul.f32 %v4772_v37, %v4772_v37 }
 0x41e   : > { %v2160_v43 = vadd.f32 %v4740_v1, %v2159_v40  ;;  %v2669_v45 = vmul.f32 %v4774_v38, %v4774_v38  ;;  %v2536_v46 = vpop.f32.mrb[9].mxu1 }
 0x41f   : > { %2705 = vadd.xlane.f32.xlu1 %v2668_v41  ;;  %v4060_v49 = vpop.f32.mrb[10].mxu1 }
 0x420   : > { %v4782_v47 = vadd.f32 %v2536_v46, %v2160_v43  ;;  %v4002_v48 = vpop.f32.mrb[10].mxu0  ;;  %2707 = vadd.xlane.f32.xlu0 %v2669_v45  ;;  %v2539_v52 = vpop.f32.mrb[11].mxu1 }
 0x421   : > { %v2175_v50 = vadd.f32 %v4002_v48, %v4740_v1  ;;  %v2169_v51 = vpop.f32.mrb[11].mxu0  ;;  %v4788_v55 = vadd.f32 %v2539_v52, %v2165_v42 }
 0x422   : > { %v2170_v54 = vadd.f32 %v4740_v1, %v2169_v51  ;;  %v2671_v56 = vmul.f32 %v4782_v47, %v4782_v47 }
 0x423   : > { %v4792_v57 = vadd.f32 %v4060_v49, %v2175_v50  ;;  %2709 = vadd.xlane.f32.xlu1 %v2670_v53  ;;  %v2672_v61 = vmul.f32 %v4788_v55, %v4788_v55 }
 0x424   : > { %v4794_v58 = vadd.f32 %v4059_v44, %v2170_v54  ;;  %v4005_v59 = vpop.f32.mrb[12].mxu0  ;;  %2711 = vadd.xlane.f32.xlu0 %v2671_v56 }
 0x425   : > { %v2179_v60 = vpop.f32.mrb[13].mxu0  ;;  %v2185_v62 = vadd.f32 %v4005_v59, %v4740_v1  ;;  %v4063_v0 = vpop.f32.mrb[12].mxu1  ;;  %v2674_v11 = vmul.f32 %v4792_v57, %v4792_v57 }
 0x426   : > { %v2180_v63 = vadd.f32 %v4740_v1, %v2179_v60  ;;  %v2673_v2 = vmul.f32 %v4794_v58, %v4794_v58  ;;  %v2552_v3 = vpop.f32.mrb[13].mxu1 }
 0x427   : > { %2713 = vadd.xlane.f32.xlu1 %v2672_v61  ;;  %v4064_v6 = vpop.f32.mrb[14].mxu1 }
 0x428   : > { %v4802_v4 = vadd.f32 %v2552_v3, %v2180_v63  ;;  %v4008_v5 = vpop.f32.mrb[14].mxu0  ;;  %2715 = vadd.xlane.f32.xlu0 %v2673_v2  ;;  %v2555_v10 = vpop.f32.mrb[15].mxu1 }
 0x429   : > { %v2195_v7 = vadd.f32 %v4008_v5, %v4740_v1  ;;  %v2189_v9 = vpop.f32.mrb[15].mxu0  ;;  %v4808_v13 = vadd.f32 %v2555_v10, %v2185_v62 }
 0x42a   : > { %v2190_v12 = vadd.f32 %v4740_v1, %v2189_v9  ;;  %v2675_v14 = vmul.f32 %v4802_v4, %v4802_v4 }
 0x42b   : > { %v4812_v16 = vadd.f32 %v4064_v6, %v2195_v7  ;;  %2717 = vadd.xlane.f32.xlu1 %v2674_v11  ;;  %v2676_v22 = vmul.f32 %v4808_v13, %v4808_v13 }
 0x42c   : > { %v4814_v19 = vadd.f32 %v4063_v0, %v2190_v12  ;;  %v4011_v20 = vpop.f32.mrb[16].mxu0  ;;  %2719 = vadd.xlane.f32.xlu0 %v2675_v14 }
 0x42d   : > { %v2199_v21 = vpop.f32.mrb[17].mxu0  ;;  %v2205_v23 = vadd.f32 %v4011_v20, %v4740_v1  ;;  %v4067_v25 = vpop.f32.mrb[16].mxu1  ;;  %v2678_v36 = vmul.f32 %v4812_v16, %v4812_v16 }
 0x42e   : > { %v2200_v24 = vadd.f32 %v4740_v1, %v2199_v21  ;;  %v2677_v26 = vmul.f32 %v4814_v19, %v4814_v19  ;;  %v2568_v28 = vpop.f32.mrb[17].mxu1 }
 0x42f   : > { %2721 = vadd.xlane.f32.xlu1 %v2676_v22  ;;  %v4068_v31 = vpop.f32.mrb[18].mxu1 }
 0x430   : > { %v4822_v29 = vadd.f32 %v2568_v28, %v2200_v24  ;;  %v4014_v30 = vpop.f32.mrb[18].mxu0  ;;  %2723 = vadd.xlane.f32.xlu0 %v2677_v26  ;;  %v2571_v34 = vpop.f32.mrb[19].mxu1 }
 0x431   : > { %v2215_v32 = vadd.f32 %v4014_v30, %v4740_v1  ;;  %v2209_v33 = vpop.f32.mrb[19].mxu0  ;;  %v4828_v40 = vadd.f32 %v2571_v34, %v2205_v23 }
 0x432   : > { %v2210_v39 = vadd.f32 %v4740_v1, %v2209_v33  ;;  %v2679_v41 = vmul.f32 %v4822_v29, %v4822_v29 }
 0x433   : > { %v4832_v42 = vadd.f32 %v4068_v31, %v2215_v32  ;;  %2725 = vadd.xlane.f32.xlu1 %v2678_v36  ;;  %v2680_v46 = vmul.f32 %v4828_v40, %v4828_v40 }
 0x434   : > { %v4834_v43 = vadd.f32 %v4067_v25, %v2210_v39  ;;  %v4017_v44 = vpop.f32.mrb[20].mxu0  ;;  %2727 = vadd.xlane.f32.xlu0 %v2679_v41 }
 0x435   : > { %v2219_v45 = vpop.f32.mrb[21].mxu0  ;;  %v2225_v48 = vadd.f32 %v4017_v44, %v4740_v1  ;;  %v4071_v50 = vpop.f32.mrb[20].mxu1  ;;  %v2682_v62 = vmul.f32 %v4832_v42, %v4832_v42 }
 0x436   : > { %v2220_v49 = vadd.f32 %v4740_v1, %v2219_v45  ;;  %v2681_v51 = vmul.f32 %v4834_v43, %v4834_v43  ;;  %v2584_v52 = vpop.f32.mrb[21].mxu1 }
 0x437   : > { %2729 = vadd.xlane.f32.xlu1 %v2680_v46  ;;  %v4072_v56 = vpop.f32.mrb[22].mxu1 }
 0x438   : > { %v4842_v53 = vadd.f32 %v2584_v52, %v2220_v49  ;;  %v4020_v54 = vpop.f32.mrb[22].mxu0  ;;  %2731 = vadd.xlane.f32.xlu0 %v2681_v51  ;;  %v2587_v61 = vpop.f32.mrb[23].mxu1 }
 0x439   : > { %v2235_v59 = vadd.f32 %v4020_v54, %v4740_v1  ;;  %v2229_v60 = vpop.f32.mrb[23].mxu0  ;;  %v4848_v0 = vadd.f32 %v2587_v61, %v2225_v48 }
 0x43a   : > { %v2230_v63 = vadd.f32 %v4740_v1, %v2229_v60  ;;  %v2683_v2 = vmul.f32 %v4842_v53, %v4842_v53 }
 0x43b   : > { %v4852_v3 = vadd.f32 %v4072_v56, %v2235_v59  ;;  %2733 = vadd.xlane.f32.xlu1 %v2682_v62  ;;  %v2684_v9 = vmul.f32 %v4848_v0, %v4848_v0 }
 0x43c   : > { %v4854_v5 = vadd.f32 %v4071_v50, %v2230_v63  ;;  %v4023_v6 = vpop.f32.mrb[24].mxu0  ;;  %2735 = vadd.xlane.f32.xlu0 %v2683_v2 }
 0x43d   : > { %v2239_v7 = vpop.f32.mrb[25].mxu0  ;;  %v2245_v10 = vadd.f32 %v4023_v6, %v4740_v1  ;;  %v4075_v12 = vpop.f32.mrb[24].mxu1  ;;  %v2686_v28 = vmul.f32 %v4852_v3, %v4852_v3 }
 0x43e   : > { %v2240_v11 = vadd.f32 %v4740_v1, %v2239_v7  ;;  %v2685_v14 = vmul.f32 %v4854_v5, %v4854_v5  ;;  %v2600_v20 = vpop.f32.mrb[25].mxu1 }
 0x43f   : > { %2737 = vadd.xlane.f32.xlu1 %v2684_v9  ;;  %v4076_v23 = vpop.f32.mrb[26].mxu1 }
 0x440   : > { %v4862_v21 = vadd.f32 %v2600_v20, %v2240_v11  ;;  %v4026_v22 = vpop.f32.mrb[26].mxu0  ;;  %2739 = vadd.xlane.f32.xlu0 %v2685_v14  ;;  %v2603_v26 = vpop.f32.mrb[27].mxu1 }
 0x441   : > { %v2255_v24 = vadd.f32 %v4026_v22, %v4740_v1  ;;  %v2249_v25 = vpop.f32.mrb[27].mxu0  ;;  %v4868_v31 = vadd.f32 %v2603_v26, %v2245_v10 }
 0x442   : > { %v2250_v30 = vadd.f32 %v4740_v1, %v2249_v25  ;;  %v2687_v32 = vmul.f32 %v4862_v21, %v4862_v21 }
 0x443   : > { %v4872_v33 = vadd.f32 %v4076_v23, %v2255_v24  ;;  %2741 = vadd.xlane.f32.xlu1 %v2686_v28  ;;  %v2688_v41 = vmul.f32 %v4868_v31, %v4868_v31 }
 0x444   : > { %v4874_v34 = vadd.f32 %v4075_v12, %v2250_v30  ;;  %v4029_v36 = vpop.f32.mrb[28].mxu0  ;;  %2743 = vadd.xlane.f32.xlu0 %v2687_v32 }
 0x445   : > { %v2259_v39 = vpop.f32.mrb[29].mxu0  ;;  %v2265_v44 = vadd.f32 %v4029_v36, %v4740_v1  ;;  %v4079_v46 = vpop.f32.mrb[28].mxu1  ;;  %v2690_v60 = vmul.f32 %v4872_v33, %v4872_v33 }
 0x446   : > { %v2260_v45 = vadd.f32 %v4740_v1, %v2259_v39  ;;  %v2689_v48 = vmul.f32 %v4874_v34, %v4874_v34  ;;  %v2616_v49 = vpop.f32.mrb[29].mxu1  ;;  %v4907_v39 = vld [vmem:[%s691_s27] ss:$0 sm:$0xff] }
 0x447   : > { %2745 = vadd.xlane.f32.xlu1 %v2688_v41  ;;  %v4080_v52 = vpop.f32.mrb[30].mxu1 }
 0x448   : > { %v4882_v50 = vadd.f32 %v2616_v49, %v2260_v45  ;;  %v4032_v51 = vpop.f32.mrb[30].mxu0  ;;  %2747 = vadd.xlane.f32.xlu0 %v2689_v48  ;;  %v2619_v59 = vpop.f32.mrb[31].mxu1 }
 0x449   : > { %v2275_v54 = vadd.f32 %v4032_v51, %v4740_v1  ;;  %v2269_v56 = vpop.f32.mrb[31].mxu0  ;;  %v4888_v62 = vadd.f32 %v2619_v59, %v2265_v44 }
 0x44a   : > { %v2270_v61 = vadd.f32 %v4740_v1, %v2269_v56  ;;  %v2691_v63 = vmul.f32 %v4882_v50, %v4882_v50 }
 0x44b   : > { %v4892_v2 = vadd.f32 %v4080_v52, %v2275_v54  ;;  %2749 = vadd.xlane.f32.xlu1 %v2690_v60  ;;  %v2692_v7 = vmul.f32 %v4888_v62, %v4888_v62  ;;  %v4916_v54 = vld [vmem:[%s694_s22] ss:$0 sm:$0xff] }
 0x44c   : > { %v4894_v6 = vadd.f32 %v4079_v46, %v2270_v61  ;;  %2751 = vadd.xlane.f32.xlu0 %v2691_v63 }
 0x44d   : > { %v2694_v1 = vmul.f32 %v4892_v2, %v4892_v2 }
 0x44e   : > { %v2693_v9 = vmul.f32 %v4894_v6, %v4894_v6 }
 0x44f   : > { %2753 = vadd.xlane.f32.xlu1 %v2692_v7 }
 0x450   : > { %2755 = vadd.xlane.f32.xlu0 %v2693_v9 }
 0x453   : > { %2757 = vadd.xlane.f32.xlu1 %v2694_v1 }
 0x4a1   : > { %v2696_v10 = vpop.xlane.xlu0 %2695 }
 0x4a2   : > { %v2759_v11 = vmax.f32 %v2696_v10, 1e-24 }
 0x4a4   : > { %4324 = vrsqrt.f32 %v2759_v11  ;;  %v2702_v12 = vpop.xlane.xlu1 %2701 }
 0x4a5   : > { %v2762_v14 = vmax.f32 %v2702_v12, 1e-24  ;;  %v2698_v20 = vpop.xlane.xlu0 %2697 }
 0x4a6   : > { %v2760_v22 = vmax.f32 %v2698_v20, 1e-24 }
 0x4a7   : > { %4326 = vrsqrt.f32 %v2762_v14 }
 0x4a8   : > { %4328 = vrsqrt.f32 %v2760_v22  ;;  %v2700_v23 = vpop.xlane.xlu1 %2699 }
 0x4a9   : > { %v2761_v24 = vmax.f32 %v2700_v23, 1e-24  ;;  %v2704_v25 = vpop.xlane.xlu0 %2703 }
 0x4aa   : > { %v2763_v26 = vmax.f32 %v2704_v25, 1e-24 }
 0x4ab   : > { %4330 = vrsqrt.f32 %v2761_v24 }
 0x4ac   : > { %4332 = vrsqrt.f32 %v2763_v26  ;;  %v2706_v28 = vpop.xlane.xlu1 %2705 }
 0x4ad   : > { %v2764_v30 = vmax.f32 %v2706_v28, 1e-24  ;;  %v2708_v32 = vpop.xlane.xlu0 %2707 }
 0x4ae   : > { %v4325_v36 = vpop.eup %4324  ;;  %v2765_v41 = vmax.f32 %v2708_v32, 1e-24 }
 0x4af   : > { %v2823_v44 = vmul.f32 %v4325_v36, %v4744_v8  ;;  %4334 = vrsqrt.f32 %v2764_v30 }
 0x4b0   : > { %4336 = vrsqrt.f32 %v2765_v41  ;;  %v2710_v45 = vpop.xlane.xlu1 %2709 }
 0x4b1   : > { %v4327_v46 = vpop.eup %4326  ;;  %v2862_v48 = vmul.f32 %v4907_v39, %v2823_v44  ;;  %v2766_v49 = vmax.f32 %v2710_v45, 1e-24  ;;  %v2712_v51 = vpop.xlane.xlu0 %2711 }
 0x4b2   : > { %v4329_v52 = vpop.eup %4328  ;;  %v2826_v56 = vmul.f32 %v4327_v46, %v4752_v17  ;;  %v2767_v59 = vmax.f32 %v2712_v51, 1e-24 }
 0x4b3   : > { %v2824_v8 = vmul.f32 %v4329_v52, %v4748_v15  ;;  %4338 = vrsqrt.f32 %v2766_v49  ;;  %v2901_v7 = vadd.f32 %v4916_v54, %v2862_v48 }
 0x4b4   : > { %v2865_v60 = vmul.f32 %v4907_v39, %v2826_v56  ;;  %4340 = vrsqrt.f32 %v2767_v59  ;;  %v2714_v61 = vpop.xlane.xlu1 %2713 }
 0x4b5   : > { %v4331_v63 = vpop.eup %4330  ;;  %v2863_v9 = vmul.f32 %v4907_v39, %v2824_v8  ;;  %v2768_v1 = vmax.f32 %v2714_v61, 1e-24  ;;  %v2716_v10 = vpop.xlane.xlu0 %2715  ;;  %v2933_v25 = vmax.f32 %v2901_v7, 0.0 }
 0x4b6   : > { %v4333_v11 = vpop.eup %4332  ;;  %v2825_v12 = vmul.f32 %v4331_v63, %v4754_v18  ;;  %v2769_v14 = vmax.f32 %v2716_v10, 1e-24  ;;  %v2904_v20 = vadd.f32 %v4916_v54, %v2865_v60 }
 0x4b7   : > { %v2902_v17 = vadd.f32 %v4916_v54, %v2863_v9  ;;  %v2827_v15 = vmul.f32 %v4333_v11, %v4762_v27  ;;  %4342 = vrsqrt.f32 %v2768_v1 }
 0x4b8   : > { %v2864_v22 = vmul.f32 %v4907_v39, %v2825_v12  ;;  %4344 = vrsqrt.f32 %v2769_v14  ;;  %v2718_v23 = vpop.xlane.xlu1 %2717  ;;  %v2936_v48 = vmax.f32 %v2904_v20, 0.0 }
 0x4b9   : > { %v4335_v24 = vpop.eup %4334  ;;  %v2934_v26 = vmax.f32 %v2902_v17, 0.0  ;;  %v2866_v28 = vmul.f32 %v4907_v39, %v2827_v15  ;;  %v2770_v30 = vmax.f32 %v2718_v23, 1e-24  ;;  %v2720_v18 = vpop.xlane.xlu0 %2719 }
 0x4ba   : > { %v4337_v32 = vpop.eup %4336  ;;  %v2903_v36 = vadd.f32 %v4916_v54, %v2864_v22  ;;  %v2828_v27 = vmul.f32 %v4335_v24, %v4768_v35  ;;  %v2771_v41 = vmax.f32 %v2720_v18, 1e-24 }
 0x4bb   : > { %v3558_v44 = vpack.c.bf16 %v2934_v26, %v2933_v25  ;;  %v2905_v45 = vadd.f32 %v4916_v54, %v2866_v28  ;;  %v2829_v46 = vmul.f32 %v4337_v32, %v4774_v38  ;;  %4346 = vrsqrt.f32 %v2770_v30 }
 0x4bc   : > { %v2935_v49 = vmax.f32 %v2903_v36, 0.0  ;;  %v2867_v51 = vmul.f32 %v4907_v39, %v2828_v27  ;;  %4348 = vrsqrt.f32 %v2771_v41  ;;  %v2722_v52 = vpop.xlane.xlu1 %2721 }
 0x4bd   : > { %v4339_v56 = vpop.eup %4338  ;;  %3559 = vst [vmem:[%s4592_s15] sm:$0xff] %v3558_v44   ;;  %v2868_v59 = vmul.f32 %v4907_v39, %v2829_v46  ;;  %v2772_v8 = vmax.f32 %v2722_v52, 1e-24  ;;  %v2724_v35 = vpop.xlane.xlu0 %2723  ;;  %v2937_v9 = vmax.f32 %v2905_v45, 0.0 }
 0x4be   : > { %v4341_v60 = vpop.eup %4340  ;;  %v3563_v61 = vpack.c.bf16 %v2936_v48, %v2935_v49  ;;  %v2906_v63 = vadd.f32 %v4916_v54, %v2867_v51  ;;  %v2830_v38 = vmul.f32 %v4339_v56, %v4772_v37  ;;  %v2773_v7 = vmax.f32 %v2724_v35, 1e-24 }
 0x4bf   : > { %v2831_v1 = vmul.f32 %v4341_v60, %v4782_v47  ;;  %4350 = vrsqrt.f32 %v2772_v8  ;;  %v2907_v11 = vadd.f32 %v4916_v54, %v2868_v59 }
 0x4c0   : > { %3642 = vst [vmem:[%s4592_s15 + $0x8] sm:$0xff] %v3563_v61   ;;  %v2938_v10 = vmax.f32 %v2906_v63, 0.0  ;;  %v2869_v12 = vmul.f32 %v4907_v39, %v2830_v38  ;;  %4352 = vrsqrt.f32 %v2773_v7  ;;  %v2726_v14 = vpop.xlane.xlu1 %2725 }
 0x4c1   : > { %v4343_v17 = vpop.eup %4342  ;;  %v2870_v15 = vmul.f32 %v4907_v39, %v2831_v1  ;;  %v2774_v20 = vmax.f32 %v2726_v14, 1e-24  ;;  %v2728_v22 = vpop.xlane.xlu0 %2727  ;;  %v2939_v30 = vmax.f32 %v2907_v11, 0.0 }
 0x4c2   : > { %v4345_v37 = vpop.eup %4344  ;;  %v3568_v23 = vpack.c.bf16 %v2938_v10, %v2937_v9  ;;  %v2908_v24 = vadd.f32 %v4916_v54, %v2869_v12  ;;  %v2832_v47 = vmul.f32 %v4343_v17, %v4788_v55  ;;  %v2775_v25 = vmax.f32 %v2728_v22, 1e-24 }
 0x4c3   : > { %v2909_v26 = vadd.f32 %v4916_v54, %v2870_v15  ;;  %v2833_v28 = vmul.f32 %v4345_v37, %v4794_v58  ;;  %4354 = vrsqrt.f32 %v2774_v20 }
 0x4c4   : > { %3643 = vst [vmem:[%s4592_s15 + $0x10] sm:$0xff] %v3568_v23   ;;  %v2940_v18 = vmax.f32 %v2908_v24, 0.0  ;;  %v2871_v32 = vmul.f32 %v4907_v39, %v2832_v47  ;;  %4356 = vrsqrt.f32 %v2775_v25  ;;  %v2730_v36 = vpop.xlane.xlu1 %2729 }
 0x4c5   : > { %v4347_v27 = vpop.eup %4346  ;;  %v2872_v41 = vmul.f32 %v4907_v39, %v2833_v28  ;;  %v2776_v44 = vmax.f32 %v2730_v36, 1e-24  ;;  %v2732_v45 = vpop.xlane.xlu0 %2731  ;;  %v2941_v51 = vmax.f32 %v2909_v26, 0.0 }
 0x4c6   : > { %v4349_v55 = vpop.eup %4348  ;;  %v3573_v46 = vpack.c.bf16 %v2940_v18, %v2939_v30  ;;  %v2910_v48 = vadd.f32 %v4916_v54, %v2871_v32  ;;  %v2834_v58 = vmul.f32 %v4347_v27, %v4792_v57  ;;  %v2777_v49 = vmax.f32 %v2732_v45, 1e-24 }
 0x4c7   : > { %v2835_v52 = vmul.f32 %v4349_v55, %v4802_v4  ;;  %4358 = vrsqrt.f32 %v2776_v44  ;;  %v2911_v59 = vadd.f32 %v4916_v54, %v2872_v41 }
 0x4c8   : > { %3644 = vst [vmem:[%s4592_s15 + $0x18] sm:$0xff] %v3573_v46   ;;  %v2942_v56 = vmax.f32 %v2910_v48, 0.0  ;;  %v2873_v8 = vmul.f32 %v4907_v39, %v2834_v58  ;;  %4360 = vrsqrt.f32 %v2777_v49  ;;  %v2734_v35 = vpop.xlane.xlu1 %2733 }
 0x4c9   : > { %v4351_v60 = vpop.eup %4350  ;;  %v2874_v61 = vmul.f32 %v4907_v39, %v2835_v52  ;;  %v2778_v63 = vmax.f32 %v2734_v35, 1e-24  ;;  %v2736_v38 = vpop.xlane.xlu0 %2735  ;;  %v2943_v12 = vmax.f32 %v2911_v59, 0.0 }
 0x4ca   : > { %v4353_v57 = vpop.eup %4352  ;;  %v3578_v7 = vpack.c.bf16 %v2942_v56, %v2941_v51  ;;  %v2912_v9 = vadd.f32 %v4916_v54, %v2873_v8  ;;  %v2836_v4 = vmul.f32 %v4351_v60, %v4808_v13  ;;  %v2779_v1 = vmax.f32 %v2736_v38, 1e-24 }
 0x4cb   : > { %v2913_v10 = vadd.f32 %v4916_v54, %v2874_v61  ;;  %v2837_v11 = vmul.f32 %v4353_v57, %v4814_v19  ;;  %4362 = vrsqrt.f32 %v2778_v63 }
 0x4cc   : > { %3645 = vst [vmem:[%s4592_s15 + $0x20] sm:$0xff] %v3578_v7   ;;  %v2944_v14 = vmax.f32 %v2912_v9, 0.0  ;;  %v2875_v17 = vmul.f32 %v4907_v39, %v2836_v4  ;;  %4364 = vrsqrt.f32 %v2779_v1  ;;  %v2738_v15 = vpop.xlane.xlu1 %2737 }
 0x4cd   : > { %v4355_v20 = vpop.eup %4354  ;;  %v2876_v22 = vmul.f32 %v4907_v39, %v2837_v11  ;;  %v2780_v37 = vmax.f32 %v2738_v15, 1e-24  ;;  %v2740_v23 = vpop.xlane.xlu0 %2739  ;;  %v2945_v26 = vmax.f32 %v2913_v10, 0.0 }
 0x4ce   : > { %v4357_v13 = vpop.eup %4356  ;;  %v3583_v24 = vpack.c.bf16 %v2944_v14, %v2943_v12  ;;  %v2914_v47 = vadd.f32 %v4916_v54, %v2875_v17  ;;  %v2838_v19 = vmul.f32 %v4355_v20, %v4812_v16  ;;  %v2781_v25 = vmax.f32 %v2740_v23, 1e-24 }
 0x4cf   : > { %v2839_v28 = vmul.f32 %v4357_v13, %v4822_v29  ;;  %4366 = vrsqrt.f32 %v2780_v37  ;;  %v2915_v18 = vadd.f32 %v4916_v54, %v2876_v22 }
 0x4d0   : > { %3646 = vst [vmem:[%s4592_s15 + $0x28] sm:$0xff] %v3583_v24   ;;  %v2946_v30 = vmax.f32 %v2914_v47, 0.0  ;;  %v2877_v32 = vmul.f32 %v4907_v39, %v2838_v19  ;;  %4368 = vrsqrt.f32 %v2781_v25  ;;  %v2742_v36 = vpop.xlane.xlu1 %2741 }
 0x4d1   : > { %v4359_v27 = vpop.eup %4358  ;;  %v2878_v41 = vmul.f32 %v4907_v39, %v2839_v28  ;;  %v2782_v44 = vmax.f32 %v2742_v36, 1e-24  ;;  %v2744_v45 = vpop.xlane.xlu0 %2743  ;;  %v2947_v51 = vmax.f32 %v2915_v18, 0.0 }
 0x4d2   : > { %v4361_v16 = vpop.eup %4360  ;;  %v3588_v55 = vpack.c.bf16 %v2946_v30, %v2945_v26  ;;  %v2916_v46 = vadd.f32 %v4916_v54, %v2877_v32  ;;  %v2840_v29 = vmul.f32 %v4359_v27, %v4828_v40  ;;  %v2783_v48 = vmax.f32 %v2744_v45, 1e-24 }
 0x4d3   : > { %v2917_v58 = vadd.f32 %v4916_v54, %v2878_v41  ;;  %v2841_v49 = vmul.f32 %v4361_v16, %v4834_v43  ;;  %4370 = vrsqrt.f32 %v2782_v44 }
 0x4d4   : > { %3647 = vst [vmem:[%s4592_s15 + $0x30] sm:$0xff] %v3588_v55   ;;  %v2948_v52 = vmax.f32 %v2916_v46, 0.0  ;;  %v2879_v56 = vmul.f32 %v4907_v39, %v2840_v29  ;;  %4372 = vrsqrt.f32 %v2783_v48  ;;  %v2746_v59 = vpop.xlane.xlu1 %2745 }
 0x4d5   : > { %v4363_v8 = vpop.eup %4362  ;;  %v2880_v35 = vmul.f32 %v4907_v39, %v2841_v49  ;;  %v2784_v60 = vmax.f32 %v2746_v59, 1e-24  ;;  %v2748_v61 = vpop.xlane.xlu0 %2747  ;;  %v2949_v7 = vmax.f32 %v2917_v58, 0.0 }
 0x4d6   : > { %v4365_v40 = vpop.eup %4364  ;;  %v3593_v63 = vpack.c.bf16 %v2948_v52, %v2947_v51  ;;  %v2918_v38 = vadd.f32 %v4916_v54, %v2879_v56  ;;  %v2842_v43 = vmul.f32 %v4363_v8, %v4832_v42  ;;  %v2785_v57 = vmax.f32 %v2748_v61, 1e-24 }
 0x4d7   : > { %v2843_v9 = vmul.f32 %v4365_v40, %v4842_v53  ;;  %4374 = vrsqrt.f32 %v2784_v60  ;;  %v2919_v1 = vadd.f32 %v4916_v54, %v2880_v35 }
 0x4d8   : > { %3648 = vst [vmem:[%s4592_s15 + $0x38] sm:$0xff] %v3593_v63   ;;  %v2950_v4 = vmax.f32 %v2918_v38, 0.0  ;;  %v2881_v10 = vmul.f32 %v4907_v39, %v2842_v43  ;;  %4376 = vrsqrt.f32 %v2785_v57  ;;  %v2750_v11 = vpop.xlane.xlu1 %2749 }
 0x4d9   : > { %v4367_v12 = vpop.eup %4366  ;;  %v2882_v14 = vmul.f32 %v4907_v39, %v2843_v9  ;;  %v2786_v17 = vmax.f32 %v2750_v11, 1e-24  ;;  %v2752_v15 = vpop.xlane.xlu0 %2751  ;;  %v2951_v24 = vmax.f32 %v2919_v1, 0.0 }
 0x4da   : > { %v4369_v42 = vpop.eup %4368  ;;  %v3598_v20 = vpack.c.bf16 %v2950_v4, %v2949_v7  ;;  %v2920_v22 = vadd.f32 %v4916_v54, %v2881_v10  ;;  %v2844_v53 = vmul.f32 %v4367_v12, %v4848_v0  ;;  %v2787_v37 = vmax.f32 %v2752_v15, 1e-24 }
 0x4db   : > { %v2921_v23 = vadd.f32 %v4916_v54, %v2882_v14  ;;  %v2845_v13 = vmul.f32 %v4369_v42, %v4854_v5  ;;  %4378 = vrsqrt.f32 %v2786_v17 }
 0x4dc   : > { %3649 = vst [vmem:[%s4592_s15 + $0x40] sm:$0xff] %v3598_v20   ;;  %v2952_v47 = vmax.f32 %v2920_v22, 0.0  ;;  %v2883_v19 = vmul.f32 %v4907_v39, %v2844_v53  ;;  %4380 = vrsqrt.f32 %v2787_v37  ;;  %v2754_v25 = vpop.xlane.xlu1 %2753 }
 0x4dd   : > { %v4371_v26 = vpop.eup %4370  ;;  %v2884_v28 = vmul.f32 %v4907_v39, %v2845_v13  ;;  %v2788_v30 = vmax.f32 %v2754_v25, 1e-24  ;;  %v2756_v18 = vpop.xlane.xlu0 %2755  ;;  %v2953_v41 = vmax.f32 %v2921_v23, 0.0 }
 0x4de   : > { %v4373_v0 = vpop.eup %4372  ;;  %v3603_v32 = vpack.c.bf16 %v2952_v47, %v2951_v24  ;;  %v2922_v36 = vadd.f32 %v4916_v54, %v2883_v19  ;;  %v2846_v5 = vmul.f32 %v4371_v26, %v4852_v3  ;;  %v2789_v27 = vmax.f32 %v2756_v18, 1e-24 }
 0x4df   : > { %v2847_v44 = vmul.f32 %v4373_v0, %v4862_v21  ;;  %4382 = vrsqrt.f32 %v2788_v30  ;;  %v2923_v16 = vadd.f32 %v4916_v54, %v2884_v28 }
 0x4e0   : > { %3650 = vst [vmem:[%s4592_s15 + $0x48] sm:$0xff] %v3603_v32   ;;  %v2954_v45 = vmax.f32 %v2922_v36, 0.0  ;;  %v2885_v55 = vmul.f32 %v4907_v39, %v2846_v5  ;;  %4384 = vrsqrt.f32 %v2789_v27  ;;  %v2758_v46 = vpop.xlane.xlu1 %2757 }
 0x4e1   : > { %v4375_v29 = vpop.eup %4374  ;;  %v2886_v48 = vmul.f32 %v4907_v39, %v2847_v44  ;;  %v2790_v58 = vmax.f32 %v2758_v46, 1e-24  ;;  %v2955_v56 = vmax.f32 %v2923_v16, 0.0 }
 0x4e2   : > { %v4377_v49 = vpop.eup %4376  ;;  %v3608_v3 = vpack.c.bf16 %v2954_v45, %v2953_v41  ;;  %v2924_v51 = vadd.f32 %v4916_v54, %v2885_v55  ;;  %v2848_v21 = vmul.f32 %v4375_v29, %v4868_v31 }
 0x4e3   : > { %v2849_v52 = vmul.f32 %v4377_v49, %v4874_v34  ;;  %4386 = vrsqrt.f32 %v2790_v58  ;;  %v2925_v8 = vadd.f32 %v4916_v54, %v2886_v48 }
 0x4e4   : > { %3651 = vst [vmem:[%s4592_s15 + $0x50] sm:$0xff] %v3608_v3   ;;  %v2956_v59 = vmax.f32 %v2924_v51, 0.0  ;;  %v2887_v35 = vmul.f32 %v4907_v39, %v2848_v21 }
 0x4e5   : > { %v4379_v60 = vpop.eup %4378  ;;  %v2888_v61 = vmul.f32 %v4907_v39, %v2849_v52  ;;  %v2957_v43 = vmax.f32 %v2925_v8, 0.0 }
 0x4e6   : > { %v4381_v40 = vpop.eup %4380  ;;  %v3613_v63 = vpack.c.bf16 %v2956_v59, %v2955_v56  ;;  %v2926_v38 = vadd.f32 %v4916_v54, %v2887_v35  ;;  %v2850_v31 = vmul.f32 %v4379_v60, %v4872_v33 }
 0x4e7   : > { %v2851_v34 = vmul.f32 %v4381_v40, %v4882_v50  ;;  %v2927_v7 = vadd.f32 %v4916_v54, %v2888_v61 }
 0x4e8   : > { %3652 = vst [vmem:[%s4592_s15 + $0x58] sm:$0xff] %v3613_v63   ;;  %v2958_v57 = vmax.f32 %v2926_v38, 0.0  ;;  %v2889_v9 = vmul.f32 %v4907_v39, %v2850_v31 }
 0x4e9   : > { %v4383_v4 = vpop.eup %4382  ;;  %v2890_v1 = vmul.f32 %v4907_v39, %v2851_v34  ;;  %v2959_v50 = vmax.f32 %v2927_v7, 0.0 }
 0x4ea   : > { %v4385_v10 = vpop.eup %4384  ;;  %v3618_v11 = vpack.c.bf16 %v2958_v57, %v2957_v43  ;;  %v2928_v12 = vadd.f32 %v4916_v54, %v2889_v9  ;;  %v2852_v14 = vmul.f32 %v4383_v4, %v4888_v62 }
 0x4eb   : > { %v2853_v33 = vmul.f32 %v4385_v10, %v4894_v6  ;;  %v2929_v15 = vadd.f32 %v4916_v54, %v2890_v1 }
 0x4ec   : > { %3653 = vst [vmem:[%s4592_s15 + $0x60] sm:$0xff] %v3618_v11   ;;  %v2960_v17 = vmax.f32 %v2928_v12, 0.0  ;;  %v2891_v42 = vmul.f32 %v4907_v39, %v2852_v14 }
 0x4ed   : > { %v4387_v20 = vpop.eup %4386  ;;  %v2892_v22 = vmul.f32 %v4907_v39, %v2853_v33  ;;  %v2961_v62 = vmax.f32 %v2929_v15, 0.0 }
 0x4ee   : > { %v3623_v53 = vpack.c.bf16 %v2960_v17, %v2959_v50  ;;  %v2930_v37 = vadd.f32 %v4916_v54, %v2891_v42  ;;  %v2854_v23 = vmul.f32 %v4387_v20, %v4892_v2 }
 0x4ef   : > { %v2931_v13 = vadd.f32 %v4916_v54, %v2892_v22 }
 0x4f0   : > { %3654 = vst [vmem:[%s4592_s15 + $0x68] sm:$0xff] %v3623_v53   ;;  %v2962_v6 = vmax.f32 %v2930_v37, 0.0  ;;  %v2893_v24 = vmul.f32 %v4907_v39, %v2854_v23 }
 0x4f1   : > { %v2963_v25 = vmax.f32 %v2931_v13, 0.0 }
 0x4f2   : > { %v3628_v47 = vpack.c.bf16 %v2962_v6, %v2961_v62  ;;  %v2932_v19 = vadd.f32 %v4916_v54, %v2893_v24 }
 0x4f4   : > { %3655 = vst [vmem:[%s4592_s15 + $0x70] sm:$0xff] %v3628_v47   ;;  %v2964_v26 = vmax.f32 %v2932_v19, 0.0 }
 0x4f6   : > { %v3633_v28 = vpack.c.bf16 %v2964_v26, %v2963_v25 }
 0x4f8   : > { %3656 = vst [vmem:[%s4592_s15 + $0x78] sm:$0xff] %v3633_v28  }
 0x4f9 PF: > { %s5062_s11 = sld [smem:[#allocation8_spill]]  ;;  %s5063_s1 = sld [smem:[#allocation7_spill]] }
 0x4fa   : > { %s5064_s22 = sld [smem:[#allocation9_spill]] }
 0x4ff   : > { %s30_s23 = sadd.s32 1, %s5062_s11  }
 0x500   : > { %p27_p10 = scmp.ge.s32.totalorder %s30_s23, 4  }
 0x502   :  { %29 = sbr.rel (!%p27_p10) target bundleno = 28 (0x1c), region = 119 }

// kernel: model_forward.4
= control target key start
LH: loop header
LB: loop body
LE: loop exit
PB: predicated region body
PF: predicated region fallthrough
CT: control target
= control target key end

     0   :  { %s5005_s0 = inlined_call_operand.vmem [shape: s32[2,1,1], index: 0, kind: input, shape index: {}]   ;;  %s5006_s2 = inlined_call_operand.vmem [shape: bf16[256,256], index: 2, kind: input, shape index: {}]   ;;  %s5007_s3 = inlined_call_operand.vmem [shape: bf16[2,256,128], index: 3, kind: input, shape index: {}, may-alias: {3,4}]   ;;  %s5008_s4 = inlined_call_operand.vmem [shape: bf16[2,256,128], index: 4, kind: input, shape index: {}, may-alias: {3,4}]   ;;  %s5009_s5 = inlined_call_operand.vmem [shape: bf16[2,128,128], index: 5, kind: input, shape index: {}]   ;;  %s5010_s6 = inlined_call_operand.vmem [shape: f32[2,1,128], index: 6, kind: input, shape index: {}]   ;;  %s5011_s7 = inlined_call_operand.vmem [shape: bf16[2,128,128], index: 7, kind: input, shape index: {}]   ;;  %s5012_s8 = inlined_call_operand.vmem [shape: f32[2,1,128], index: 8, kind: input, shape index: {}]   ;;  %s5013_s9 = inlined_call_operand.vmem [shape: f32[2,1,128], index: 9, kind: input, shape index: {}]   ;;  %s5014_s10 = inlined_call_operand.vmem [shape: bf16[2,256,128], index: 10, kind: output, shape index: {}]   ;;  %s5015_s1 = inlined_call_operand.vmem [shape: s32[2,1], index: 1, kind: input, shape index: {}]  }
   0x1   :  { %5019 = sst [smem:[#allocation11_spill]] %s5007_s3  ;;  %s15_s15 = sshll.u32 %s5005_s0, 4  ;;  %s16_s15 = int_to_ptr.vmem [resolvable:$true] %s15_s15 }
   0x2   :  { %5020 = sst [smem:[#allocation12_spill]] %s5008_s4  ;;  %s19_s18 = sshll.u32 %s5015_s1, 4  ;;  %s20_s18 = int_to_ptr.vmem [resolvable:$true] %s19_s18 }
   0x3   :  { %s4356_s19 = scalar_lea.vmem %s16_s15, 32  ;;  %p4361_p1 = scmp.lt.s32.totalorder %s16_s15, %s16_s15 }
   0x4   :  { %p4357_p0 = scmp.ne.s32.totalorder %s16_s15, %s4356_s19  ;;  %p4362_p2 = scmp.lt.s32.totalorder %s4356_s19, %s4356_s19 }
   0x6   :  { %p4363_p3 = por %p4362_p2, %p4361_p1 }
   0x8   :  { %p4364_p4 = pnand %p4363_p3, %p4357_p0 }
   0xa   :  { %4367 = shalt.err (!%p4364_p4)  }
   0xb   :  { %s4406_s20 = smov [#allocation4]   ;;  %s4368_s21 = scalar_lea.vmem %s20_s18, 32 }
   0xc   :  { %18 = dma.vmem_to_smem %s16_s15, 32, %s4406_s20, [#allocation3] }
   0xd   :  { %p4369_p5 = scmp.ne.s32.totalorder %s20_s18, %s4368_s21  ;;  %p4373_p6 = scmp.lt.s32.totalorder %s20_s18, %s20_s18 }
   0xe   :  { %p4374_p7 = scmp.lt.s32.totalorder %s4368_s21, %s4368_s21 }
  0x10   :  { %p4375_p8 = por %p4374_p7, %p4373_p6 }
  0x12   :  { %p4376_p9 = pnand %p4375_p8, %p4369_p5 }
  0x14   :  { %4379 = shalt.err (!%p4376_p9)  }
  0x15   :  { %s4407_s0 = smov [#allocation5]  }
  0x16   :  { %22 = dma.vmem_to_smem %s20_s18, 32, %s4407_s0, [#allocation3] }
  0x17   :  { %4392 = dma.done.wait [#allocation3], 64 }
  0x18   :  { %4393 = vsyncadd [#allocation3], 4294967232 }
  0x19   :  { %24 = sfence }
  0x1a   :  { %s4470_s1 = smov 0   ;;  %s4472_s22 = smov 0  }
  0x1b   :  { %s4474_s23 = smov 0  }
  0x1c LB: > { %5021 = sst [smem:[#allocation7_spill]] %s4400_s22  ;;  %s49_s24 = sadd.s32 1, %s4400_s22  ;;  %s4404_s23 = sphi %s4474_s23, %s30_s23   ;;  %s4400_s22 = sphi %s4472_s22, %s5032_s22   ;;  %s4396_s1 = sphi %s4470_s1, %s5031_s1  }
  0x1d   : > { %5022 = sst [smem:[#allocation8_spill]] %s4404_s23  ;;  %p3278_p10 = scmp.ge.s32.totalorder %s4404_s23, 1 }
  0x1e   : > { %p51_p11 = scmp.ge.s32.totalorder %s49_s24, 2  ;;  %p486_p12 = scmp.lt.s32.totalorder %s4404_s23, 3 }
  0x20   : > { %s5034_s24 = smov (%p51_p11, %s49_s24), 0  ;;  %p487_p13 = pnand %p3278_p10, %p486_p12 }
  0x21   : > { %5023 = sst [smem:[#allocation9_spill]] %s5034_s24 }
  0x22   : > { %490 = sbr.rel (%p487_p13) target bundleno = 1271 (0x4f7), region = 52 }
  0x29   : > { %s4491_s25 = sshll.u32 %s4396_s1, 7  ;;  %s4494_s26 = ssub.s32 1, %s4396_s1  ;;  %v4408_v0 = vmov 0.0  }
  0x2a   : > { %s4497_s27 = sld [smem:[#allocation4 + %s4491_s25]]  ;;  %710 = vst [vmem:[#allocation2] sm:$0xff] %v4408_v0  ;;  %711 = vst [vmem:[#allocation2 + $0x8] sm:$0xff] %v4408_v0  ;;  %p647_p0 = scmp.lt.s32.totalorder %s4494_s26, 1 }
  0x2b   : > { %s4500_s28 = sld [smem:[#allocation4 + %s4491_s25]]  ;;  %712 = vst [vmem:[#allocation2 + $0x10] sm:$0xff] %v4408_v0  ;;  %713 = vst [vmem:[#allocation2 + $0x18] sm:$0xff] %v4408_v0  ;;  %p667_p1 = scmp.lt.s32.totalorder %s4396_s1, 1 }
  0x2c   : > { %714 = vst [vmem:[#allocation2 + $0x20] sm:$0xff] %v4408_v0  ;;  %715 = vst [vmem:[#allocation2 + $0x28] sm:$0xff] %v4408_v0  ;;  %s4505_s29 = sld [smem:[#allocation5 + %s4491_s25]]  ;;  %p751_p2 = scmp.eq.s32.totalorder %s4396_s1, 0 }
  0x2d   : > { %716 = vst [vmem:[#allocation2 + $0x30] sm:$0xff] %v4408_v0  ;;  %717 = vst [vmem:[#allocation2 + $0x38] sm:$0xff] %v4408_v0  ;;  %s648_s30 = scalar_select %p647_p0, %s4494_s26, 1 }
  0x2e   : > { %718 = vst [vmem:[#allocation2 + $0x40] sm:$0xff] %v4408_v0  ;;  %719 = vst [vmem:[#allocation2 + $0x48] sm:$0xff] %v4408_v0  ;;  %s4509_s11 = scalar_select %p667_p1, %s4396_s1, 1 }
  0x2f   : > { %720 = vst [vmem:[#allocation2 + $0x50] sm:$0xff] %v4408_v0  ;;  %721 = vst [vmem:[#allocation2 + $0x58] sm:$0xff] %v4408_v0  ;;  %s3286_s12 = sshll.u32 %s648_s30, 5  ;;  %s5025_s4 = sld [smem:[#allocation12_spill]] }
  0x30   : > { %722 = vst [vmem:[#allocation2 + $0x60] sm:$0xff] %v4408_v0  ;;  %723 = vst [vmem:[#allocation2 + $0x68] sm:$0xff] %v4408_v0  ;;  %s603_s13 = smul.u32 %s4396_s1, %s4497_s27  ;;  %s3455_s18 = sshll.u32 %s4509_s11, 7 }
  0x31   : > { %724 = vst [vmem:[#allocation2 + $0x70] sm:$0xff] %v4408_v0  ;;  %725 = vst [vmem:[#allocation2 + $0x78] sm:$0xff] %v4408_v0  ;;  %s3285_s14 = sshll.u32 %s4500_s28, 5  ;;  %s605_s15 = smul.u32 %s4494_s26, %s4497_s27 }
  0x32   : > { %726 = vst [vmem:[#allocation2 + $0x80] sm:$0xff] %v4408_v0  ;;  %727 = vst [vmem:[#allocation2 + $0x88] sm:$0xff] %v4408_v0  ;;  %p4517_p3 = scmp.lt.s32.totalorder %s3285_s14, 31  ;;  %s3280_s17 = sshll.u32 %s603_s13, 5 }
  0x33   : > { %728 = vst [vmem:[#allocation2 + $0x90] sm:$0xff] %v4408_v0  ;;  %729 = vst [vmem:[#allocation2 + $0x98] sm:$0xff] %v4408_v0  ;;  %s3281_s19 = sshll.u32 %s605_s15, 1  ;;  %p610_p4 = scmp.lt.s32.totalorder %s3280_s17, 31 }
  0x34   : > { %730 = vst [vmem:[#allocation2 + $0xa0] sm:$0xff] %v4408_v0  ;;  %731 = vst [vmem:[#allocation2 + $0xa8] sm:$0xff] %v4408_v0  ;;  %p612_p5 = scmp.lt.s32.totalorder %s3281_s19, 1  ;;  %s3456_s26 = sshll.u32 %s4509_s11, 6 }
  0x35   : > { %732 = vst [vmem:[#allocation2 + $0xb0] sm:$0xff] %v4408_v0  ;;  %733 = vst [vmem:[#allocation2 + $0xb8] sm:$0xff] %v4408_v0  ;;  %s4525_s0 = scalar_lea.vmem %s5025_s4, %s3455_s18  ;;  %s5036_s17 = smov (!%p610_p4, %s3280_s17), 31 }
  0x36   : > { %734 = vst [vmem:[#allocation2 + $0xc0] sm:$0xff] %v4408_v0  ;;  %735 = vst [vmem:[#allocation2 + $0xc8] sm:$0xff] %v4408_v0  ;;  %5026 = sst [smem:[#allocation10_spill]] %s4525_s0  ;;  %s5038_s19 = smov (!%p612_p5, %s3281_s19), 1 }
  0x37   : > { %736 = vst [vmem:[#allocation2 + $0xd0] sm:$0xff] %v4408_v0  ;;  %737 = vst [vmem:[#allocation2 + $0xd8] sm:$0xff] %v4408_v0  ;;  %s3282_s25 = sshll.u32 %s5036_s17, 1  ;;  %s4531_s13 = scalar_lea.vmem %s5009_s5, %s3456_s26 }
  0x38   : > { %738 = vst [vmem:[#allocation2 + $0xe0] sm:$0xff] %v4408_v0  ;;  %739 = vst [vmem:[#allocation2 + $0xe8] sm:$0xff] %v4408_v0  ;;  %s615_s27 = sadd.s32 %s3282_s25, %s5038_s19  ;;  %s4545_s3 = scalar_lea.vmem %s5011_s7, %s3456_s26 }
  0x39   : > { %740 = vst [vmem:[#allocation2 + $0xf0] sm:$0xff] %v4408_v0  ;;  %741 = vst [vmem:[#allocation2 + $0xf8] sm:$0xff] %v4408_v0  ;;  %s3283_s15 = sshll.u32 %s615_s27, 2  ;;  %s5040_s14 = smov (!%p4517_p3, %s3285_s14), 31 }
  0x3a   : > { %s4540_s23 = scalar_lea.vmem %s5006_s2, %s3283_s15  ;;  %s691_s27 = scalar_lea.vmem %s5012_s8, %s4509_s11 }
  0x3b   : > { %s694_s22 = scalar_lea.vmem %s5013_s9, %s4509_s11  ;;  %s652_s24 = sadd.s32 %s3286_s12, %s5040_s14 }
  0x3c   : > { %s4560_s15 = scalar_lea.vmem %s5014_s10, %s3455_s18  ;;  %s3287_s21 = sshll.u32 %s652_s24, 2 }
  0x3d   : > { %p3297_p6 = scmp.gt.s32.totalorder %s4505_s29, 0  ;;  %s5027_s16 = sld [smem:[#allocation11_spill]] }
  0x3f   : > { %p752_p7 = pnand %p3297_p6, %p751_p2 }
  0x40   : > { %v4158_v12 = vld [vmem:[%s4540_s23 + $0x4] ss:$8 sps:$4 sm:$0xff] (!%p752_p7)   ;;  %v4156_v19 = vld [vmem:[%s4540_s23] ss:$8 sps:$4 sm:$0xff] (!%p752_p7)   ;;  %v4162_v21 = vld [vmem:[%s4540_s23 + $0x14] ss:$8 sps:$4 sm:$0xff] (!%p752_p7)  }
  0x41   : > { %755 = sbr.rel (%p752_p7) target bundleno = 377 (0x179), region = 60  ;;  %v4161_v13 = vld [vmem:[%s4540_s23 + $0x84] ss:$8 sps:$4 sm:$0xff] (!%p752_p7)   ;;  %1140 = vmatprep.mubr.bf16.mxu0 (!%p752_p7), %v4158_v12  ;;  %v4159_v20 = vld [vmem:[%s4540_s23 + $0x80] ss:$8 sps:$4 sm:$0xff] (!%p752_p7)  }
  0x42   : > { %1204 = vmatprep.mubr.bf16.mxu1 (!%p752_p7), %v4161_v13  ;;  %v4164_v22 = vld [vmem:[%s4540_s23 + $0x94] ss:$8 sps:$4 sm:$0xff] (!%p752_p7)   ;;  %v4166_v23 = vld [vmem:[%s4540_s23 + $0x10] ss:$8 sps:$4 sm:$0xff] (!%p752_p7)   ;;  %v4168_v25 = vld [vmem:[%s4540_s23 + $0x24] ss:$8 sps:$4 sm:$0xff] (!%p752_p7)  }
  0x43   : > { %s4566_s17 = scalar_lea.vmem %s5027_s16, %s3287_s21  ;;  %v4167_v24 = vld [vmem:[%s4540_s23 + $0x90] ss:$8 sps:$4 sm:$0xff] (!%p752_p7)   ;;  %v4170_v26 = vld [vmem:[%s4540_s23 + $0xa4] ss:$8 sps:$4 sm:$0xff] (!%p752_p7)   ;;  %v4172_v27 = vld [vmem:[%s4540_s23 + $0x20] ss:$8 sps:$4 sm:$0xff] (!%p752_p7)  }
  0x44   : > { %v4140_v1 = vld [vmem:[%s4566_s17 + $0x40] sm:$0xff] (!%p752_p7)   ;;  %v4142_v3 = vld [vmem:[%s4566_s17 + $0x48] sm:$0xff] (!%p752_p7)   ;;  %v4144_v5 = vld [vmem:[%s4566_s17 + $0x50] sm:$0xff] (!%p752_p7)  }
  0x45   : > { %v4141_v2 = vld [vmem:[%s4566_s17] sm:$0xff] (!%p752_p7)   ;;  %3625 = vmatprep.subr.bf16.mxu0 (!%p752_p7), %v4140_v1  ;;  %4081 = vmatprep.subr.bf16.mxu1 (!%p752_p7), %v4140_v1  ;;  %v4143_v4 = vld [vmem:[%s4566_s17 + $0x8] sm:$0xff] (!%p752_p7)   ;;  %v4145_v6 = vld [vmem:[%s4566_s17 + $0x10] sm:$0xff] (!%p752_p7)  }
  0x46   : > { %3626 = vmatpush3.bf16.msra.mxu0 (!%p752_p7), %v4141_v2  ;;  %4089 = vmatpush3.bf16.msra.mxu1 (!%p752_p7), %v4141_v2  ;;  %v4146_v7 = vld [vmem:[%s4566_s17 + $0x58] sm:$0xff] (!%p752_p7)   ;;  %v4148_v9 = vld [vmem:[%s4566_s17 + $0x60] sm:$0xff] (!%p752_p7)   ;;  %v4150_v11 = vld [vmem:[%s4566_s17 + $0x68] sm:$0xff] (!%p752_p7)  }
  0x47   : > { %3627 = vmatprep.subr.bf16.mxu0 (!%p752_p7), %v4142_v3  ;;  %4082 = vmatprep.subr.bf16.mxu1 (!%p752_p7), %v4142_v3  ;;  %v4147_v8 = vld [vmem:[%s4566_s17 + $0x18] sm:$0xff] (!%p752_p7)   ;;  %v4149_v10 = vld [vmem:[%s4566_s17 + $0x20] sm:$0xff] (!%p752_p7)   ;;  %v4151_v14 = vld [vmem:[%s4566_s17 + $0x28] sm:$0xff] (!%p752_p7)  }
  0x48   : > { %v4152_v15 = vld [vmem:[%s4566_s17 + $0x70] sm:$0xff]   ;;  %v4154_v17 = vld [vmem:[%s4566_s17 + $0x78] sm:$0xff]   ;;  %v4173_v28 = vld [vmem:[%s4540_s23 + $0xa0] ss:$8 sps:$4 sm:$0xff]  }
  0x49   : > { %v4153_v16 = vld [vmem:[%s4566_s17 + $0x30] sm:$0xff]   ;;  %v4155_v18 = vld [vmem:[%s4566_s17 + $0x38] sm:$0xff]   ;;  %v4180_v33 = vld [vmem:[%s4540_s23 + $0x44] ss:$8 sps:$4 sm:$0xff]  }
  0x4a   : > { %3628 = vmatpush3.bf16.msra.mxu0 %v4143_v4  ;;  %4090 = vmatpush3.bf16.msra.mxu1 %v4143_v4  ;;  %v4174_v29 = vld [vmem:[%s4540_s23 + $0x34] ss:$8 sps:$4 sm:$0xff]   ;;  %v4178_v31 = vld [vmem:[%s4540_s23 + $0x30] ss:$8 sps:$4 sm:$0xff]   ;;  %v4182_v34 = vld [vmem:[%s4540_s23 + $0xc4] ss:$8 sps:$4 sm:$0xff]  }
  0x4b   : > { %3629 = vmatprep.subr.bf16.mxu0 %v4144_v5  ;;  %4083 = vmatprep.subr.bf16.mxu1 %v4144_v5  ;;  %v4176_v30 = vld [vmem:[%s4540_s23 + $0xb4] ss:$8 sps:$4 sm:$0xff]   ;;  %v4179_v32 = vld [vmem:[%s4540_s23 + $0xb0] ss:$8 sps:$4 sm:$0xff]   ;;  %v4184_v35 = vld [vmem:[%s4540_s23 + $0x40] ss:$8 sps:$4 sm:$0xff]  }
  0x4c   : > { %v4185_v36 = vld [vmem:[%s4540_s23 + $0xc0] ss:$8 sps:$4 sm:$0xff]   ;;  %v4186_v37 = vld [vmem:[%s4540_s23 + $0x54] ss:$8 sps:$4 sm:$0xff]   ;;  %v4190_v39 = vld [vmem:[%s4540_s23 + $0x50] ss:$8 sps:$4 sm:$0xff]  }
  0x4d   : > { %v4188_v38 = vld [vmem:[%s4540_s23 + $0xd4] ss:$8 sps:$4 sm:$0xff]   ;;  %v4191_v40 = vld [vmem:[%s4540_s23 + $0xd0] ss:$8 sps:$4 sm:$0xff]   ;;  %v4192_v41 = vld [vmem:[%s4540_s23 + $0x64] ss:$8 sps:$4 sm:$0xff]  }
  0x4e   : > { %3630 = vmatpush3.bf16.msra.mxu0 %v4145_v6  ;;  %4091 = vmatpush3.bf16.msra.mxu1 %v4145_v6  ;;  %v4194_v42 = vld [vmem:[%s4540_s23 + $0xe4] ss:$8 sps:$4 sm:$0xff]   ;;  %v4196_v43 = vld [vmem:[%s4540_s23 + $0x60] ss:$8 sps:$4 sm:$0xff]   ;;  %v4198_v45 = vld [vmem:[%s4540_s23 + $0x74] ss:$8 sps:$4 sm:$0xff]  }
  0x4f   : > { %3631 = vmatprep.subr.bf16.mxu0 %v4146_v7  ;;  %4084 = vmatprep.subr.bf16.mxu1 %v4146_v7  ;;  %v4197_v44 = vld [vmem:[%s4540_s23 + $0xe0] ss:$8 sps:$4 sm:$0xff]   ;;  %v4200_v46 = vld [vmem:[%s4540_s23 + $0xf4] ss:$8 sps:$4 sm:$0xff]   ;;  %v4202_v47 = vld [vmem:[%s4540_s23 + $0x70] ss:$8 sps:$4 sm:$0xff]  }
  0x50   : > { %v4203_v48 = vld [vmem:[%s4540_s23 + $0xf0] ss:$8 sps:$4 sm:$0xff]   ;;  %v756_v51 = vld [vmem:[#allocation2] sm:$0xff]  ;;  %v757_v59 = vld [vmem:[#allocation2 + $0x8] sm:$0xff] }
  0x51   : > { %v772_v53 = vld [vmem:[#allocation2 + $0x80] sm:$0xff]  ;;  %v773_v61 = vld [vmem:[#allocation2 + $0x88] sm:$0xff]  ;;  %v758_v7 = vld [vmem:[#allocation2 + $0x10] sm:$0xff] }
  0x52   : > { %3632 = vmatpush3.bf16.msra.mxu0 %v4147_v8  ;;  %4092 = vmatpush3.bf16.msra.mxu1 %v4147_v8 }
  0x53   : > { %3633 = vmatprep.subr.bf16.mxu0 %v4148_v9  ;;  %4085 = vmatprep.subr.bf16.mxu1 %v4148_v9  ;;  %v774_v9 = vld [vmem:[#allocation2 + $0x90] sm:$0xff] }
  0x56   : > { %3634 = vmatpush3.bf16.msra.mxu0 %v4149_v10  ;;  %4093 = vmatpush3.bf16.msra.mxu1 %v4149_v10 }
  0x57   : > { %3635 = vmatprep.subr.bf16.mxu0 %v4150_v11  ;;  %4086 = vmatprep.subr.bf16.mxu1 %v4150_v11 }
  0x5a   : > { %3636 = vmatpush3.bf16.msra.mxu0 %v4151_v14  ;;  %4094 = vmatpush3.bf16.msra.mxu1 %v4151_v14 }
  0x5b   : > { %3637 = vmatprep.subr.bf16.mxu0 %v4152_v15  ;;  %4087 = vmatprep.subr.bf16.mxu1 %v4152_v15  ;;  %v759_v15 = vld [vmem:[#allocation2 + $0x18] sm:$0xff] }
  0x5e   : > { %3638 = vmatpush3.bf16.msra.mxu0 %v4153_v16  ;;  %4095 = vmatpush3.bf16.msra.mxu1 %v4153_v16 }
  0x5f   : > { %3639 = vmatprep.subr.bf16.mxu0 %v4154_v17  ;;  %4088 = vmatprep.subr.bf16.mxu1 %v4154_v17  ;;  %v775_v17 = vld [vmem:[#allocation2 + $0x98] sm:$0xff] }
  0x62   : > { %3640 = vmatpush3.bf16.msra.mxu0 %v4155_v18  ;;  %4096 = vmatpush3.bf16.msra.mxu1 %v4155_v18 }
  0x65   : > { %1141 = vmatmul.mubr.bf16.vlgmr.msra.gmra.mrb[0].mxu0 %v4156_v19  ;;  %1205 = vmatmul.mubr.bf16.vlgmr.msra.gmra.mrb[0].mxu1 %v4159_v20 }
  0x66   : > { %1148 = vmatprep.mubr.bf16.mxu0 %v4162_v21  ;;  %1212 = vmatprep.mubr.bf16.mxu1 %v4164_v22 }
  0x6d   : > { %1149 = vmatmul.mubr.bf16.gmra.mrb[4].mxu0 %v4166_v23  ;;  %1213 = vmatmul.mubr.bf16.gmra.mrb[4].mxu1 %v4167_v24 }
  0x6e   : > { %1156 = vmatprep.mubr.bf16.mxu0 %v4168_v25  ;;  %1220 = vmatprep.mubr.bf16.mxu1 %v4170_v26 }
  0x75   : > { %1157 = vmatmul.mubr.bf16.gmra.mrb[8].mxu0 %v4172_v27  ;;  %1221 = vmatmul.mubr.bf16.gmra.mrb[8].mxu1 %v4173_v28  ;;  %v760_v27 = vld [vmem:[#allocation2 + $0x20] sm:$0xff] }
  0x76   : > { %1164 = vmatprep.mubr.bf16.mxu0 %v4174_v29  ;;  %1228 = vmatprep.mubr.bf16.mxu1 %v4176_v30  ;;  %v776_v29 = vld [vmem:[#allocation2 + $0xa0] sm:$0xff] }
  0x7d   : > { %1165 = vmatmul.mubr.bf16.gmra.mrb[12].mxu0 %v4178_v31  ;;  %1229 = vmatmul.mubr.bf16.gmra.mrb[12].mxu1 %v4179_v32 }
  0x7e   : > { %1172 = vmatprep.mubr.bf16.mxu0 %v4180_v33  ;;  %1236 = vmatprep.mubr.bf16.mxu1 %v4182_v34 }
  0x85   : > { %1173 = vmatmul.mubr.bf16.gmra.mrb[16].mxu0 %v4184_v35  ;;  %1237 = vmatmul.mubr.bf16.gmra.mrb[16].mxu1 %v4185_v36  ;;  %v761_v35 = vld [vmem:[#allocation2 + $0x28] sm:$0xff] }
  0x86   : > { %1180 = vmatprep.mubr.bf16.mxu0 %v4186_v37  ;;  %1244 = vmatprep.mubr.bf16.mxu1 %v4188_v38  ;;  %v777_v37 = vld [vmem:[#allocation2 + $0xa8] sm:$0xff] }
  0x8d   : > { %1181 = vmatmul.mubr.bf16.gmra.mrb[20].mxu0 %v4190_v39  ;;  %1245 = vmatmul.mubr.bf16.gmra.mrb[20].mxu1 %v4191_v40 }
  0x8e   : > { %1188 = vmatprep.mubr.bf16.mxu0 %v4192_v41  ;;  %1252 = vmatprep.mubr.bf16.mxu1 %v4194_v42 }
  0x95   : > { %1189 = vmatmul.mubr.bf16.gmra.mrb[24].mxu0 %v4196_v43  ;;  %1253 = vmatmul.mubr.bf16.gmra.mrb[24].mxu1 %v4197_v44 }
  0x96   : > { %1196 = vmatprep.mubr.bf16.mxu0 %v4198_v45  ;;  %1260 = vmatprep.mubr.bf16.mxu1 %v4200_v46 }
  0x9d   : > { %1197 = vmatmul.mubr.bf16.gmra.mrb[28].mxu0 %v4202_v47  ;;  %1261 = vmatmul.mubr.bf16.gmra.mrb[28].mxu1 %v4203_v48  ;;  %v762_v47 = vld [vmem:[#allocation2 + $0x30] sm:$0xff] }
 0x138   : > { %v3641_v49 = vpop.f32.mrb[0].mxu0  ;;  %v3689_v50 = vpop.f32.mrb[0].mxu1 }
 0x139   : > { %v3642_v52 = vpop.f32.mrb[1].mxu0  ;;  %v3690_v54 = vpop.f32.mrb[1].mxu1 }
 0x13a   : > { %v3643_v55 = vadd.f32 %v3642_v52, %v3641_v49  ;;  %v3691_v56 = vadd.f32 %v3690_v54, %v3689_v50  ;;  %v3644_v57 = vpop.f32.mrb[2].mxu0  ;;  %v3692_v58 = vpop.f32.mrb[2].mxu1  ;;  %v778_v49 = vld [vmem:[#allocation2 + $0xb0] sm:$0xff] }
 0x13b   : > { %v3645_v60 = vpop.f32.mrb[3].mxu0  ;;  %v3693_v62 = vpop.f32.mrb[3].mxu1 }
 0x13c   : > { %v1269_v63 = vadd.f32 %v3643_v55, %v756_v51  ;;  %v1285_v0 = vadd.f32 %v3691_v56, %v772_v53  ;;  %v3646_v1 = vadd.f32 %v3645_v60, %v3644_v57  ;;  %v3694_v2 = vadd.f32 %v3693_v62, %v3692_v58  ;;  %v763_v55 = vld [vmem:[#allocation2 + $0x38] sm:$0xff] }
 0x13d   : > { %v779_v57 = vld [vmem:[#allocation2 + $0xb8] sm:$0xff] }
 0x13e   : > { %1301 = vst [vmem:[#allocation2] sm:$0xff] %v1269_v63  ;;  %1317 = vst [vmem:[#allocation2 + $0x80] sm:$0xff] %v1285_v0  ;;  %v1270_v3 = vadd.f32 %v3646_v1, %v757_v59  ;;  %v1286_v4 = vadd.f32 %v3694_v2, %v773_v61 }
 0x140   : > { %1302 = vst [vmem:[#allocation2 + $0x8] sm:$0xff] %v1270_v3  ;;  %1318 = vst [vmem:[#allocation2 + $0x88] sm:$0xff] %v1286_v4  ;;  %v3647_v5 = vpop.f32.mrb[4].mxu0  ;;  %v3695_v6 = vpop.f32.mrb[4].mxu1  ;;  %v764_v3 = vld [vmem:[#allocation2 + $0x40] sm:$0xff] }
 0x141   : > { %v3648_v8 = vpop.f32.mrb[5].mxu0  ;;  %v3696_v10 = vpop.f32.mrb[5].mxu1 }
 0x142   : > { %v3649_v11 = vadd.f32 %v3648_v8, %v3647_v5  ;;  %v3697_v12 = vadd.f32 %v3696_v10, %v3695_v6  ;;  %v3650_v13 = vpop.f32.mrb[6].mxu0  ;;  %v3698_v14 = vpop.f32.mrb[6].mxu1  ;;  %v780_v5 = vld [vmem:[#allocation2 + $0xc0] sm:$0xff] }
 0x143   : > { %v3651_v16 = vpop.f32.mrb[7].mxu0  ;;  %v3699_v18 = vpop.f32.mrb[7].mxu1 }
 0x144   : > { %v1271_v19 = vadd.f32 %v3649_v11, %v758_v7  ;;  %v1287_v20 = vadd.f32 %v3697_v12, %v774_v9  ;;  %v3652_v21 = vadd.f32 %v3651_v16, %v3650_v13  ;;  %v3700_v22 = vadd.f32 %v3699_v18, %v3698_v14  ;;  %v765_v11 = vld [vmem:[#allocation2 + $0x48] sm:$0xff] }
 0x145   : > { %v781_v13 = vld [vmem:[#allocation2 + $0xc8] sm:$0xff] }
 0x146   : > { %1303 = vst [vmem:[#allocation2 + $0x10] sm:$0xff] %v1271_v19  ;;  %1319 = vst [vmem:[#allocation2 + $0x90] sm:$0xff] %v1287_v20  ;;  %v1272_v23 = vadd.f32 %v3652_v21, %v759_v15  ;;  %v1288_v24 = vadd.f32 %v3700_v22, %v775_v17 }
 0x148   : > { %1304 = vst [vmem:[#allocation2 + $0x18] sm:$0xff] %v1272_v23  ;;  %1320 = vst [vmem:[#allocation2 + $0x98] sm:$0xff] %v1288_v24  ;;  %v3653_v25 = vpop.f32.mrb[8].mxu0  ;;  %v3701_v26 = vpop.f32.mrb[8].mxu1  ;;  %v766_v23 = vld [vmem:[#allocation2 + $0x50] sm:$0xff] }
 0x149   : > { %v3654_v28 = vpop.f32.mrb[9].mxu0  ;;  %v3702_v30 = vpop.f32.mrb[9].mxu1 }
 0x14a   : > { %v3655_v31 = vadd.f32 %v3654_v28, %v3653_v25  ;;  %v3703_v32 = vadd.f32 %v3702_v30, %v3701_v26  ;;  %v3656_v33 = vpop.f32.mrb[10].mxu0  ;;  %v3704_v34 = vpop.f32.mrb[10].mxu1  ;;  %v782_v25 = vld [vmem:[#allocation2 + $0xd0] sm:$0xff] }
 0x14b   : > { %v3657_v36 = vpop.f32.mrb[11].mxu0  ;;  %v3705_v38 = vpop.f32.mrb[11].mxu1 }
 0x14c   : > { %v1273_v39 = vadd.f32 %v3655_v31, %v760_v27  ;;  %v1289_v40 = vadd.f32 %v3703_v32, %v776_v29  ;;  %v3658_v41 = vadd.f32 %v3657_v36, %v3656_v33  ;;  %v3706_v42 = vadd.f32 %v3705_v38, %v3704_v34  ;;  %v767_v31 = vld [vmem:[#allocation2 + $0x58] sm:$0xff] }
 0x14d   : > { %v783_v33 = vld [vmem:[#allocation2 + $0xd8] sm:$0xff] }
 0x14e   : > { %1305 = vst [vmem:[#allocation2 + $0x20] sm:$0xff] %v1273_v39  ;;  %1321 = vst [vmem:[#allocation2 + $0xa0] sm:$0xff] %v1289_v40  ;;  %v1274_v43 = vadd.f32 %v3658_v41, %v761_v35  ;;  %v1290_v44 = vadd.f32 %v3706_v42, %v777_v37 }
 0x150   : > { %1306 = vst [vmem:[#allocation2 + $0x28] sm:$0xff] %v1274_v43  ;;  %1322 = vst [vmem:[#allocation2 + $0xa8] sm:$0xff] %v1290_v44  ;;  %v3659_v45 = vpop.f32.mrb[12].mxu0  ;;  %v3707_v46 = vpop.f32.mrb[12].mxu1  ;;  %v768_v43 = vld [vmem:[#allocation2 + $0x60] sm:$0xff] }
 0x151   : > { %v3660_v48 = vpop.f32.mrb[13].mxu0  ;;  %v3708_v50 = vpop.f32.mrb[13].mxu1 }
 0x152   : > { %v3661_v51 = vadd.f32 %v3660_v48, %v3659_v45  ;;  %v3709_v52 = vadd.f32 %v3708_v50, %v3707_v46  ;;  %v3662_v53 = vpop.f32.mrb[14].mxu0  ;;  %v3710_v54 = vpop.f32.mrb[14].mxu1  ;;  %v784_v45 = vld [vmem:[#allocation2 + $0xe0] sm:$0xff] }
 0x153   : > { %v3663_v56 = vpop.f32.mrb[15].mxu0  ;;  %v3711_v58 = vpop.f32.mrb[15].mxu1 }
 0x154   : > { %v1275_v59 = vadd.f32 %v3661_v51, %v762_v47  ;;  %v1291_v60 = vadd.f32 %v3709_v52, %v778_v49  ;;  %v3664_v61 = vadd.f32 %v3663_v56, %v3662_v53  ;;  %v3712_v62 = vadd.f32 %v3711_v58, %v3710_v54  ;;  %v769_v51 = vld [vmem:[#allocation2 + $0x68] sm:$0xff] }
 0x155   : > { %v785_v53 = vld [vmem:[#allocation2 + $0xe8] sm:$0xff] }
 0x156   : > { %1307 = vst [vmem:[#allocation2 + $0x30] sm:$0xff] %v1275_v59  ;;  %1323 = vst [vmem:[#allocation2 + $0xb0] sm:$0xff] %v1291_v60  ;;  %v1276_v63 = vadd.f32 %v3664_v61, %v763_v55  ;;  %v1292_v0 = vadd.f32 %v3712_v62, %v779_v57 }
 0x158   : > { %1308 = vst [vmem:[#allocation2 + $0x38] sm:$0xff] %v1276_v63  ;;  %1324 = vst [vmem:[#allocation2 + $0xb8] sm:$0xff] %v1292_v0  ;;  %v3665_v1 = vpop.f32.mrb[16].mxu0  ;;  %v3713_v2 = vpop.f32.mrb[16].mxu1  ;;  %v770_v63 = vld [vmem:[#allocation2 + $0x70] sm:$0xff] }
 0x159   : > { %v3666_v4 = vpop.f32.mrb[17].mxu0  ;;  %v3714_v6 = vpop.f32.mrb[17].mxu1 }
 0x15a   : > { %v3667_v7 = vadd.f32 %v3666_v4, %v3665_v1  ;;  %v3715_v8 = vadd.f32 %v3714_v6, %v3713_v2  ;;  %v3668_v9 = vpop.f32.mrb[18].mxu0  ;;  %v3716_v10 = vpop.f32.mrb[18].mxu1  ;;  %v786_v1 = vld [vmem:[#allocation2 + $0xf0] sm:$0xff] }
 0x15b   : > { %v3669_v12 = vpop.f32.mrb[19].mxu0  ;;  %v3717_v14 = vpop.f32.mrb[19].mxu1 }
 0x15c   : > { %v1277_v15 = vadd.f32 %v3667_v7, %v764_v3  ;;  %v1293_v16 = vadd.f32 %v3715_v8, %v780_v5  ;;  %v3670_v17 = vadd.f32 %v3669_v12, %v3668_v9  ;;  %v3718_v18 = vadd.f32 %v3717_v14, %v3716_v10  ;;  %v771_v7 = vld [vmem:[#allocation2 + $0x78] sm:$0xff] }
 0x15d   : > { %v787_v9 = vld [vmem:[#allocation2 + $0xf8] sm:$0xff] }
 0x15e   : > { %1309 = vst [vmem:[#allocation2 + $0x40] sm:$0xff] %v1277_v15  ;;  %1325 = vst [vmem:[#allocation2 + $0xc0] sm:$0xff] %v1293_v16  ;;  %v1278_v19 = vadd.f32 %v3670_v17, %v765_v11  ;;  %v1294_v20 = vadd.f32 %v3718_v18, %v781_v13 }
 0x160   : > { %1310 = vst [vmem:[#allocation2 + $0x48] sm:$0xff] %v1278_v19  ;;  %1326 = vst [vmem:[#allocation2 + $0xc8] sm:$0xff] %v1294_v20  ;;  %v3671_v21 = vpop.f32.mrb[20].mxu0  ;;  %v3719_v22 = vpop.f32.mrb[20].mxu1 }
 0x161   : > { %v3672_v24 = vpop.f32.mrb[21].mxu0  ;;  %v3720_v26 = vpop.f32.mrb[21].mxu1 }
 0x162   : > { %v3673_v27 = vadd.f32 %v3672_v24, %v3671_v21  ;;  %v3721_v28 = vadd.f32 %v3720_v26, %v3719_v22  ;;  %v3674_v29 = vpop.f32.mrb[22].mxu0  ;;  %v3722_v30 = vpop.f32.mrb[22].mxu1 }
 0x163   : > { %v3675_v32 = vpop.f32.mrb[23].mxu0  ;;  %v3723_v34 = vpop.f32.mrb[23].mxu1 }
 0x164   : > { %v1279_v35 = vadd.f32 %v3673_v27, %v766_v23  ;;  %v1295_v36 = vadd.f32 %v3721_v28, %v782_v25  ;;  %v3676_v37 = vadd.f32 %v3675_v32, %v3674_v29  ;;  %v3724_v38 = vadd.f32 %v3723_v34, %v3722_v30 }
 0x166   : > { %1311 = vst [vmem:[#allocation2 + $0x50] sm:$0xff] %v1279_v35  ;;  %1327 = vst [vmem:[#allocation2 + $0xd0] sm:$0xff] %v1295_v36  ;;  %v1280_v39 = vadd.f32 %v3676_v37, %v767_v31  ;;  %v1296_v40 = vadd.f32 %v3724_v38, %v783_v33 }
 0x168   : > { %1312 = vst [vmem:[#allocation2 + $0x58] sm:$0xff] %v1280_v39  ;;  %1328 = vst [vmem:[#allocation2 + $0xd8] sm:$0xff] %v1296_v40  ;;  %v3677_v41 = vpop.f32.mrb[24].mxu0  ;;  %v3725_v42 = vpop.f32.mrb[24].mxu1 }
 0x169   : > { %v3678_v44 = vpop.f32.mrb[25].mxu0  ;;  %v3726_v46 = vpop.f32.mrb[25].mxu1 }
 0x16a   : > { %v3679_v47 = vadd.f32 %v3678_v44, %v3677_v41  ;;  %v3727_v48 = vadd.f32 %v3726_v46, %v3725_v42  ;;  %v3680_v49 = vpop.f32.mrb[26].mxu0  ;;  %v3728_v50 = vpop.f32.mrb[26].mxu1 }
 0x16b   : > { %v3681_v52 = vpop.f32.mrb[27].mxu0  ;;  %v3729_v54 = vpop.f32.mrb[27].mxu1 }
 0x16c   : > { %v1281_v55 = vadd.f32 %v3679_v47, %v768_v43  ;;  %v1297_v56 = vadd.f32 %v3727_v48, %v784_v45  ;;  %v3682_v57 = vadd.f32 %v3681_v52, %v3680_v49  ;;  %v3730_v58 = vadd.f32 %v3729_v54, %v3728_v50 }
 0x16e   : > { %1313 = vst [vmem:[#allocation2 + $0x60] sm:$0xff] %v1281_v55  ;;  %1329 = vst [vmem:[#allocation2 + $0xe0] sm:$0xff] %v1297_v56  ;;  %v1282_v59 = vadd.f32 %v3682_v57, %v769_v51  ;;  %v1298_v60 = vadd.f32 %v3730_v58, %v785_v53 }
 0x170   : > { %1314 = vst [vmem:[#allocation2 + $0x68] sm:$0xff] %v1282_v59  ;;  %1330 = vst [vmem:[#allocation2 + $0xe8] sm:$0xff] %v1298_v60  ;;  %v3683_v61 = vpop.f32.mrb[28].mxu0  ;;  %v3731_v62 = vpop.f32.mrb[28].mxu1 }
 0x171   : > { %v3684_v0 = vpop.f32.mrb[29].mxu0  ;;  %v3732_v2 = vpop.f32.mrb[29].mxu1 }
 0x172   : > { %v3685_v3 = vadd.f32 %v3684_v0, %v3683_v61  ;;  %v3733_v4 = vadd.f32 %v3732_v2, %v3731_v62  ;;  %v3686_v5 = vpop.f32.mrb[30].mxu0  ;;  %v3734_v6 = vpop.f32.mrb[30].mxu1 }
 0x173   : > { %v3687_v8 = vpop.f32.mrb[31].mxu0  ;;  %v3735_v10 = vpop.f32.mrb[31].mxu1 }
 0x174   : > { %v1283_v11 = vadd.f32 %v3685_v3, %v770_v63  ;;  %v1299_v12 = vadd.f32 %v3733_v4, %v786_v1  ;;  %v3688_v13 = vadd.f32 %v3687_v8, %v3686_v5  ;;  %v3736_v14 = vadd.f32 %v3735_v10, %v3734_v6 }
 0x176   : > { %1315 = vst [vmem:[#allocation2 + $0x70] sm:$0xff] %v1283_v11  ;;  %1331 = vst [vmem:[#allocation2 + $0xf0] sm:$0xff] %v1299_v12  ;;  %v1284_v15 = vadd.f32 %v3688_v13, %v771_v7  ;;  %v1300_v16 = vadd.f32 %v3736_v14, %v787_v9 }
 0x178   : > { %1316 = vst [vmem:[#allocation2 + $0x78] sm:$0xff] %v1284_v15  ;;  %1332 = vst [vmem:[#allocation2 + $0xf8] sm:$0xff] %v1300_v16 }
 0x179 PF: > { %p1333_p8 = scmp.eq.s32.totalorder %s4396_s1, 1 }
 0x17b   : > { %p1334_p9 = pnand %p3297_p6, %p1333_p8 }
 0x17c   : > { %v4204_v17 = vld [vmem:[%s4540_s23 + $0x84] ss:$8 sps:$4 sm:$0xff] (!%p1334_p9)   ;;  %v4206_v18 = vld [vmem:[%s4540_s23 + $0x80] ss:$8 sps:$4 sm:$0xff] (!%p1334_p9)   ;;  %v4207_v19 = vld [vmem:[%s4540_s23 + $0x94] ss:$8 sps:$4 sm:$0xff] (!%p1334_p9)  }
 0x17d   : > { %1337 = sbr.rel (%p1334_p9) target bundleno = 792 (0x318), region = 64  ;;  %1642 = vxpose.xlu1.c.b16.start [1/8] (!%p1334_p9), %v4204_v17, 128  ;;  %1626 = vxpose.xlu0.c.b16.start [1/8] (!%p1334_p9), %v4206_v18, 128  ;;  %v4209_v20 = vld [vmem:[%s4540_s23 + $0x90] ss:$8 sps:$4 sm:$0xff] (!%p1334_p9)   ;;  %v4210_v21 = vld [vmem:[%s4540_s23 + $0xa4] ss:$8 sps:$4 sm:$0xff] (!%p1334_p9)  }
 0x17e   : > { %v4212_v22 = vld [vmem:[%s4540_s23 + $0xa0] ss:$8 sps:$4 sm:$0xff] (!%p1334_p9)   ;;  %v4213_v23 = vld [vmem:[%s4540_s23 + $0xb4] ss:$8 sps:$4 sm:$0xff] (!%p1334_p9)   ;;  %v4215_v24 = vld [vmem:[%s4540_s23 + $0xb0] ss:$8 sps:$4 sm:$0xff] (!%p1334_p9)  }
 0x17f   : > { %v4216_v25 = vld [vmem:[%s4540_s23 + $0xc4] ss:$8 sps:$4 sm:$0xff] (!%p1334_p9)   ;;  %v4218_v26 = vld [vmem:[%s4540_s23 + $0xc0] ss:$8 sps:$4 sm:$0xff] (!%p1334_p9)   ;;  %v4219_v27 = vld [vmem:[%s4540_s23 + $0xd4] ss:$8 sps:$4 sm:$0xff] (!%p1334_p9)  }
 0x180   : > { %v4221_v28 = vld [vmem:[%s4540_s23 + $0xd0] ss:$8 sps:$4 sm:$0xff] (!%p1334_p9)   ;;  %v4222_v29 = vld [vmem:[%s4540_s23 + $0xe4] ss:$8 sps:$4 sm:$0xff] (!%p1334_p9)   ;;  %v4224_v30 = vld [vmem:[%s4540_s23 + $0xe0] ss:$8 sps:$4 sm:$0xff] (!%p1334_p9)  }
 0x181   : > { %1643 = vxpose.xlu1.c.b16.cont [2/8] (!%p1334_p9), %v4207_v19, 128  ;;  %1627 = vxpose.xlu0.c.b16.cont [2/8] (!%p1334_p9), %v4209_v20, 128  ;;  %v4252_v31 = vld [vmem:[%s4566_s17 + $0x40] sm:$0xff] (!%p1334_p9)   ;;  %v4225_v33 = vld [vmem:[%s4540_s23 + $0xf4] ss:$8 sps:$4 sm:$0xff] (!%p1334_p9)   ;;  %v4254_v34 = vld [vmem:[%s4566_s17 + $0x48] sm:$0xff] (!%p1334_p9)  }
 0x182   : > { %v4253_v32 = vld [vmem:[%s4566_s17] sm:$0xff] (!%p1334_p9)   ;;  %3737 = vmatprep.subr.bf16.mxu0 (!%p1334_p9), %v4252_v31  ;;  %4097 = vmatprep.subr.bf16.mxu1 (!%p1334_p9), %v4252_v31  ;;  %v4255_v35 = vld [vmem:[%s4566_s17 + $0x8] sm:$0xff] (!%p1334_p9)   ;;  %v4256_v36 = vld [vmem:[%s4566_s17 + $0x50] sm:$0xff] (!%p1334_p9)  }
 0x183   : > { %3738 = vmatpush3.bf16.msra.mxu0 (!%p1334_p9), %v4253_v32  ;;  %4105 = vmatpush3.bf16.msra.mxu1 (!%p1334_p9), %v4253_v32  ;;  %v4227_v37 = vld [vmem:[%s4540_s23 + $0xf0] ss:$8 sps:$4 sm:$0xff] (!%p1334_p9)   ;;  %v4228_v38 = vld [vmem:[%s4540_s23 + $0x4] ss:$8 sps:$4 sm:$0xff] (!%p1334_p9)   ;;  %v4230_v41 = vld [vmem:[%s4540_s23] ss:$8 sps:$4 sm:$0xff] (!%p1334_p9)  }
 0x184   : > { %3739 = vmatprep.subr.bf16.mxu0 %v4254_v34  ;;  %4098 = vmatprep.subr.bf16.mxu1 %v4254_v34  ;;  %v4257_v39 = vld [vmem:[%s4566_s17 + $0x10] sm:$0xff]   ;;  %v4258_v40 = vld [vmem:[%s4566_s17 + $0x58] sm:$0xff]   ;;  %v4260_v44 = vld [vmem:[%s4566_s17 + $0x60] sm:$0xff]  }
 0x185   : > { %1644 = vxpose.xlu1.c.b16.cont [3/8] %v4210_v21, 128  ;;  %1628 = vxpose.xlu0.c.b16.cont [3/8] %v4212_v22, 128  ;;  %v4231_v42 = vld [vmem:[%s4540_s23 + $0x14] ss:$8 sps:$4 sm:$0xff]   ;;  %v4233_v45 = vld [vmem:[%s4540_s23 + $0x10] ss:$8 sps:$4 sm:$0xff]   ;;  %v4261_v46 = vld [vmem:[%s4566_s17 + $0x20] sm:$0xff]  }
 0x186   : > { %v4259_v43 = vld [vmem:[%s4566_s17 + $0x18] sm:$0xff]   ;;  %v4234_v47 = vld [vmem:[%s4540_s23 + $0x24] ss:$8 sps:$4 sm:$0xff]   ;;  %v4236_v49 = vld [vmem:[%s4540_s23 + $0x20] ss:$8 sps:$4 sm:$0xff]  }
 0x187   : > { %3740 = vmatpush3.bf16.msra.mxu0 %v4255_v35  ;;  %4106 = vmatpush3.bf16.msra.mxu1 %v4255_v35  ;;  %v4262_v48 = vld [vmem:[%s4566_s17 + $0x68] sm:$0xff]   ;;  %v4237_v51 = vld [vmem:[%s4540_s23 + $0x34] ss:$8 sps:$4 sm:$0xff]   ;;  %v4239_v53 = vld [vmem:[%s4540_s23 + $0x30] ss:$8 sps:$4 sm:$0xff]  }
 0x188   : > { %3741 = vmatprep.subr.bf16.mxu0 %v4256_v36  ;;  %4099 = vmatprep.subr.bf16.mxu1 %v4256_v36  ;;  %v4263_v50 = vld [vmem:[%s4566_s17 + $0x28] sm:$0xff]   ;;  %v4264_v52 = vld [vmem:[%s4566_s17 + $0x70] sm:$0xff]   ;;  %v4266_v56 = vld [vmem:[%s4566_s17 + $0x78] sm:$0xff]  }
 0x189   : > { %1645 = vxpose.xlu1.c.b16.cont [4/8] %v4213_v23, 128  ;;  %1629 = vxpose.xlu0.c.b16.cont [4/8] %v4215_v24, 128  ;;  %v4265_v54 = vld [vmem:[%s4566_s17 + $0x30] sm:$0xff]   ;;  %v4240_v55 = vld [vmem:[%s4540_s23 + $0x44] ss:$8 sps:$4 sm:$0xff]   ;;  %v4242_v57 = vld [vmem:[%s4540_s23 + $0x40] ss:$8 sps:$4 sm:$0xff]  }
 0x18a   : > { %v4267_v58 = vld [vmem:[%s4566_s17 + $0x38] sm:$0xff]   ;;  %v4246_v61 = vld [vmem:[%s4540_s23 + $0x64] ss:$8 sps:$4 sm:$0xff]   ;;  %v4248_v62 = vld [vmem:[%s4540_s23 + $0x60] ss:$8 sps:$4 sm:$0xff]  }
 0x18b   : > { %3742 = vmatpush3.bf16.msra.mxu0 %v4257_v39  ;;  %4107 = vmatpush3.bf16.msra.mxu1 %v4257_v39  ;;  %v4243_v59 = vld [vmem:[%s4540_s23 + $0x54] ss:$8 sps:$4 sm:$0xff]   ;;  %v4245_v60 = vld [vmem:[%s4540_s23 + $0x50] ss:$8 sps:$4 sm:$0xff]   ;;  %v1354_v35 = vld [vmem:[#allocation2 + $0x80] sm:$0xff] }
 0x18c   : > { %3743 = vmatprep.subr.bf16.mxu0 %v4258_v40  ;;  %4100 = vmatprep.subr.bf16.mxu1 %v4258_v40  ;;  %v4249_v63 = vld [vmem:[%s4540_s23 + $0x74] ss:$8 sps:$4 sm:$0xff]   ;;  %v4251_v0 = vld [vmem:[%s4540_s23 + $0x70] ss:$8 sps:$4 sm:$0xff]  }
 0x18d   : > { %1646 = vxpose.xlu1.c.b16.cont [5/8] %v4216_v25, 128  ;;  %1630 = vxpose.xlu0.c.b16.cont [5/8] %v4218_v26, 128 }
 0x18f   : > { %3744 = vmatpush3.bf16.msra.mxu0 %v4259_v43  ;;  %4108 = vmatpush3.bf16.msra.mxu1 %v4259_v43  ;;  %v1355_v43 = vld [vmem:[#allocation2 + $0x88] sm:$0xff] }
 0x190   : > { %3745 = vmatprep.subr.bf16.mxu0 %v4260_v44  ;;  %4101 = vmatprep.subr.bf16.mxu1 %v4260_v44 }
 0x191   : > { %1647 = vxpose.xlu1.c.b16.cont [6/8] %v4219_v27, 128  ;;  %1631 = vxpose.xlu0.c.b16.cont [6/8] %v4221_v28, 128 }
 0x193   : > { %3746 = vmatpush3.bf16.msra.mxu0 %v4261_v46  ;;  %4109 = vmatpush3.bf16.msra.mxu1 %v4261_v46  ;;  %v1339_v46 = vld [vmem:[#allocation2 + $0x8] sm:$0xff] }
 0x194   : > { %3747 = vmatprep.subr.bf16.mxu0 %v4262_v48  ;;  %4102 = vmatprep.subr.bf16.mxu1 %v4262_v48 }
 0x195   : > { %1648 = vxpose.xlu1.c.b16.cont [7/8] %v4222_v29, 128  ;;  %1632 = vxpose.xlu0.c.b16.cont [7/8] %v4224_v30, 128 }
 0x197   : > { %3748 = vmatpush3.bf16.msra.mxu0 %v4263_v50  ;;  %4110 = vmatpush3.bf16.msra.mxu1 %v4263_v50 }
 0x198   : > { %3749 = vmatprep.subr.bf16.mxu0 %v4264_v52  ;;  %4103 = vmatprep.subr.bf16.mxu1 %v4264_v52 }
 0x199   : > { %1649 = vxpose.xlu1.c.b16.end [8/8] %v4225_v33, 128  ;;  %1633 = vxpose.xlu0.c.b16.end [8/8] %v4227_v37, 128  ;;  %v1338_v37 = vld [vmem:[#allocation2] sm:$0xff] }
 0x19b   : > { %3750 = vmatpush3.bf16.msra.mxu0 %v4265_v54  ;;  %4111 = vmatpush3.bf16.msra.mxu1 %v4265_v54 }
 0x19c   : > { %3751 = vmatprep.subr.bf16.mxu0 %v4266_v56  ;;  %4104 = vmatprep.subr.bf16.mxu1 %v4266_v56 }
 0x19d   : > { %1610 = vxpose.xlu1.c.b16.start [1/8] %v4228_v38, 128  ;;  %1594 = vxpose.xlu0.c.b16.start [1/8] %v4230_v41, 128 }
 0x19f   : > { %3752 = vmatpush3.bf16.msra.mxu0 %v4267_v58  ;;  %4112 = vmatpush3.bf16.msra.mxu1 %v4267_v58 }
 0x1a1   : > { %1611 = vxpose.xlu1.c.b16.cont [2/8] %v4231_v42, 128  ;;  %1595 = vxpose.xlu0.c.b16.cont [2/8] %v4233_v45, 128 }
 0x1a5   : > { %1612 = vxpose.xlu1.c.b16.cont [3/8] %v4234_v47, 128  ;;  %1596 = vxpose.xlu0.c.b16.cont [3/8] %v4236_v49, 128 }
 0x1a9   : > { %1613 = vxpose.xlu1.c.b16.cont [4/8] %v4237_v51, 128  ;;  %1597 = vxpose.xlu0.c.b16.cont [4/8] %v4239_v53, 128 }
 0x1ad   : > { %1614 = vxpose.xlu1.c.b16.cont [5/8] %v4240_v55, 128  ;;  %1598 = vxpose.xlu0.c.b16.cont [5/8] %v4242_v57, 128  ;;  %v1356_v55 = vld [vmem:[#allocation2 + $0x90] sm:$0xff] }
 0x1ae   : > { %v1340_v57 = vld [vmem:[#allocation2 + $0x10] sm:$0xff] }
 0x1b1   : > { %1615 = vxpose.xlu1.c.b16.cont [6/8] %v4243_v59, 128  ;;  %1599 = vxpose.xlu0.c.b16.cont [6/8] %v4245_v60, 128 }
 0x1b5   : > { %1616 = vxpose.xlu1.c.b16.cont [7/8] %v4246_v61, 128  ;;  %1600 = vxpose.xlu0.c.b16.cont [7/8] %v4248_v62, 128 }
 0x1b9   : > { %1617 = vxpose.xlu1.c.b16.end [8/8] %v4249_v63, 128  ;;  %1601 = vxpose.xlu0.c.b16.end [8/8] %v4251_v0, 128  ;;  %v1357_v63 = vld [vmem:[#allocation2 + $0x98] sm:$0xff] }
 0x1e3   : > { %v1650_v1 = vpop.trf.xlu1  ;;  %v1634_v2 = vpop.trf.xlu0 }
 0x1e4   : > { %1850 = vmatprep.mubr.bf16.mxu1 %v1650_v1  ;;  %1786 = vmatprep.mubr.bf16.mxu0 %v1634_v2  ;;  %v1341_v2 = vld [vmem:[#allocation2 + $0x18] sm:$0xff] }
 0x1e7   : > { %v1651_v3 = vpop.trf.xlu1  ;;  %v1635_v4 = vpop.trf.xlu0 }
 0x1eb   : > { %v1652_v5 = vpop.trf.xlu1  ;;  %v1636_v6 = vpop.trf.xlu0 }
 0x1ef   : > { %v1653_v7 = vpop.trf.xlu1  ;;  %v1637_v8 = vpop.trf.xlu0 }
 0x1f3   : > { %v1654_v9 = vpop.trf.xlu1  ;;  %v1638_v10 = vpop.trf.xlu0 }
 0x1f7   : > { %v1655_v11 = vpop.trf.xlu1  ;;  %v1639_v12 = vpop.trf.xlu0 }
 0x1fb   : > { %v1656_v13 = vpop.trf.xlu1  ;;  %v1640_v14 = vpop.trf.xlu0 }
 0x1ff   : > { %v1657_v15 = vpop.trf.xlu1  ;;  %v1641_v16 = vpop.trf.xlu0 }
 0x203   : > { %v1618_v17 = vpop.trf.xlu1  ;;  %v1602_v18 = vpop.trf.xlu0 }
 0x204   : > { %1851 = vmatmul.mubr.bf16.vlgmr.msra.gmra.mrb[0].mxu1 %v1618_v17  ;;  %1787 = vmatmul.mubr.bf16.vlgmr.msra.gmra.mrb[0].mxu0 %v1602_v18 }
 0x205   : > { %1858 = vmatprep.mubr.bf16.mxu1 %v1651_v3  ;;  %1794 = vmatprep.mubr.bf16.mxu0 %v1635_v4 }
 0x207   : > { %v1619_v19 = vpop.trf.xlu1  ;;  %v1603_v20 = vpop.trf.xlu0 }
 0x20b   : > { %v1620_v21 = vpop.trf.xlu1  ;;  %v1604_v22 = vpop.trf.xlu0 }
 0x20c   : > { %1859 = vmatmul.mubr.bf16.gmra.mrb[4].mxu1 %v1619_v19  ;;  %1795 = vmatmul.mubr.bf16.gmra.mrb[4].mxu0 %v1603_v20  ;;  %v1359_v19 = vld [vmem:[#allocation2 + $0xa8] sm:$0xff] }
 0x20d   : > { %1866 = vmatprep.mubr.bf16.mxu1 %v1652_v5  ;;  %1802 = vmatprep.mubr.bf16.mxu0 %v1636_v6 }
 0x20f   : > { %v1621_v23 = vpop.trf.xlu1  ;;  %v1605_v24 = vpop.trf.xlu0 }
 0x213   : > { %v1622_v25 = vpop.trf.xlu1  ;;  %v1606_v26 = vpop.trf.xlu0 }
 0x214   : > { %1867 = vmatmul.mubr.bf16.gmra.mrb[8].mxu1 %v1620_v21  ;;  %1803 = vmatmul.mubr.bf16.gmra.mrb[8].mxu0 %v1604_v22  ;;  %v1343_v22 = vld [vmem:[#allocation2 + $0x28] sm:$0xff] }
 0x215   : > { %1874 = vmatprep.mubr.bf16.mxu1 %v1653_v7  ;;  %1810 = vmatprep.mubr.bf16.mxu0 %v1637_v8 }
 0x217   : > { %v1623_v27 = vpop.trf.xlu1  ;;  %v1607_v28 = vpop.trf.xlu0 }
 0x21b   : > { %v1624_v29 = vpop.trf.xlu1  ;;  %v1608_v30 = vpop.trf.xlu0 }
 0x21c   : > { %1875 = vmatmul.mubr.bf16.gmra.mrb[12].mxu1 %v1621_v23  ;;  %1811 = vmatmul.mubr.bf16.gmra.mrb[12].mxu0 %v1605_v24 }
 0x21d   : > { %1882 = vmatprep.mubr.bf16.mxu1 %v1654_v9  ;;  %1818 = vmatprep.mubr.bf16.mxu0 %v1638_v10 }
 0x21f   : > { %v1625_v31 = vpop.trf.xlu1  ;;  %v1609_v32 = vpop.trf.xlu0 }
 0x224   : > { %1883 = vmatmul.mubr.bf16.gmra.mrb[16].mxu1 %v1622_v25  ;;  %1819 = vmatmul.mubr.bf16.gmra.mrb[16].mxu0 %v1606_v26 }
 0x225   : > { %1890 = vmatprep.mubr.bf16.mxu1 %v1655_v11  ;;  %1826 = vmatprep.mubr.bf16.mxu0 %v1639_v12  ;;  %v1358_v11 = vld [vmem:[#allocation2 + $0xa0] sm:$0xff] }
 0x22c   : > { %1891 = vmatmul.mubr.bf16.gmra.mrb[20].mxu1 %v1623_v27  ;;  %1827 = vmatmul.mubr.bf16.gmra.mrb[20].mxu0 %v1607_v28 }
 0x22d   : > { %1898 = vmatprep.mubr.bf16.mxu1 %v1656_v13  ;;  %1834 = vmatprep.mubr.bf16.mxu0 %v1640_v14  ;;  %v1342_v13 = vld [vmem:[#allocation2 + $0x20] sm:$0xff] }
 0x234   : > { %1899 = vmatmul.mubr.bf16.gmra.mrb[24].mxu1 %v1624_v29  ;;  %1835 = vmatmul.mubr.bf16.gmra.mrb[24].mxu0 %v1608_v30 }
 0x235   : > { %1906 = vmatprep.mubr.bf16.mxu1 %v1657_v15  ;;  %1842 = vmatprep.mubr.bf16.mxu0 %v1641_v16 }
 0x23c   : > { %1907 = vmatmul.mubr.bf16.gmra.mrb[28].mxu1 %v1625_v31  ;;  %1843 = vmatmul.mubr.bf16.gmra.mrb[28].mxu0 %v1609_v32  ;;  %v1360_v31 = vld [vmem:[#allocation2 + $0xb0] sm:$0xff] }
 0x2d7   : > { %v3801_v33 = vpop.f32.mrb[0].mxu1  ;;  %v3753_v34 = vpop.f32.mrb[0].mxu0 }
 0x2d8   : > { %v3802_v36 = vpop.f32.mrb[1].mxu1  ;;  %v3754_v38 = vpop.f32.mrb[1].mxu0 }
 0x2d9   : > { %v3803_v39 = vadd.f32 %v3802_v36, %v3801_v33  ;;  %v3804_v40 = vpop.f32.mrb[2].mxu1  ;;  %v3755_v41 = vadd.f32 %v3754_v38, %v3753_v34  ;;  %v3756_v42 = vpop.f32.mrb[2].mxu0  ;;  %v1344_v33 = vld [vmem:[#allocation2 + $0x30] sm:$0xff] }
 0x2da   : > { %v3805_v44 = vpop.f32.mrb[3].mxu1  ;;  %v3757_v47 = vpop.f32.mrb[3].mxu0 }
 0x2db   : > { %v1931_v45 = vadd.f32 %v3803_v39, %v1354_v35  ;;  %v3806_v48 = vadd.f32 %v3805_v44, %v3804_v40  ;;  %v1915_v49 = vadd.f32 %v3755_v41, %v1338_v37  ;;  %v3758_v50 = vadd.f32 %v3757_v47, %v3756_v42  ;;  %v1361_v39 = vld [vmem:[#allocation2 + $0xb8] sm:$0xff] }
 0x2dc   : > { %v1345_v42 = vld [vmem:[#allocation2 + $0x38] sm:$0xff] }
 0x2dd   : > { %1963 = vst [vmem:[#allocation2 + $0x80] sm:$0xff] %v1931_v45  ;;  %v1932_v51 = vadd.f32 %v3806_v48, %v1355_v43  ;;  %1947 = vst [vmem:[#allocation2] sm:$0xff] %v1915_v49  ;;  %v1916_v52 = vadd.f32 %v3758_v50, %v1339_v46 }
 0x2df   : > { %1964 = vst [vmem:[#allocation2 + $0x88] sm:$0xff] %v1932_v51  ;;  %v3807_v53 = vpop.f32.mrb[4].mxu1  ;;  %1948 = vst [vmem:[#allocation2 + $0x8] sm:$0xff] %v1916_v52  ;;  %v3759_v54 = vpop.f32.mrb[4].mxu0  ;;  %v1362_v51 = vld [vmem:[#allocation2 + $0xc0] sm:$0xff] }
 0x2e0   : > { %v3808_v56 = vpop.f32.mrb[5].mxu1  ;;  %v3760_v58 = vpop.f32.mrb[5].mxu0 }
 0x2e1   : > { %v3809_v59 = vadd.f32 %v3808_v56, %v3807_v53  ;;  %v3810_v60 = vpop.f32.mrb[6].mxu1  ;;  %v3761_v61 = vadd.f32 %v3760_v58, %v3759_v54  ;;  %v3762_v62 = vpop.f32.mrb[6].mxu0  ;;  %v1346_v53 = vld [vmem:[#allocation2 + $0x40] sm:$0xff] }
 0x2e2   : > { %v3811_v0 = vpop.f32.mrb[7].mxu1  ;;  %v3763_v3 = vpop.f32.mrb[7].mxu0 }
 0x2e3   : > { %v1933_v1 = vadd.f32 %v3809_v59, %v1356_v55  ;;  %v3812_v4 = vadd.f32 %v3811_v0, %v3810_v60  ;;  %v1917_v5 = vadd.f32 %v3761_v61, %v1340_v57  ;;  %v3764_v6 = vadd.f32 %v3763_v3, %v3762_v62  ;;  %v1363_v59 = vld [vmem:[#allocation2 + $0xc8] sm:$0xff] }
 0x2e4   : > { %v1347_v62 = vld [vmem:[#allocation2 + $0x48] sm:$0xff] }
 0x2e5   : > { %1965 = vst [vmem:[#allocation2 + $0x90] sm:$0xff] %v1933_v1  ;;  %v1934_v7 = vadd.f32 %v3812_v4, %v1357_v63  ;;  %1949 = vst [vmem:[#allocation2 + $0x10] sm:$0xff] %v1917_v5  ;;  %v1918_v8 = vadd.f32 %v3764_v6, %v1341_v2 }
 0x2e7   : > { %1966 = vst [vmem:[#allocation2 + $0x98] sm:$0xff] %v1934_v7  ;;  %v3813_v9 = vpop.f32.mrb[8].mxu1  ;;  %1950 = vst [vmem:[#allocation2 + $0x18] sm:$0xff] %v1918_v8  ;;  %v3765_v10 = vpop.f32.mrb[8].mxu0  ;;  %v1364_v7 = vld [vmem:[#allocation2 + $0xd0] sm:$0xff] }
 0x2e8   : > { %v3814_v12 = vpop.f32.mrb[9].mxu1  ;;  %v3766_v14 = vpop.f32.mrb[9].mxu0 }
 0x2e9   : > { %v3815_v15 = vadd.f32 %v3814_v12, %v3813_v9  ;;  %v3816_v16 = vpop.f32.mrb[10].mxu1  ;;  %v3767_v17 = vadd.f32 %v3766_v14, %v3765_v10  ;;  %v3768_v18 = vpop.f32.mrb[10].mxu0  ;;  %v1348_v9 = vld [vmem:[#allocation2 + $0x50] sm:$0xff] }
 0x2ea   : > { %v3817_v20 = vpop.f32.mrb[11].mxu1  ;;  %v3769_v23 = vpop.f32.mrb[11].mxu0 }
 0x2eb   : > { %v1935_v21 = vadd.f32 %v3815_v15, %v1358_v11  ;;  %v3818_v24 = vadd.f32 %v3817_v20, %v3816_v16  ;;  %v1919_v25 = vadd.f32 %v3767_v17, %v1342_v13  ;;  %v3770_v26 = vadd.f32 %v3769_v23, %v3768_v18  ;;  %v1365_v15 = vld [vmem:[#allocation2 + $0xd8] sm:$0xff] }
 0x2ec   : > { %v1349_v18 = vld [vmem:[#allocation2 + $0x58] sm:$0xff] }
 0x2ed   : > { %1967 = vst [vmem:[#allocation2 + $0xa0] sm:$0xff] %v1935_v21  ;;  %v1936_v27 = vadd.f32 %v3818_v24, %v1359_v19  ;;  %1951 = vst [vmem:[#allocation2 + $0x20] sm:$0xff] %v1919_v25  ;;  %v1920_v28 = vadd.f32 %v3770_v26, %v1343_v22 }
 0x2ef   : > { %1968 = vst [vmem:[#allocation2 + $0xa8] sm:$0xff] %v1936_v27  ;;  %v3819_v29 = vpop.f32.mrb[12].mxu1  ;;  %1952 = vst [vmem:[#allocation2 + $0x28] sm:$0xff] %v1920_v28  ;;  %v3771_v30 = vpop.f32.mrb[12].mxu0  ;;  %v1366_v27 = vld [vmem:[#allocation2 + $0xe0] sm:$0xff] }
 0x2f0   : > { %v3820_v32 = vpop.f32.mrb[13].mxu1  ;;  %v3772_v34 = vpop.f32.mrb[13].mxu0 }
 0x2f1   : > { %v3821_v35 = vadd.f32 %v3820_v32, %v3819_v29  ;;  %v3822_v36 = vpop.f32.mrb[14].mxu1  ;;  %v3773_v37 = vadd.f32 %v3772_v34, %v3771_v30  ;;  %v3774_v38 = vpop.f32.mrb[14].mxu0  ;;  %v1350_v29 = vld [vmem:[#allocation2 + $0x60] sm:$0xff] }
 0x2f2   : > { %v3823_v40 = vpop.f32.mrb[15].mxu1  ;;  %v3775_v43 = vpop.f32.mrb[15].mxu0 }
 0x2f3   : > { %v1937_v41 = vadd.f32 %v3821_v35, %v1360_v31  ;;  %v3824_v44 = vadd.f32 %v3823_v40, %v3822_v36  ;;  %v1921_v45 = vadd.f32 %v3773_v37, %v1344_v33  ;;  %v3776_v46 = vadd.f32 %v3775_v43, %v3774_v38  ;;  %v1367_v35 = vld [vmem:[#allocation2 + $0xe8] sm:$0xff] }
 0x2f4   : > { %v1351_v38 = vld [vmem:[#allocation2 + $0x68] sm:$0xff] }
 0x2f5   : > { %1969 = vst [vmem:[#allocation2 + $0xb0] sm:$0xff] %v1937_v41  ;;  %v1938_v47 = vadd.f32 %v3824_v44, %v1361_v39  ;;  %1953 = vst [vmem:[#allocation2 + $0x30] sm:$0xff] %v1921_v45  ;;  %v1922_v48 = vadd.f32 %v3776_v46, %v1345_v42 }
 0x2f7   : > { %1970 = vst [vmem:[#allocation2 + $0xb8] sm:$0xff] %v1938_v47  ;;  %v3825_v49 = vpop.f32.mrb[16].mxu1  ;;  %1954 = vst [vmem:[#allocation2 + $0x38] sm:$0xff] %v1922_v48  ;;  %v3777_v50 = vpop.f32.mrb[16].mxu0  ;;  %v1368_v47 = vld [vmem:[#allocation2 + $0xf0] sm:$0xff] }
 0x2f8   : > { %v3826_v52 = vpop.f32.mrb[17].mxu1  ;;  %v3778_v54 = vpop.f32.mrb[17].mxu0 }
 0x2f9   : > { %v3827_v55 = vadd.f32 %v3826_v52, %v3825_v49  ;;  %v3828_v56 = vpop.f32.mrb[18].mxu1  ;;  %v3779_v57 = vadd.f32 %v3778_v54, %v3777_v50  ;;  %v3780_v58 = vpop.f32.mrb[18].mxu0  ;;  %v1352_v49 = vld [vmem:[#allocation2 + $0x70] sm:$0xff] }
 0x2fa   : > { %v3829_v60 = vpop.f32.mrb[19].mxu1  ;;  %v3781_v63 = vpop.f32.mrb[19].mxu0 }
 0x2fb   : > { %v1939_v61 = vadd.f32 %v3827_v55, %v1362_v51  ;;  %v3830_v0 = vadd.f32 %v3829_v60, %v3828_v56  ;;  %v1923_v1 = vadd.f32 %v3779_v57, %v1346_v53  ;;  %v3782_v2 = vadd.f32 %v3781_v63, %v3780_v58  ;;  %v1369_v55 = vld [vmem:[#allocation2 + $0xf8] sm:$0xff] }
 0x2fc   : > { %v1353_v58 = vld [vmem:[#allocation2 + $0x78] sm:$0xff] }
 0x2fd   : > { %1971 = vst [vmem:[#allocation2 + $0xc0] sm:$0xff] %v1939_v61  ;;  %v1940_v3 = vadd.f32 %v3830_v0, %v1363_v59  ;;  %1955 = vst [vmem:[#allocation2 + $0x40] sm:$0xff] %v1923_v1  ;;  %v1924_v4 = vadd.f32 %v3782_v2, %v1347_v62 }
 0x2ff   : > { %1972 = vst [vmem:[#allocation2 + $0xc8] sm:$0xff] %v1940_v3  ;;  %v3831_v5 = vpop.f32.mrb[20].mxu1  ;;  %1956 = vst [vmem:[#allocation2 + $0x48] sm:$0xff] %v1924_v4  ;;  %v3783_v6 = vpop.f32.mrb[20].mxu0 }
 0x300   : > { %v3832_v8 = vpop.f32.mrb[21].mxu1  ;;  %v3784_v10 = vpop.f32.mrb[21].mxu0 }
 0x301   : > { %v3833_v11 = vadd.f32 %v3832_v8, %v3831_v5  ;;  %v3834_v12 = vpop.f32.mrb[22].mxu1  ;;  %v3785_v13 = vadd.f32 %v3784_v10, %v3783_v6  ;;  %v3786_v14 = vpop.f32.mrb[22].mxu0 }
 0x302   : > { %v3835_v16 = vpop.f32.mrb[23].mxu1  ;;  %v3787_v19 = vpop.f32.mrb[23].mxu0 }
 0x303   : > { %v1941_v17 = vadd.f32 %v3833_v11, %v1364_v7  ;;  %v3836_v20 = vadd.f32 %v3835_v16, %v3834_v12  ;;  %v1925_v21 = vadd.f32 %v3785_v13, %v1348_v9  ;;  %v3788_v22 = vadd.f32 %v3787_v19, %v3786_v14 }
 0x305   : > { %1973 = vst [vmem:[#allocation2 + $0xd0] sm:$0xff] %v1941_v17  ;;  %v1942_v23 = vadd.f32 %v3836_v20, %v1365_v15  ;;  %1957 = vst [vmem:[#allocation2 + $0x50] sm:$0xff] %v1925_v21  ;;  %v1926_v24 = vadd.f32 %v3788_v22, %v1349_v18 }
 0x307   : > { %1974 = vst [vmem:[#allocation2 + $0xd8] sm:$0xff] %v1942_v23  ;;  %v3837_v25 = vpop.f32.mrb[24].mxu1  ;;  %1958 = vst [vmem:[#allocation2 + $0x58] sm:$0xff] %v1926_v24  ;;  %v3789_v26 = vpop.f32.mrb[24].mxu0 }
 0x308   : > { %v3838_v28 = vpop.f32.mrb[25].mxu1  ;;  %v3790_v30 = vpop.f32.mrb[25].mxu0 }
 0x309   : > { %v3839_v31 = vadd.f32 %v3838_v28, %v3837_v25  ;;  %v3840_v32 = vpop.f32.mrb[26].mxu1  ;;  %v3791_v33 = vadd.f32 %v3790_v30, %v3789_v26  ;;  %v3792_v34 = vpop.f32.mrb[26].mxu0 }
 0x30a   : > { %v3841_v36 = vpop.f32.mrb[27].mxu1  ;;  %v3793_v39 = vpop.f32.mrb[27].mxu0 }
 0x30b   : > { %v1943_v37 = vadd.f32 %v3839_v31, %v1366_v27  ;;  %v3842_v40 = vadd.f32 %v3841_v36, %v3840_v32  ;;  %v1927_v41 = vadd.f32 %v3791_v33, %v1350_v29  ;;  %v3794_v42 = vadd.f32 %v3793_v39, %v3792_v34 }
 0x30d   : > { %1975 = vst [vmem:[#allocation2 + $0xe0] sm:$0xff] %v1943_v37  ;;  %v1944_v43 = vadd.f32 %v3842_v40, %v1367_v35  ;;  %1959 = vst [vmem:[#allocation2 + $0x60] sm:$0xff] %v1927_v41  ;;  %v1928_v44 = vadd.f32 %v3794_v42, %v1351_v38 }
 0x30f   : > { %1976 = vst [vmem:[#allocation2 + $0xe8] sm:$0xff] %v1944_v43  ;;  %v3843_v45 = vpop.f32.mrb[28].mxu1  ;;  %1960 = vst [vmem:[#allocation2 + $0x68] sm:$0xff] %v1928_v44  ;;  %v3795_v46 = vpop.f32.mrb[28].mxu0 }
 0x310   : > { %v3844_v48 = vpop.f32.mrb[29].mxu1  ;;  %v3796_v50 = vpop.f32.mrb[29].mxu0 }
 0x311   : > { %v3845_v51 = vadd.f32 %v3844_v48, %v3843_v45  ;;  %v3846_v52 = vpop.f32.mrb[30].mxu1  ;;  %v3797_v53 = vadd.f32 %v3796_v50, %v3795_v46  ;;  %v3798_v54 = vpop.f32.mrb[30].mxu0 }
 0x312   : > { %v3847_v56 = vpop.f32.mrb[31].mxu1  ;;  %v3799_v59 = vpop.f32.mrb[31].mxu0 }
 0x313   : > { %v1945_v57 = vadd.f32 %v3845_v51, %v1368_v47  ;;  %v3848_v60 = vadd.f32 %v3847_v56, %v3846_v52  ;;  %v1929_v61 = vadd.f32 %v3797_v53, %v1352_v49  ;;  %v3800_v62 = vadd.f32 %v3799_v59, %v3798_v54 }
 0x315   : > { %1977 = vst [vmem:[#allocation2 + $0xf0] sm:$0xff] %v1945_v57  ;;  %v1946_v63 = vadd.f32 %v3848_v60, %v1369_v55  ;;  %1961 = vst [vmem:[#allocation2 + $0x70] sm:$0xff] %v1929_v61  ;;  %v1930_v0 = vadd.f32 %v3800_v62, %v1353_v58 }
 0x317   : > { %1978 = vst [vmem:[#allocation2 + $0xf8] sm:$0xff] %v1946_v63  ;;  %1962 = vst [vmem:[#allocation2 + $0x78] sm:$0xff] %v1930_v0 }
 0x318 PF: > { %v3492_v1 = vld [vmem:[%s4531_s13] sm:$0xff]   ;;  %v3603_v3 = vld [vmem:[%s4531_s13 + $0x8] sm:$0xff]   ;;  %s5028_s1 = sld [smem:[#allocation10_spill]]  ;;  %v3604_v5 = vld [vmem:[%s4531_s13 + $0x10] sm:$0xff]   ;;  %s5029_s29 = scalar_lea.vmem %s5010_s6, %s4509_s11 }
 0x319   : > { %4050 = vmatprep.subr.bf16.mxu0 %v3492_v1  ;;  %v4268_v2 = vld [vmem:[%s4545_s3] sm:$0xff]   ;;  %v4269_v4 = vld [vmem:[%s4545_s3 + $0x8] sm:$0xff]   ;;  %v4270_v6 = vld [vmem:[%s4545_s3 + $0x10] sm:$0xff]  }
 0x31a   : > { %4052 = vmatpush3.bf16.msra.mxu0 %v3492_v1  ;;  %4001 = vmatprep.subr.bf16.mxu1 %v4268_v2  ;;  %v3605_v7 = vld [vmem:[%s4531_s13 + $0x18] sm:$0xff]   ;;  %v1982_v9 = vld [vmem:[#allocation2] sm:$0xff]  ;;  %v3607_v13 = vld [vmem:[%s4531_s13 + $0x28] sm:$0xff]  }
 0x31b   : > { %4054 = vmatprep.subr.bf16.mxu0 %v3603_v3  ;;  %4002 = vmatpush3.bf16.msra.mxu1 %v4268_v2  ;;  %v4271_v8 = vld [vmem:[%s4545_s3 + $0x18] sm:$0xff]   ;;  %v3606_v10 = vld [vmem:[%s4531_s13 + $0x20] sm:$0xff]   ;;  %v4273_v14 = vld [vmem:[%s4545_s3 + $0x28] sm:$0xff]  }
 0x31c   : > { %4003 = vmatprep.subr.bf16.mxu1 %v4269_v4  ;;  %3953 = vmatprep.mubr.f32.mxu0 %v1982_v9  ;;  %v4272_v12 = vld [vmem:[%s4545_s3 + $0x20] sm:$0xff]   ;;  %v3608_v15 = vld [vmem:[%s4531_s13 + $0x30] sm:$0xff]   ;;  %v3609_v17 = vld [vmem:[%s4531_s13 + $0x38] sm:$0xff]  }
 0x31d   : > { %v4274_v16 = vld [vmem:[%s4545_s3 + $0x30] sm:$0xff]   ;;  %v4275_v18 = vld [vmem:[%s4545_s3 + $0x38] sm:$0xff]   ;;  %v1983_v19 = vld [vmem:[#allocation2 + $0x8] sm:$0xff] }
 0x31e   : > { %4056 = vmatpush3.bf16.msra.mxu0 %v3603_v3  ;;  %v4276_v11 = vld [vmem:[%s5028_s1] sm:$0xff]   ;;  %v4277_v20 = vld [vmem:[%s5028_s1 + $0x8] sm:$0xff]   ;;  %v1984_v21 = vld [vmem:[#allocation2 + $0x10] sm:$0xff] }
 0x31f   : > { %4058 = vmatprep.subr.bf16.mxu0 %v3604_v5  ;;  %4004 = vmatpush3.bf16.msra.mxu1 %v4269_v4  ;;  %v4278_v22 = vld [vmem:[%s5028_s1 + $0x10] sm:$0xff]   ;;  %v1985_v23 = vld [vmem:[#allocation2 + $0x18] sm:$0xff]  ;;  %v1986_v24 = vld [vmem:[#allocation2 + $0x20] sm:$0xff] }
 0x320   : > { %4005 = vmatprep.subr.bf16.mxu1 %v4270_v6  ;;  %4017 = vmatprep.mubr.bf16.mxu1 %v4276_v11  ;;  %v1987_v25 = vld [vmem:[#allocation2 + $0x28] sm:$0xff]  ;;  %v4279_v26 = vld [vmem:[%s5028_s1 + $0x18] sm:$0xff]   ;;  %v1988_v27 = vld [vmem:[#allocation2 + $0x30] sm:$0xff] }
 0x321   : > { %v4280_v28 = vld [vmem:[%s5028_s1 + $0x20] sm:$0xff]   ;;  %v1989_v29 = vld [vmem:[#allocation2 + $0x38] sm:$0xff]  ;;  %v1991_v31 = vld [vmem:[#allocation2 + $0x48] sm:$0xff] }
 0x322   : > { %4060 = vmatpush3.bf16.msra.mxu0 %v3604_v5  ;;  %v1990_v30 = vld [vmem:[#allocation2 + $0x40] sm:$0xff]  ;;  %v4281_v32 = vld [vmem:[%s5028_s1 + $0x28] sm:$0xff]   ;;  %v1992_v33 = vld [vmem:[#allocation2 + $0x50] sm:$0xff] }
 0x323   : > { %4062 = vmatprep.subr.bf16.mxu0 %v3605_v7  ;;  %4006 = vmatpush3.bf16.msra.mxu1 %v4270_v6  ;;  %v4282_v34 = vld [vmem:[%s5028_s1 + $0x30] sm:$0xff]   ;;  %v1993_v35 = vld [vmem:[#allocation2 + $0x58] sm:$0xff]  ;;  %v1994_v36 = vld [vmem:[#allocation2 + $0x60] sm:$0xff] }
 0x324   : > { %4007 = vmatprep.subr.bf16.mxu1 %v4271_v8  ;;  %v1995_v37 = vld [vmem:[#allocation2 + $0x68] sm:$0xff]  ;;  %v4283_v38 = vld [vmem:[%s5028_s1 + $0x38] sm:$0xff]   ;;  %v1996_v39 = vld [vmem:[#allocation2 + $0x70] sm:$0xff] }
 0x325   : > { %v4284_v40 = vld [vmem:[%s5028_s1 + $0x40] sm:$0xff]   ;;  %v1997_v41 = vld [vmem:[#allocation2 + $0x78] sm:$0xff]  ;;  %v1999_v43 = vld [vmem:[#allocation2 + $0x88] sm:$0xff] }
 0x326   : > { %4064 = vmatpush3.bf16.msra.mxu0 %v3605_v7  ;;  %v1998_v42 = vld [vmem:[#allocation2 + $0x80] sm:$0xff]  ;;  %v4285_v44 = vld [vmem:[%s5028_s1 + $0x48] sm:$0xff]   ;;  %v2000_v45 = vld [vmem:[#allocation2 + $0x90] sm:$0xff] }
 0x327   : > { %4066 = vmatprep.subr.bf16.mxu0 %v3606_v10  ;;  %4008 = vmatpush3.bf16.msra.mxu1 %v4271_v8  ;;  %v4286_v46 = vld [vmem:[%s5028_s1 + $0x50] sm:$0xff]   ;;  %v2001_v47 = vld [vmem:[#allocation2 + $0x98] sm:$0xff]  ;;  %v2002_v48 = vld [vmem:[#allocation2 + $0xa0] sm:$0xff] }
 0x328   : > { %4009 = vmatprep.subr.bf16.mxu1 %v4272_v12  ;;  %v2003_v49 = vld [vmem:[#allocation2 + $0xa8] sm:$0xff]  ;;  %v4287_v50 = vld [vmem:[%s5028_s1 + $0x58] sm:$0xff]   ;;  %v2004_v51 = vld [vmem:[#allocation2 + $0xb0] sm:$0xff] }
 0x329   : > { %v4288_v52 = vld [vmem:[%s5028_s1 + $0x60] sm:$0xff]   ;;  %v2005_v53 = vld [vmem:[#allocation2 + $0xb8] sm:$0xff]  ;;  %v2007_v55 = vld [vmem:[#allocation2 + $0xc8] sm:$0xff] }
 0x32a   : > { %4068 = vmatpush3.bf16.msra.mxu0 %v3606_v10  ;;  %v2006_v54 = vld [vmem:[#allocation2 + $0xc0] sm:$0xff]  ;;  %v4289_v56 = vld [vmem:[%s5028_s1 + $0x68] sm:$0xff]   ;;  %v2008_v57 = vld [vmem:[#allocation2 + $0xd0] sm:$0xff] }
 0x32b   : > { %4070 = vmatprep.subr.bf16.mxu0 %v3607_v13  ;;  %4010 = vmatpush3.bf16.msra.mxu1 %v4272_v12  ;;  %v4290_v58 = vld [vmem:[%s5028_s1 + $0x70] sm:$0xff]   ;;  %v2009_v59 = vld [vmem:[#allocation2 + $0xd8] sm:$0xff]  ;;  %v2010_v60 = vld [vmem:[#allocation2 + $0xe0] sm:$0xff] }
 0x32c   : > { %4011 = vmatprep.subr.bf16.mxu1 %v4273_v14  ;;  %v2011_v61 = vld [vmem:[#allocation2 + $0xe8] sm:$0xff]  ;;  %v4291_v62 = vld [vmem:[%s5028_s1 + $0x78] sm:$0xff]   ;;  %v2012_v63 = vld [vmem:[#allocation2 + $0xf0] sm:$0xff] }
 0x32d   : > { %v2013_v0 = vld [vmem:[#allocation2 + $0xf8] sm:$0xff]  ;;  %v4708_v1 = vld [vmem:[%s5029_s29] ss:$0 sm:$0xff] }
 0x32e   : > { %4072 = vmatpush3.bf16.msra.mxu0 %v3607_v13 }
 0x32f   : > { %4074 = vmatprep.subr.bf16.mxu0 %v3608_v15  ;;  %4012 = vmatpush3.bf16.msra.mxu1 %v4273_v14 }
 0x330   : > { %4013 = vmatprep.subr.bf16.mxu1 %v4274_v16 }
 0x332   : > { %4076 = vmatpush3.bf16.msra.mxu0 %v3608_v15 }
 0x333   : > { %4078 = vmatprep.subr.bf16.mxu0 %v3609_v17  ;;  %4014 = vmatpush3.bf16.msra.mxu1 %v4274_v16 }
 0x334   : > { %4015 = vmatprep.subr.bf16.mxu1 %v4275_v18 }
 0x336   : > { %4080 = vmatpush3.bf16.msra.mxu0 %v3609_v17 }
 0x337   : > { %4016 = vmatpush3.bf16.msra.mxu1 %v4275_v18 }
 0x339   : > { %3954 = vmatmul.mubr.f32.vlgmr.msra.gmra.mrb[0].mxu0 %v1983_v19 }
 0x33a   : > { %3956 = vmatprep.mubr.f32.mxu0 %v1984_v21  ;;  %4018 = vmatmul.mubr.bf16.vlgmr.msra.gmra.mrb[0].mxu1 %v4277_v20 }
 0x33b   : > { %4021 = vmatprep.mubr.bf16.mxu1 %v4278_v22 }
 0x33d   : > { %3957 = vmatmul.mubr.f32.gmra.mrb[2].mxu0 %v1985_v23 }
 0x33e   : > { %3959 = vmatprep.mubr.f32.mxu0 %v1986_v24 }
 0x341   : > { %3960 = vmatmul.mubr.f32.gmra.mrb[4].mxu0 %v1987_v25 }
 0x342   : > { %3962 = vmatprep.mubr.f32.mxu0 %v1988_v27  ;;  %4022 = vmatmul.mubr.bf16.gmra.mrb[4].mxu1 %v4279_v26 }
 0x343   : > { %4025 = vmatprep.mubr.bf16.mxu1 %v4280_v28 }
 0x345   : > { %3963 = vmatmul.mubr.f32.gmra.mrb[6].mxu0 %v1989_v29 }
 0x346   : > { %3965 = vmatprep.mubr.f32.mxu0 %v1990_v30 }
 0x349   : > { %3966 = vmatmul.mubr.f32.gmra.mrb[8].mxu0 %v1991_v31 }
 0x34a   : > { %3968 = vmatprep.mubr.f32.mxu0 %v1992_v33  ;;  %4026 = vmatmul.mubr.bf16.gmra.mrb[8].mxu1 %v4281_v32 }
 0x34b   : > { %4029 = vmatprep.mubr.bf16.mxu1 %v4282_v34 }
 0x34d   : > { %3969 = vmatmul.mubr.f32.gmra.mrb[10].mxu0 %v1993_v35 }
 0x34e   : > { %3971 = vmatprep.mubr.f32.mxu0 %v1994_v36 }
 0x351   : > { %3972 = vmatmul.mubr.f32.gmra.mrb[12].mxu0 %v1995_v37 }
 0x352   : > { %3974 = vmatprep.mubr.f32.mxu0 %v1996_v39  ;;  %4030 = vmatmul.mubr.bf16.gmra.mrb[12].mxu1 %v4283_v38 }
 0x353   : > { %4033 = vmatprep.mubr.bf16.mxu1 %v4284_v40 }
 0x355   : > { %3975 = vmatmul.mubr.f32.gmra.mrb[14].mxu0 %v1997_v41 }
 0x356   : > { %3977 = vmatprep.mubr.f32.mxu0 %v1998_v42 }
 0x359   : > { %3978 = vmatmul.mubr.f32.gmra.mrb[16].mxu0 %v1999_v43 }
 0x35a   : > { %3980 = vmatprep.mubr.f32.mxu0 %v2000_v45  ;;  %4034 = vmatmul.mubr.bf16.gmra.mrb[16].mxu1 %v4285_v44 }
 0x35b   : > { %4037 = vmatprep.mubr.bf16.mxu1 %v4286_v46 }
 0x35d   : > { %3981 = vmatmul.mubr.f32.gmra.mrb[18].mxu0 %v2001_v47 }
 0x35e   : > { %3983 = vmatprep.mubr.f32.mxu0 %v2002_v48 }
 0x361   : > { %3984 = vmatmul.mubr.f32.gmra.mrb[20].mxu0 %v2003_v49 }
 0x362   : > { %3986 = vmatprep.mubr.f32.mxu0 %v2004_v51  ;;  %4038 = vmatmul.mubr.bf16.gmra.mrb[20].mxu1 %v4287_v50 }
 0x363   : > { %4041 = vmatprep.mubr.bf16.mxu1 %v4288_v52 }
 0x365   : > { %3987 = vmatmul.mubr.f32.gmra.mrb[22].mxu0 %v2005_v53 }
 0x366   : > { %3989 = vmatprep.mubr.f32.mxu0 %v2006_v54 }
 0x369   : > { %3990 = vmatmul.mubr.f32.gmra.mrb[24].mxu0 %v2007_v55 }
 0x36a   : > { %3992 = vmatprep.mubr.f32.mxu0 %v2008_v57  ;;  %4042 = vmatmul.mubr.bf16.gmra.mrb[24].mxu1 %v4289_v56 }
 0x36b   : > { %4045 = vmatprep.mubr.bf16.mxu1 %v4290_v58 }
 0x36d   : > { %3993 = vmatmul.mubr.f32.gmra.mrb[26].mxu0 %v2009_v59 }
 0x36e   : > { %3995 = vmatprep.mubr.f32.mxu0 %v2010_v60 }
 0x371   : > { %3996 = vmatmul.mubr.f32.gmra.mrb[28].mxu0 %v2011_v61 }
 0x372   : > { %3998 = vmatprep.mubr.f32.mxu0 %v2012_v63  ;;  %4046 = vmatmul.mubr.bf16.gmra.mrb[28].mxu1 %v4291_v62 }
 0x375   : > { %3999 = vmatmul.mubr.f32.gmra.mrb[30].mxu0 %v2013_v0 }
 0x40c   : > { %v3955_v2 = vpop.f32.mrb[0].mxu0 }
 0x40d   : > { %v2119_v3 = vpop.f32.mrb[1].mxu0  ;;  %v4019_v5 = vpop.f32.mrb[0].mxu1  ;;  %v2125_v7 = vadd.f32 %v3955_v2, %v4708_v1 }
 0x40e   : > { %v2120_v4 = vadd.f32 %v4708_v1, %v2119_v3  ;;  %v2504_v6 = vpop.f32.mrb[1].mxu1 }
 0x40f   : > { %v4020_v10 = vpop.f32.mrb[2].mxu1 }
 0x410   : > { %v4712_v8 = vadd.f32 %v2504_v6, %v2120_v4  ;;  %v3958_v9 = vpop.f32.mrb[2].mxu0  ;;  %v2507_v13 = vpop.f32.mrb[3].mxu1 }
 0x411   : > { %v2135_v11 = vadd.f32 %v3958_v9, %v4708_v1  ;;  %v2129_v12 = vpop.f32.mrb[3].mxu0  ;;  %v4716_v15 = vadd.f32 %v2507_v13, %v2125_v7 }
 0x412   : > { %v2130_v14 = vadd.f32 %v4708_v1, %v2129_v12  ;;  %v2663_v16 = vmul.f32 %v4712_v8, %v4712_v8 }
 0x413   : > { %v4720_v17 = vadd.f32 %v4020_v10, %v2135_v11  ;;  %v2664_v25 = vmul.f32 %v4716_v15, %v4716_v15 }
 0x414   : > { %v4722_v18 = vadd.f32 %v4019_v5, %v2130_v14  ;;  %v3961_v19 = vpop.f32.mrb[4].mxu0  ;;  %2695 = vadd.xlane.f32.xlu0 %v2663_v16 }
 0x415   : > { %v2139_v20 = vpop.f32.mrb[5].mxu0  ;;  %v2666_v21 = vmul.f32 %v4720_v17, %v4720_v17  ;;  %v2145_v22 = vadd.f32 %v3961_v19, %v4708_v1  ;;  %v4023_v24 = vpop.f32.mrb[4].mxu1 }
 0x416   : > { %v2140_v23 = vadd.f32 %v4708_v1, %v2139_v20  ;;  %v2520_v26 = vpop.f32.mrb[5].mxu1  ;;  %v2665_v33 = vmul.f32 %v4722_v18, %v4722_v18 }
 0x417   : > { %2701 = vadd.xlane.f32.xlu1 %v2666_v21  ;;  %v4024_v29 = vpop.f32.mrb[6].mxu1 }
 0x418   : > { %v4730_v27 = vadd.f32 %v2520_v26, %v2140_v23  ;;  %v3964_v28 = vpop.f32.mrb[6].mxu0  ;;  %2697 = vadd.xlane.f32.xlu0 %v2664_v25  ;;  %v2523_v32 = vpop.f32.mrb[7].mxu1 }
 0x419   : > { %v2155_v30 = vadd.f32 %v3964_v28, %v4708_v1  ;;  %v2149_v31 = vpop.f32.mrb[7].mxu0  ;;  %v4736_v35 = vadd.f32 %v2523_v32, %v2145_v22 }
 0x41a   : > { %v2150_v34 = vadd.f32 %v4708_v1, %v2149_v31  ;;  %v2667_v36 = vmul.f32 %v4730_v27, %v4730_v27 }
 0x41b   : > { %v4740_v37 = vadd.f32 %v4024_v29, %v2155_v30  ;;  %2699 = vadd.xlane.f32.xlu1 %v2665_v33  ;;  %v2668_v41 = vmul.f32 %v4736_v35, %v4736_v35 }
 0x41c   : > { %v4742_v38 = vadd.f32 %v4023_v24, %v2150_v34  ;;  %v3967_v39 = vpop.f32.mrb[8].mxu0  ;;  %2703 = vadd.xlane.f32.xlu0 %v2667_v36 }
 0x41d   : > { %v2159_v40 = vpop.f32.mrb[9].mxu0  ;;  %v2165_v42 = vadd.f32 %v3967_v39, %v4708_v1  ;;  %v4027_v44 = vpop.f32.mrb[8].mxu1  ;;  %v2670_v53 = vmul.f32 %v4740_v37, %v4740_v37 }
 0x41e   : > { %v2160_v43 = vadd.f32 %v4708_v1, %v2159_v40  ;;  %v2669_v45 = vmul.f32 %v4742_v38, %v4742_v38  ;;  %v2536_v46 = vpop.f32.mrb[9].mxu1 }
 0x41f   : > { %2705 = vadd.xlane.f32.xlu1 %v2668_v41  ;;  %v4028_v49 = vpop.f32.mrb[10].mxu1 }
 0x420   : > { %v4750_v47 = vadd.f32 %v2536_v46, %v2160_v43  ;;  %v3970_v48 = vpop.f32.mrb[10].mxu0  ;;  %2707 = vadd.xlane.f32.xlu0 %v2669_v45  ;;  %v2539_v52 = vpop.f32.mrb[11].mxu1 }
 0x421   : > { %v2175_v50 = vadd.f32 %v3970_v48, %v4708_v1  ;;  %v2169_v51 = vpop.f32.mrb[11].mxu0  ;;  %v4756_v55 = vadd.f32 %v2539_v52, %v2165_v42 }
 0x422   : > { %v2170_v54 = vadd.f32 %v4708_v1, %v2169_v51  ;;  %v2671_v56 = vmul.f32 %v4750_v47, %v4750_v47 }
 0x423   : > { %v4760_v57 = vadd.f32 %v4028_v49, %v2175_v50  ;;  %2709 = vadd.xlane.f32.xlu1 %v2670_v53  ;;  %v2672_v61 = vmul.f32 %v4756_v55, %v4756_v55 }
 0x424   : > { %v4762_v58 = vadd.f32 %v4027_v44, %v2170_v54  ;;  %v3973_v59 = vpop.f32.mrb[12].mxu0  ;;  %2711 = vadd.xlane.f32.xlu0 %v2671_v56 }
 0x425   : > { %v2179_v60 = vpop.f32.mrb[13].mxu0  ;;  %v2185_v62 = vadd.f32 %v3973_v59, %v4708_v1  ;;  %v4031_v0 = vpop.f32.mrb[12].mxu1  ;;  %v2674_v11 = vmul.f32 %v4760_v57, %v4760_v57 }
 0x426   : > { %v2180_v63 = vadd.f32 %v4708_v1, %v2179_v60  ;;  %v2673_v2 = vmul.f32 %v4762_v58, %v4762_v58  ;;  %v2552_v3 = vpop.f32.mrb[13].mxu1 }
 0x427   : > { %2713 = vadd.xlane.f32.xlu1 %v2672_v61  ;;  %v4032_v6 = vpop.f32.mrb[14].mxu1 }
 0x428   : > { %v4770_v4 = vadd.f32 %v2552_v3, %v2180_v63  ;;  %v3976_v5 = vpop.f32.mrb[14].mxu0  ;;  %2715 = vadd.xlane.f32.xlu0 %v2673_v2  ;;  %v2555_v10 = vpop.f32.mrb[15].mxu1 }
 0x429   : > { %v2195_v7 = vadd.f32 %v3976_v5, %v4708_v1  ;;  %v2189_v9 = vpop.f32.mrb[15].mxu0  ;;  %v4776_v13 = vadd.f32 %v2555_v10, %v2185_v62 }
 0x42a   : > { %v2190_v12 = vadd.f32 %v4708_v1, %v2189_v9  ;;  %v2675_v14 = vmul.f32 %v4770_v4, %v4770_v4 }
 0x42b   : > { %v4780_v16 = vadd.f32 %v4032_v6, %v2195_v7  ;;  %2717 = vadd.xlane.f32.xlu1 %v2674_v11  ;;  %v2676_v22 = vmul.f32 %v4776_v13, %v4776_v13 }
 0x42c   : > { %v4782_v19 = vadd.f32 %v4031_v0, %v2190_v12  ;;  %v3979_v20 = vpop.f32.mrb[16].mxu0  ;;  %2719 = vadd.xlane.f32.xlu0 %v2675_v14 }
 0x42d   : > { %v2199_v21 = vpop.f32.mrb[17].mxu0  ;;  %v2205_v23 = vadd.f32 %v3979_v20, %v4708_v1  ;;  %v4035_v25 = vpop.f32.mrb[16].mxu1  ;;  %v2678_v36 = vmul.f32 %v4780_v16, %v4780_v16 }
 0x42e   : > { %v2200_v24 = vadd.f32 %v4708_v1, %v2199_v21  ;;  %v2677_v26 = vmul.f32 %v4782_v19, %v4782_v19  ;;  %v2568_v28 = vpop.f32.mrb[17].mxu1 }
 0x42f   : > { %2721 = vadd.xlane.f32.xlu1 %v2676_v22  ;;  %v4036_v31 = vpop.f32.mrb[18].mxu1 }
 0x430   : > { %v4790_v29 = vadd.f32 %v2568_v28, %v2200_v24  ;;  %v3982_v30 = vpop.f32.mrb[18].mxu0  ;;  %2723 = vadd.xlane.f32.xlu0 %v2677_v26  ;;  %v2571_v34 = vpop.f32.mrb[19].mxu1 }
 0x431   : > { %v2215_v32 = vadd.f32 %v3982_v30, %v4708_v1  ;;  %v2209_v33 = vpop.f32.mrb[19].mxu0  ;;  %v4796_v40 = vadd.f32 %v2571_v34, %v2205_v23 }
 0x432   : > { %v2210_v39 = vadd.f32 %v4708_v1, %v2209_v33  ;;  %v2679_v41 = vmul.f32 %v4790_v29, %v4790_v29 }
 0x433   : > { %v4800_v42 = vadd.f32 %v4036_v31, %v2215_v32  ;;  %2725 = vadd.xlane.f32.xlu1 %v2678_v36  ;;  %v2680_v46 = vmul.f32 %v4796_v40, %v4796_v40 }
 0x434   : > { %v4802_v43 = vadd.f32 %v4035_v25, %v2210_v39  ;;  %v3985_v44 = vpop.f32.mrb[20].mxu0  ;;  %2727 = vadd.xlane.f32.xlu0 %v2679_v41 }
 0x435   : > { %v2219_v45 = vpop.f32.mrb[21].mxu0  ;;  %v2225_v48 = vadd.f32 %v3985_v44, %v4708_v1  ;;  %v4039_v50 = vpop.f32.mrb[20].mxu1  ;;  %v2682_v62 = vmul.f32 %v4800_v42, %v4800_v42 }
 0x436   : > { %v2220_v49 = vadd.f32 %v4708_v1, %v2219_v45  ;;  %v2681_v51 = vmul.f32 %v4802_v43, %v4802_v43  ;;  %v2584_v52 = vpop.f32.mrb[21].mxu1 }
 0x437   : > { %2729 = vadd.xlane.f32.xlu1 %v2680_v46  ;;  %v4040_v56 = vpop.f32.mrb[22].mxu1 }
 0x438   : > { %v4810_v53 = vadd.f32 %v2584_v52, %v2220_v49  ;;  %v3988_v54 = vpop.f32.mrb[22].mxu0  ;;  %2731 = vadd.xlane.f32.xlu0 %v2681_v51  ;;  %v2587_v61 = vpop.f32.mrb[23].mxu1 }
 0x439   : > { %v2235_v59 = vadd.f32 %v3988_v54, %v4708_v1  ;;  %v2229_v60 = vpop.f32.mrb[23].mxu0  ;;  %v4816_v0 = vadd.f32 %v2587_v61, %v2225_v48 }
 0x43a   : > { %v2230_v63 = vadd.f32 %v4708_v1, %v2229_v60  ;;  %v2683_v2 = vmul.f32 %v4810_v53, %v4810_v53 }
 0x43b   : > { %v4820_v3 = vadd.f32 %v4040_v56, %v2235_v59  ;;  %2733 = vadd.xlane.f32.xlu1 %v2682_v62  ;;  %v2684_v9 = vmul.f32 %v4816_v0, %v4816_v0 }
 0x43c   : > { %v4822_v5 = vadd.f32 %v4039_v50, %v2230_v63  ;;  %v3991_v6 = vpop.f32.mrb[24].mxu0  ;;  %2735 = vadd.xlane.f32.xlu0 %v2683_v2 }
 0x43d   : > { %v2239_v7 = vpop.f32.mrb[25].mxu0  ;;  %v2245_v10 = vadd.f32 %v3991_v6, %v4708_v1  ;;  %v4043_v12 = vpop.f32.mrb[24].mxu1  ;;  %v2686_v28 = vmul.f32 %v4820_v3, %v4820_v3 }
 0x43e   : > { %v2240_v11 = vadd.f32 %v4708_v1, %v2239_v7  ;;  %v2685_v14 = vmul.f32 %v4822_v5, %v4822_v5  ;;  %v2600_v20 = vpop.f32.mrb[25].mxu1 }
 0x43f   : > { %2737 = vadd.xlane.f32.xlu1 %v2684_v9  ;;  %v4044_v23 = vpop.f32.mrb[26].mxu1 }
 0x440   : > { %v4830_v21 = vadd.f32 %v2600_v20, %v2240_v11  ;;  %v3994_v22 = vpop.f32.mrb[26].mxu0  ;;  %2739 = vadd.xlane.f32.xlu0 %v2685_v14  ;;  %v2603_v26 = vpop.f32.mrb[27].mxu1 }
 0x441   : > { %v2255_v24 = vadd.f32 %v3994_v22, %v4708_v1  ;;  %v2249_v25 = vpop.f32.mrb[27].mxu0  ;;  %v4836_v31 = vadd.f32 %v2603_v26, %v2245_v10 }
 0x442   : > { %v2250_v30 = vadd.f32 %v4708_v1, %v2249_v25  ;;  %v2687_v32 = vmul.f32 %v4830_v21, %v4830_v21 }
 0x443   : > { %v4840_v33 = vadd.f32 %v4044_v23, %v2255_v24  ;;  %2741 = vadd.xlane.f32.xlu1 %v2686_v28  ;;  %v2688_v41 = vmul.f32 %v4836_v31, %v4836_v31 }
 0x444   : > { %v4842_v34 = vadd.f32 %v4043_v12, %v2250_v30  ;;  %v3997_v36 = vpop.f32.mrb[28].mxu0  ;;  %2743 = vadd.xlane.f32.xlu0 %v2687_v32 }
 0x445   : > { %v2259_v39 = vpop.f32.mrb[29].mxu0  ;;  %v2265_v44 = vadd.f32 %v3997_v36, %v4708_v1  ;;  %v4047_v46 = vpop.f32.mrb[28].mxu1  ;;  %v2690_v60 = vmul.f32 %v4840_v33, %v4840_v33 }
 0x446   : > { %v2260_v45 = vadd.f32 %v4708_v1, %v2259_v39  ;;  %v2689_v48 = vmul.f32 %v4842_v34, %v4842_v34  ;;  %v2616_v49 = vpop.f32.mrb[29].mxu1 }
 0x447   : > { %2745 = vadd.xlane.f32.xlu1 %v2688_v41  ;;  %v4048_v52 = vpop.f32.mrb[30].mxu1 }
 0x448   : > { %v4850_v50 = vadd.f32 %v2616_v49, %v2260_v45  ;;  %v4000_v51 = vpop.f32.mrb[30].mxu0  ;;  %2747 = vadd.xlane.f32.xlu0 %v2689_v48  ;;  %v2619_v59 = vpop.f32.mrb[31].mxu1 }
 0x449   : > { %v2275_v54 = vadd.f32 %v4000_v51, %v4708_v1  ;;  %v2269_v56 = vpop.f32.mrb[31].mxu0  ;;  %v4856_v62 = vadd.f32 %v2619_v59, %v2265_v44  ;;  %v4876_v44 = vld [vmem:[%s691_s27] ss:$0 sm:$0xff] }
 0x44a   : > { %v2270_v61 = vadd.f32 %v4708_v1, %v2269_v56  ;;  %v2691_v63 = vmul.f32 %v4850_v50, %v4850_v50  ;;  %v4886_v59 = vld [vmem:[%s694_s22] ss:$0 sm:$0xff] }
 0x44b   : > { %v4860_v2 = vadd.f32 %v4048_v52, %v2275_v54  ;;  %2749 = vadd.xlane.f32.xlu1 %v2690_v60  ;;  %v2692_v7 = vmul.f32 %v4856_v62, %v4856_v62 }
 0x44c   : > { %v4862_v6 = vadd.f32 %v4047_v46, %v2270_v61  ;;  %2751 = vadd.xlane.f32.xlu0 %v2691_v63 }
 0x44d   : > { %v2694_v1 = vmul.f32 %v4860_v2, %v4860_v2 }
 0x44e   : > { %v2693_v9 = vmul.f32 %v4862_v6, %v4862_v6 }
 0x44f   : > { %2753 = vadd.xlane.f32.xlu1 %v2692_v7 }
 0x450   : > { %2755 = vadd.xlane.f32.xlu0 %v2693_v9 }
 0x453   : > { %2757 = vadd.xlane.f32.xlu1 %v2694_v1 }
 0x4a1   : > { %v2696_v10 = vpop.xlane.xlu0 %2695 }
 0x4a2   : > { %v2759_v11 = vmax.f32 %v2696_v10, 1e-24 }
 0x4a4   : > { %4292 = vrsqrt.f32 %v2759_v11  ;;  %v2702_v12 = vpop.xlane.xlu1 %2701 }
 0x4a5   : > { %v2762_v14 = vmax.f32 %v2702_v12, 1e-24  ;;  %v2698_v20 = vpop.xlane.xlu0 %2697 }
 0x4a6   : > { %v2760_v22 = vmax.f32 %v2698_v20, 1e-24 }
 0x4a7   : > { %4294 = vrsqrt.f32 %v2762_v14 }
 0x4a8   : > { %4296 = vrsqrt.f32 %v2760_v22  ;;  %v2700_v23 = vpop.xlane.xlu1 %2699 }
 0x4a9   : > { %v2761_v24 = vmax.f32 %v2700_v23, 1e-24  ;;  %v2704_v25 = vpop.xlane.xlu0 %2703 }
 0x4aa   : > { %v2763_v26 = vmax.f32 %v2704_v25, 1e-24 }
 0x4ab   : > { %4298 = vrsqrt.f32 %v2761_v24 }
 0x4ac   : > { %4300 = vrsqrt.f32 %v2763_v26  ;;  %v2706_v28 = vpop.xlane.xlu1 %2705 }
 0x4ad   : > { %v2764_v30 = vmax.f32 %v2706_v28, 1e-24  ;;  %v2708_v32 = vpop.xlane.xlu0 %2707 }
 0x4ae   : > { %v4293_v36 = vpop.eup %4292  ;;  %v2765_v39 = vmax.f32 %v2708_v32, 1e-24 }
 0x4af   : > { %v2823_v41 = vmul.f32 %v4293_v36, %v4712_v8  ;;  %4302 = vrsqrt.f32 %v2764_v30 }
 0x4b0   : > { %4304 = vrsqrt.f32 %v2765_v39  ;;  %v2710_v45 = vpop.xlane.xlu1 %2709 }
 0x4b1   : > { %v4295_v46 = vpop.eup %4294  ;;  %v2766_v48 = vmax.f32 %v2710_v45, 1e-24  ;;  %v2712_v49 = vpop.xlane.xlu0 %2711  ;;  %v2862_v56 = vmul.f32 %v4876_v44, %v2823_v41 }
 0x4b2   : > { %v4297_v51 = vpop.eup %4296  ;;  %v2826_v52 = vmul.f32 %v4295_v46, %v4720_v17  ;;  %v2767_v54 = vmax.f32 %v2712_v49, 1e-24 }
 0x4b3   : > { %v2824_v8 = vmul.f32 %v4297_v51, %v4716_v15  ;;  %4306 = vrsqrt.f32 %v2766_v48  ;;  %v2901_v11 = vadd.f32 %v4886_v59, %v2862_v56 }
 0x4b4   : > { %4308 = vrsqrt.f32 %v2767_v54  ;;  %v2714_v60 = vpop.xlane.xlu1 %2713  ;;  %v2865_v1 = vmul.f32 %v4876_v44, %v2826_v52 }
 0x4b5   : > { %v4299_v61 = vpop.eup %4298  ;;  %v2863_v63 = vmul.f32 %v4876_v44, %v2824_v8  ;;  %v2768_v7 = vmax.f32 %v2714_v60, 1e-24  ;;  %v2716_v9 = vpop.xlane.xlu0 %2715 }
 0x4b6   : > { %v4301_v17 = vpop.eup %4300  ;;  %v2825_v10 = vmul.f32 %v4299_v61, %v4722_v18  ;;  %v2769_v15 = vmax.f32 %v2716_v9, 1e-24  ;;  %v2904_v30 = vadd.f32 %v4886_v59, %v2865_v1 }
 0x4b7   : > { %v2902_v12 = vadd.f32 %v4886_v59, %v2863_v63  ;;  %v2827_v14 = vmul.f32 %v4301_v17, %v4730_v27  ;;  %4310 = vrsqrt.f32 %v2768_v7 }
 0x4b8   : > { %v2864_v20 = vmul.f32 %v4876_v44, %v2825_v10  ;;  %4312 = vrsqrt.f32 %v2769_v15  ;;  %v2718_v22 = vpop.xlane.xlu1 %2717 }
 0x4b9   : > { %v4303_v23 = vpop.eup %4302  ;;  %v3526_v24 = vpack.c.bf16 %v2902_v12, %v2901_v11  ;;  %v2866_v25 = vmul.f32 %v4876_v44, %v2827_v14  ;;  %v2770_v26 = vmax.f32 %v2718_v22, 1e-24  ;;  %v2720_v28 = vpop.xlane.xlu0 %2719 }
 0x4ba   : > { %v4305_v18 = vpop.eup %4304  ;;  %v2903_v32 = vadd.f32 %v4886_v59, %v2864_v20  ;;  %v2828_v36 = vmul.f32 %v4303_v23, %v4736_v35  ;;  %v2771_v27 = vmax.f32 %v2720_v28, 1e-24 }
 0x4bb   : > { %3527 = vst [vmem:[%s4560_s15] sm:$0xff] %v3526_v24   ;;  %v2829_v39 = vmul.f32 %v4305_v18, %v4742_v38  ;;  %4314 = vrsqrt.f32 %v2770_v26  ;;  %v2905_v49 = vadd.f32 %v4886_v59, %v2866_v25 }
 0x4bc   : > { %v3531_v41 = vpack.c.bf16 %v2904_v30, %v2903_v32  ;;  %v2867_v45 = vmul.f32 %v4876_v44, %v2828_v36  ;;  %4316 = vrsqrt.f32 %v2771_v27  ;;  %v2722_v46 = vpop.xlane.xlu1 %2721 }
 0x4bd   : > { %v4307_v48 = vpop.eup %4306  ;;  %v2772_v51 = vmax.f32 %v2722_v46, 1e-24  ;;  %v2724_v52 = vpop.xlane.xlu0 %2723  ;;  %v2868_v56 = vmul.f32 %v4876_v44, %v2829_v39 }
 0x4be   : > { %v4309_v54 = vpop.eup %4308  ;;  %3610 = vst [vmem:[%s4560_s15 + $0x8] sm:$0xff] %v3531_v41   ;;  %v2906_v35 = vadd.f32 %v4886_v59, %v2867_v45  ;;  %v2830_v38 = vmul.f32 %v4307_v48, %v4740_v37  ;;  %v2773_v8 = vmax.f32 %v2724_v52, 1e-24 }
 0x4bf   : > { %v2831_v60 = vmul.f32 %v4309_v54, %v4750_v47  ;;  %4318 = vrsqrt.f32 %v2772_v51  ;;  %v2907_v11 = vadd.f32 %v4886_v59, %v2868_v56 }
 0x4c0   : > { %v3536_v61 = vpack.c.bf16 %v2906_v35, %v2905_v49  ;;  %v2869_v63 = vmul.f32 %v4876_v44, %v2830_v38  ;;  %4320 = vrsqrt.f32 %v2773_v8  ;;  %v2726_v7 = vpop.xlane.xlu1 %2725 }
 0x4c1   : > { %v4311_v9 = vpop.eup %4310  ;;  %v2870_v17 = vmul.f32 %v4876_v44, %v2831_v60  ;;  %v2774_v1 = vmax.f32 %v2726_v7, 1e-24  ;;  %v2728_v10 = vpop.xlane.xlu0 %2727 }
 0x4c2   : > { %v4313_v15 = vpop.eup %4312  ;;  %3611 = vst [vmem:[%s4560_s15 + $0x10] sm:$0xff] %v3536_v61   ;;  %v2908_v37 = vadd.f32 %v4886_v59, %v2869_v63  ;;  %v2832_v47 = vmul.f32 %v4311_v9, %v4756_v55  ;;  %v2775_v12 = vmax.f32 %v2728_v10, 1e-24 }
 0x4c3   : > { %v2833_v14 = vmul.f32 %v4313_v15, %v4762_v58  ;;  %4322 = vrsqrt.f32 %v2774_v1  ;;  %v2909_v25 = vadd.f32 %v4886_v59, %v2870_v17 }
 0x4c4   : > { %v3541_v20 = vpack.c.bf16 %v2908_v37, %v2907_v11  ;;  %v2871_v22 = vmul.f32 %v4876_v44, %v2832_v47  ;;  %4324 = vrsqrt.f32 %v2775_v12  ;;  %v2730_v23 = vpop.xlane.xlu1 %2729 }
 0x4c5   : > { %v4315_v24 = vpop.eup %4314  ;;  %v2776_v26 = vmax.f32 %v2730_v23, 1e-24  ;;  %v2732_v28 = vpop.xlane.xlu0 %2731  ;;  %v2872_v55 = vmul.f32 %v4876_v44, %v2833_v14 }
 0x4c6   : > { %v4317_v18 = vpop.eup %4316  ;;  %3612 = vst [vmem:[%s4560_s15 + $0x18] sm:$0xff] %v3541_v20   ;;  %v2910_v30 = vadd.f32 %v4886_v59, %v2871_v22  ;;  %v2834_v58 = vmul.f32 %v4315_v24, %v4760_v57  ;;  %v2777_v32 = vmax.f32 %v2732_v28, 1e-24 }
 0x4c7   : > { %v2835_v36 = vmul.f32 %v4317_v18, %v4770_v4  ;;  %4326 = vrsqrt.f32 %v2776_v26  ;;  %v2911_v52 = vadd.f32 %v4886_v59, %v2872_v55 }
 0x4c8   : > { %v3546_v27 = vpack.c.bf16 %v2910_v30, %v2909_v25  ;;  %v2873_v39 = vmul.f32 %v4876_v44, %v2834_v58  ;;  %4328 = vrsqrt.f32 %v2777_v32  ;;  %v2734_v41 = vpop.xlane.xlu1 %2733 }
 0x4c9   : > { %v4319_v45 = vpop.eup %4318  ;;  %v2874_v46 = vmul.f32 %v4876_v44, %v2835_v36  ;;  %v2778_v48 = vmax.f32 %v2734_v41, 1e-24  ;;  %v2736_v49 = vpop.xlane.xlu0 %2735 }
 0x4ca   : > { %v4321_v51 = vpop.eup %4320  ;;  %3613 = vst [vmem:[%s4560_s15 + $0x20] sm:$0xff] %v3546_v27   ;;  %v2912_v57 = vadd.f32 %v4886_v59, %v2873_v39  ;;  %v2836_v4 = vmul.f32 %v4319_v45, %v4776_v13  ;;  %v2779_v54 = vmax.f32 %v2736_v49, 1e-24 }
 0x4cb   : > { %v2837_v35 = vmul.f32 %v4321_v51, %v4782_v19  ;;  %4330 = vrsqrt.f32 %v2778_v48  ;;  %v2913_v61 = vadd.f32 %v4886_v59, %v2874_v46 }
 0x4cc   : > { %v3551_v56 = vpack.c.bf16 %v2912_v57, %v2911_v52  ;;  %v2875_v38 = vmul.f32 %v4876_v44, %v2836_v4  ;;  %4332 = vrsqrt.f32 %v2779_v54  ;;  %v2738_v8 = vpop.xlane.xlu1 %2737 }
 0x4cd   : > { %v4323_v60 = vpop.eup %4322  ;;  %v2780_v63 = vmax.f32 %v2738_v8, 1e-24  ;;  %v2740_v7 = vpop.xlane.xlu0 %2739  ;;  %v2876_v13 = vmul.f32 %v4876_v44, %v2837_v35 }
 0x4ce   : > { %v4325_v9 = vpop.eup %4324  ;;  %3614 = vst [vmem:[%s4560_s15 + $0x28] sm:$0xff] %v3551_v56   ;;  %v2914_v17 = vadd.f32 %v4886_v59, %v2875_v38  ;;  %v2838_v19 = vmul.f32 %v4323_v60, %v4780_v16  ;;  %v2781_v1 = vmax.f32 %v2740_v7, 1e-24 }
 0x4cf   : > { %v2839_v10 = vmul.f32 %v4325_v9, %v4790_v29  ;;  %4334 = vrsqrt.f32 %v2780_v63  ;;  %v2915_v23 = vadd.f32 %v4886_v59, %v2876_v13 }
 0x4d0   : > { %v3556_v15 = vpack.c.bf16 %v2914_v17, %v2913_v61  ;;  %v2877_v11 = vmul.f32 %v4876_v44, %v2838_v19  ;;  %4336 = vrsqrt.f32 %v2781_v1  ;;  %v2742_v37 = vpop.xlane.xlu1 %2741 }
 0x4d1   : > { %v4327_v47 = vpop.eup %4326  ;;  %v2878_v12 = vmul.f32 %v4876_v44, %v2839_v10  ;;  %v2782_v14 = vmax.f32 %v2742_v37, 1e-24  ;;  %v2744_v20 = vpop.xlane.xlu0 %2743 }
 0x4d2   : > { %v4329_v22 = vpop.eup %4328  ;;  %3615 = vst [vmem:[%s4560_s15 + $0x30] sm:$0xff] %v3556_v15   ;;  %v2916_v16 = vadd.f32 %v4886_v59, %v2877_v11  ;;  %v2840_v29 = vmul.f32 %v4327_v47, %v4796_v40  ;;  %v2783_v24 = vmax.f32 %v2744_v20, 1e-24 }
 0x4d3   : > { %v2841_v25 = vmul.f32 %v4329_v22, %v4802_v43  ;;  %4338 = vrsqrt.f32 %v2782_v14  ;;  %v2917_v55 = vadd.f32 %v4886_v59, %v2878_v12 }
 0x4d4   : > { %v3561_v26 = vpack.c.bf16 %v2916_v16, %v2915_v23  ;;  %v2879_v28 = vmul.f32 %v4876_v44, %v2840_v29  ;;  %4340 = vrsqrt.f32 %v2783_v24  ;;  %v2746_v18 = vpop.xlane.xlu1 %2745 }
 0x4d5   : > { %v4331_v30 = vpop.eup %4330  ;;  %v2784_v58 = vmax.f32 %v2746_v18, 1e-24  ;;  %v2748_v32 = vpop.xlane.xlu0 %2747  ;;  %v2880_v40 = vmul.f32 %v4876_v44, %v2841_v25 }
 0x4d6   : > { %v4333_v36 = vpop.eup %4332  ;;  %3616 = vst [vmem:[%s4560_s15 + $0x38] sm:$0xff] %v3561_v26   ;;  %v2918_v27 = vadd.f32 %v4886_v59, %v2879_v28  ;;  %v2842_v43 = vmul.f32 %v4331_v30, %v4800_v42  ;;  %v2785_v39 = vmax.f32 %v2748_v32, 1e-24 }
 0x4d7   : > { %v2843_v41 = vmul.f32 %v4333_v36, %v4810_v53  ;;  %4342 = vrsqrt.f32 %v2784_v58  ;;  %v2919_v54 = vadd.f32 %v4886_v59, %v2880_v40 }
 0x4d8   : > { %v3566_v45 = vpack.c.bf16 %v2918_v27, %v2917_v55  ;;  %v2881_v46 = vmul.f32 %v4876_v44, %v2842_v43  ;;  %4344 = vrsqrt.f32 %v2785_v39  ;;  %v2750_v48 = vpop.xlane.xlu1 %2749 }
 0x4d9   : > { %v4335_v49 = vpop.eup %4334  ;;  %v2882_v51 = vmul.f32 %v4876_v44, %v2843_v41  ;;  %v2786_v52 = vmax.f32 %v2750_v48, 1e-24  ;;  %v2752_v57 = vpop.xlane.xlu0 %2751 }
 0x4da   : > { %v4337_v4 = vpop.eup %4336  ;;  %3617 = vst [vmem:[%s4560_s15 + $0x40] sm:$0xff] %v3566_v45   ;;  %v2920_v42 = vadd.f32 %v4886_v59, %v2881_v46  ;;  %v2844_v53 = vmul.f32 %v4335_v49, %v4816_v0  ;;  %v2787_v35 = vmax.f32 %v2752_v57, 1e-24 }
 0x4db   : > { %v2845_v56 = vmul.f32 %v4337_v4, %v4822_v5  ;;  %4346 = vrsqrt.f32 %v2786_v52  ;;  %v2921_v63 = vadd.f32 %v4886_v59, %v2882_v51 }
 0x4dc   : > { %v3571_v38 = vpack.c.bf16 %v2920_v42, %v2919_v54  ;;  %v2883_v8 = vmul.f32 %v4876_v44, %v2844_v53  ;;  %4348 = vrsqrt.f32 %v2787_v35  ;;  %v2754_v60 = vpop.xlane.xlu1 %2753 }
 0x4dd   : > { %v4339_v61 = vpop.eup %4338  ;;  %v2788_v7 = vmax.f32 %v2754_v60, 1e-24  ;;  %v2756_v9 = vpop.xlane.xlu0 %2755  ;;  %v2884_v0 = vmul.f32 %v4876_v44, %v2845_v56 }
 0x4de   : > { %v4341_v17 = vpop.eup %4340  ;;  %3618 = vst [vmem:[%s4560_s15 + $0x48] sm:$0xff] %v3571_v38   ;;  %v2922_v13 = vadd.f32 %v4886_v59, %v2883_v8  ;;  %v2846_v5 = vmul.f32 %v4339_v61, %v4820_v3  ;;  %v2789_v19 = vmax.f32 %v2756_v9, 1e-24 }
 0x4df   : > { %v2847_v1 = vmul.f32 %v4341_v17, %v4830_v21  ;;  %4350 = vrsqrt.f32 %v2788_v7  ;;  %v2923_v14 = vadd.f32 %v4886_v59, %v2884_v0 }
 0x4e0   : > { %v3576_v10 = vpack.c.bf16 %v2922_v13, %v2921_v63  ;;  %v2885_v15 = vmul.f32 %v4876_v44, %v2846_v5  ;;  %4352 = vrsqrt.f32 %v2789_v19  ;;  %v2758_v11 = vpop.xlane.xlu1 %2757 }
 0x4e1   : > { %v4343_v37 = vpop.eup %4342  ;;  %v2790_v47 = vmax.f32 %v2758_v11, 1e-24  ;;  %v2886_v3 = vmul.f32 %v4876_v44, %v2847_v1 }
 0x4e2   : > { %v4345_v12 = vpop.eup %4344  ;;  %3619 = vst [vmem:[%s4560_s15 + $0x50] sm:$0xff] %v3576_v10   ;;  %v2924_v20 = vadd.f32 %v4886_v59, %v2885_v15  ;;  %v2848_v22 = vmul.f32 %v4343_v37, %v4836_v31 }
 0x4e3   : > { %v2849_v21 = vmul.f32 %v4345_v12, %v4842_v34  ;;  %4354 = vrsqrt.f32 %v2790_v47  ;;  %v2925_v25 = vadd.f32 %v4886_v59, %v2886_v3 }
 0x4e4   : > { %v3581_v23 = vpack.c.bf16 %v2924_v20, %v2923_v14  ;;  %v2887_v16 = vmul.f32 %v4876_v44, %v2848_v22 }
 0x4e5   : > { %v4347_v29 = vpop.eup %4346  ;;  %v2888_v28 = vmul.f32 %v4876_v44, %v2849_v21 }
 0x4e6   : > { %v4349_v24 = vpop.eup %4348  ;;  %3620 = vst [vmem:[%s4560_s15 + $0x58] sm:$0xff] %v3581_v23   ;;  %v2926_v26 = vadd.f32 %v4886_v59, %v2887_v16  ;;  %v2850_v18 = vmul.f32 %v4347_v29, %v4840_v33 }
 0x4e7   : > { %v2851_v31 = vmul.f32 %v4349_v24, %v4850_v50  ;;  %v2927_v32 = vadd.f32 %v4886_v59, %v2888_v28 }
 0x4e8   : > { %v3586_v34 = vpack.c.bf16 %v2926_v26, %v2925_v25  ;;  %v2889_v30 = vmul.f32 %v4876_v44, %v2850_v18 }
 0x4e9   : > { %v4351_v55 = vpop.eup %4350  ;;  %v2890_v27 = vmul.f32 %v4876_v44, %v2851_v31 }
 0x4ea   : > { %v4353_v58 = vpop.eup %4352  ;;  %3621 = vst [vmem:[%s4560_s15 + $0x60] sm:$0xff] %v3586_v34   ;;  %v2928_v36 = vadd.f32 %v4886_v59, %v2889_v30  ;;  %v2852_v40 = vmul.f32 %v4351_v55, %v4856_v62 }
 0x4eb   : > { %v2853_v33 = vmul.f32 %v4353_v58, %v4862_v6  ;;  %v2929_v41 = vadd.f32 %v4886_v59, %v2890_v27 }
 0x4ec   : > { %v3591_v43 = vpack.c.bf16 %v2928_v36, %v2927_v32  ;;  %v2891_v50 = vmul.f32 %v4876_v44, %v2852_v40 }
 0x4ed   : > { %v4355_v39 = vpop.eup %4354  ;;  %v2892_v46 = vmul.f32 %v4876_v44, %v2853_v33 }
 0x4ee   : > { %3622 = vst [vmem:[%s4560_s15 + $0x68] sm:$0xff] %v3591_v43   ;;  %v2930_v45 = vadd.f32 %v4886_v59, %v2891_v50  ;;  %v2854_v48 = vmul.f32 %v4355_v39, %v4860_v2 }
 0x4ef   : > { %v2931_v62 = vadd.f32 %v4886_v59, %v2892_v46 }
 0x4f0   : > { %v3596_v49 = vpack.c.bf16 %v2930_v45, %v2929_v41  ;;  %v2893_v51 = vmul.f32 %v4876_v44, %v2854_v48 }
 0x4f2   : > { %3623 = vst [vmem:[%s4560_s15 + $0x70] sm:$0xff] %v3596_v49   ;;  %v2932_v6 = vadd.f32 %v4886_v59, %v2893_v51 }
 0x4f4   : > { %v3601_v52 = vpack.c.bf16 %v2932_v6, %v2931_v62 }
 0x4f6   : > { %3624 = vst [vmem:[%s4560_s15 + $0x78] sm:$0xff] %v3601_v52  }
 0x4f7 PF: > { %s5030_s11 = sld [smem:[#allocation8_spill]]  ;;  %s5031_s1 = sld [smem:[#allocation7_spill]] }
 0x4f8   : > { %s5032_s22 = sld [smem:[#allocation9_spill]] }
 0x4fd   : > { %s30_s23 = sadd.s32 1, %s5030_s11  }
 0x4fe   : > { %p27_p10 = scmp.ge.s32.totalorder %s30_s23, 4  }
 0x500   :  { %29 = sbr.rel (!%p27_p10) target bundleno = 28 (0x1c), region = 119 }

</bundles_post_ra>
